<compile_context>
chip_gen: v7x
topology: tpu7x:2x2x1
jax: 0.10.0
libtpu: 0.0.40
codegen_flags: <defaults>
</compile_context>

<pallas_src>
import jax
import jax.numpy as jnp
from jax.experimental import pallas as pl
from jax.experimental.pallas import tpu as pltpu

BN_EPS = 1e-5
NORM_EPS = 1e-12
BLOCK_B = 128   # graphs per grid step


def _round_up(x, m):
    return (x + m - 1) // m * m


def _block_diag_weight(w, n):
    """(din, dout) -> (n*din, n*dout) with n copies of w on the diagonal."""
    din, dout = w.shape
    eye = jnp.eye(n, dtype=w.dtype)
    bd = eye[:, None, :, None] * w[None, :, None, :]            # (n, din, n, dout)
    return bd.reshape(n * din, n * dout)


@jax.jit
def gnn_forward(adj, node_attr, params):
    adj = adj.astype(jnp.float32)
    node_attr = node_attr.astype(jnp.float32)
    B, N, A = node_attr.shape
    D1 = params["w0"].shape[1]
    D2 = params["w1"].shape[1]
    D3 = params["w2"].shape[1]
    H0 = params["wf0"].shape[1]
    H1 = params["wf1"].shape[1]
    G = params["wf2"].shape[1]

    # ---- batch blocking: nb grid steps of Bt graphs each (Bt multiple of 8) ----
    nb = -(-B // BLOCK_B)
    Bt = _round_up(-(-B // nb), 8)
    B_pad = nb * Bt
    if B_pad != B:
        pad = B_pad - B
        adj = jnp.pad(adj, ((0, pad), (0, 0), (0, 0)))
        node_attr = jnp.pad(node_attr, ((0, pad), (0, 0), (0, 0)))

    adj2 = adj.reshape(B_pad, N * N)                  # lane c = m*N + n   (f32, compact)
    x2 = node_attr.reshape(B_pad, N * A)              # lane c = n*A + a   (batch-major)

    # ---- fold eval-mode BatchNorm1d into the block-diagonal Linear weights ----
    def fold_graph_layer(w, b, g, beta, m, v):
        din, dout = w.shape
        s = g / jnp.sqrt(v + BN_EPS)                  # (N,) per-node scale
        t = beta - m * s                              # (N,) per-node shift
        wbd = _block_diag_weight(w, N)                # (N*din, N*dout)
        s_col = jnp.repeat(s, dout)                   # scale per output column
        t_col = jnp.repeat(t, dout)
        b_col = jnp.tile(b, N)
        w_eff = (wbd * s_col[None, :]).astype(jnp.bfloat16)
        b_eff = (b_col * s_col + t_col).reshape(1, N * dout).astype(jnp.float32)
        return w_eff, b_eff

    w0e, b0e = fold_graph_layer(params["w0"], params["b0"], params["g0"],
                                params["be0"], params["m0"], params["v0"])
    w1e, b1e = fold_graph_layer(params["w1"], params["b1"], params["g1"],
                                params["be1"], params["m1"], params["v1"])
    w2e, b2e = fold_graph_layer(params["w2"], params["b2"], params["g2"],
                                params["be2"], params["m2"], params["v2"])

    wf0 = params["wf0"].astype(jnp.bfloat16)
    wf1 = params["wf1"].astype(jnp.bfloat16)
    wf2 = params["wf2"].astype(jnp.bfloat16)
    bf0 = params["bf0"].reshape(1, H0)
    bf1 = params["bf1"].reshape(1, H1)
    bf2 = params["bf2"].reshape(1, G)

    def kernel(adj_ref, x_ref,
               w0_ref, b0_ref, w1_ref, b1_ref, w2_ref, b2_ref,
               wf0_ref, bf0_ref, wf1_ref, bf1_ref, wf2_ref, bf2_ref,
               alpha_ref, out_ref):
        adj_f = adj_ref[...]                          # (Bt, N*N) f32
        h = x_ref[...]                                # (Bt, N*A) f32

        def dense(x, w_ref, b_ref):
            # bf16 matmul operands, f32 accumulation; bias/activations stay f32.
            return jnp.dot(x.astype(jnp.bfloat16), w_ref[...],
                           preferred_element_type=jnp.float32) + b_ref[...]

        def prelu(x, a):
            return jnp.where(x > 0, x, a * x)

        def message_pass(x, d):
            # torch.bmm(adj, x) on batch-major layout:
            #   out[b, m*d:(m+1)*d] = sum_n adj[b, m, n] * x[b, n*d:(n+1)*d]
            chunks = [x[:, n * d:(n + 1) * d] for n in range(N)]
            outs = []
            for m in range(N):
                acc = adj_f[:, m * N:m * N + 1] * chunks[0]
                for n in range(1, N):
                    acc = acc + adj_f[:, m * N + n:m * N + n + 1] * chunks[n]
                outs.append(acc)
            return jnp.concatenate(outs, axis=-1)

        h = message_pass(prelu(dense(h, w0_ref, b0_ref), alpha_ref[0]), D1)
        h = message_pass(prelu(dense(h, w1_ref, b1_ref), alpha_ref[1]), D2)
        h = message_pass(prelu(dense(h, w2_ref, b2_ref), alpha_ref[2]), D3)

        # flatten is free: h is already (Bt, N*D3) in torch's row-major flatten order
        f = prelu(dense(h, wf0_ref, bf0_ref), alpha_ref[3])
        # Dropout(0.3): identity in eval mode
        f = prelu(dense(f, wf1_ref, bf1_ref), alpha_ref[4])
        # Dropout(0.3): identity in eval mode
        f = dense(f, wf2_ref, bf2_ref)

        # F.normalize(p=2, dim=1)
        norm = jnp.sqrt(jnp.sum(f * f, axis=-1, keepdims=True))
        out_ref[...] = f / jnp.maximum(norm, NORM_EPS)

    inputs = [adj2, x2,
              w0e, b0e, w1e, b1e, w2e, b2e,
              wf0, bf0, wf1, bf1, wf2, bf2,
              params["alphas"]]

    def const_spec(a):
        nd = a.ndim
        return pl.BlockSpec(a.shape, lambda g, _n=nd: (0,) * _n)

    in_specs = [pl.BlockSpec((Bt, N * N), lambda g: (g, 0)),   # compact adjacency
                pl.BlockSpec((Bt, N * A), lambda g: (g, 0))]   # batch-major features
    in_specs += [const_spec(a) for a in inputs[2:-1]]          # resident weights/biases
    in_specs.append(pl.BlockSpec(memory_space=pltpu.MemorySpace.SMEM))  # PReLU slopes

    out = pl.pallas_call(
        kernel,
        out_shape=jax.ShapeDtypeStruct((B_pad, G), jnp.float32),
        grid_spec=pltpu.PrefetchScalarGridSpec(
            num_scalar_prefetch=0,
            grid=(nb,),
            in_specs=in_specs,
            out_specs=pl.BlockSpec((Bt, G), lambda g: (g, 0)),
        ),
        compiler_params=pltpu.CompilerParams(
            dimension_semantics=("parallel",)),
    )(*inputs)
    return out[:B]


def gnn_reference(adj, x, p):
    """Pure-JAX f32 reference of the same (eval-mode) forward pass."""
    hp = jax.lax.Precision.HIGHEST

    def bn(h, g, beta, m, v):
        s = g / jnp.sqrt(v + BN_EPS)
        return (h - m[None, :, None]) * s[None, :, None] + beta[None, :, None]

    def prelu(h, a):
        return jnp.where(h > 0, h, a * h)

    h = jnp.einsum("bna,ad->bnd", x, p["w0"], precision=hp) + p["b0"]
    h = prelu(bn(h, p["g0"], p["be0"], p["m0"], p["v0"]), p["alphas"][0])
    h = jnp.einsum("bmn,bnd->bmd", adj, h, precision=hp)

    h = jnp.einsum("bna,ad->bnd", h, p["w1"], precision=hp) + p["b1"]
    h = prelu(bn(h, p["g1"], p["be1"], p["m1"], p["v1"]), p["alphas"][1])
    h = jnp.einsum("bmn,bnd->bmd", adj, h, precision=hp)

    h = jnp.einsum("bna,ad->bnd", h, p["w2"], precision=hp) + p["b2"]
    h = prelu(bn(h, p["g2"], p["be2"], p["m2"], p["v2"]), p["alphas"][2])
    h = jnp.einsum("bmn,bnd->bmd", adj, h, precision=hp)

    f = h.reshape(h.shape[0], -1)
    f = prelu(jnp.dot(f, p["wf0"], precision=hp) + p["bf0"], p["alphas"][3])
    f = prelu(jnp.dot(f, p["wf1"], precision=hp) + p["bf1"], p["alphas"][4])
    f = jnp.dot(f, p["wf2"], precision=hp) + p["bf2"]
    norm = jnp.sqrt(jnp.sum(f * f, axis=1, keepdims=True))
    return f / jnp.maximum(norm, NORM_EPS)


def init_params(key, A, N, D1, D2, D3, G, H0=512, H1=256):
    ks = iter(jax.random.split(key, 40))

    def lin(din, dout):
        w = jax.random.normal(next(ks), (din, dout), jnp.float32) / jnp.sqrt(din)
        b = 0.01 * jax.random.normal(next(ks), (dout,), jnp.float32)
        return w, b

    def bn(n):
        g = 1.0 + 0.1 * jax.random.normal(next(ks), (n,), jnp.float32)
        beta = 0.1 * jax.random.normal(next(ks), (n,), jnp.float32)
        m = 0.1 * jax.random.normal(next(ks), (n,), jnp.float32)
        v = jax.random.uniform(next(ks), (n,), jnp.float32, 0.5, 1.5)
        return g, beta, m, v

    p = {}
    p["w0"], p["b0"] = lin(A, D1)
    p["g0"], p["be0"], p["m0"], p["v0"] = bn(N)
    p["w1"], p["b1"] = lin(D1, D2)
    p["g1"], p["be1"], p["m1"], p["v1"] = bn(N)
    p["w2"], p["b2"] = lin(D2, D3)
    p["g2"], p["be2"], p["m2"], p["v2"] = bn(N)
    p["wf0"], p["bf0"] = lin(N * D3, H0)
    p["wf1"], p["bf1"] = lin(H0, H1)
    p["wf2"], p["bf2"] = lin(H1, G)
    p["alphas"] = jnp.full((5,), 0.25, jnp.float32)  # PReLU default slopes
    return p


if __name__ == "__main__":
    key = jax.random.PRNGKey(0)
    k_adj, k_x, k_p = jax.random.split(key, 3)

    # args: max_node_num=8, atom_attr_dim=16, latent_dim1/2/3=32, gnn_out_dim=16
    B, N, A = 2, 8, 16
    D1 = D2 = D3 = 32
    G = 16

    adj = jax.random.bernoulli(k_adj, 0.4, (B, N, N)).astype(jnp.float32)
    node_attr = jax.random.normal(k_x, (B, N, A), jnp.float32)
    params = init_params(k_p, A, N, D1, D2, D3, G)

    out = gnn_forward(adj, node_attr, params)
    out = jax.block_until_ready(out)

    ref = gnn_reference(adj, node_attr, params)
    assert out.shape == (B, G)
    err = float(jnp.max(jnp.abs(out - ref)))
    if err < 5e-3:
        print("KERNEL_OK")
    else:
        print("MISMATCH max_abs_err =", err)
</pallas_src>

<mosaic_0001>
module attributes {stable_mosaic.version = 11 : i64} {
  func.func @kernel(%arg0: i32, %arg1: memref<8x64xf32, #tpu.memory_space<vmem>>, %arg2: memref<8x128xf32, #tpu.memory_space<vmem>>, %arg3: memref<128x256xbf16, #tpu.memory_space<vmem>>, %arg4: memref<1x256xf32, #tpu.memory_space<vmem>>, %arg5: memref<256x256xbf16, #tpu.memory_space<vmem>>, %arg6: memref<1x256xf32, #tpu.memory_space<vmem>>, %arg7: memref<256x256xbf16, #tpu.memory_space<vmem>>, %arg8: memref<1x256xf32, #tpu.memory_space<vmem>>, %arg9: memref<256x512xbf16, #tpu.memory_space<vmem>>, %arg10: memref<1x512xf32, #tpu.memory_space<vmem>>, %arg11: memref<512x256xbf16, #tpu.memory_space<vmem>>, %arg12: memref<1x256xf32, #tpu.memory_space<vmem>>, %arg13: memref<256x16xbf16, #tpu.memory_space<vmem>>, %arg14: memref<1x16xf32, #tpu.memory_space<vmem>>, %arg15: memref<5xf32, #tpu.memory_space<smem>>, %arg16: memref<8x16xf32, #tpu.memory_space<vmem>>) attributes {dimension_semantics = [#tpu.dimension_semantics<parallel>], iteration_bounds = array<i64: 1>, scalar_prefetch = 0 : i64, scratch_operands = 0 : i64, tpu.core_type = #tpu.core_type<tc>, window_params = [{transform_indices = @transform_0, window_bounds = array<i64: 8, 64>}, {transform_indices = @transform_1, window_bounds = array<i64: 8, 128>}, {pipeline_mode = #tpu.pipeline_mode<synchronous>, transform_indices = @transform_2, window_bounds = array<i64: 128, 256>}, {pipeline_mode = #tpu.pipeline_mode<synchronous>, transform_indices = @transform_3, window_bounds = array<i64: 1, 256>}, {pipeline_mode = #tpu.pipeline_mode<synchronous>, transform_indices = @transform_4, window_bounds = array<i64: 256, 256>}, {pipeline_mode = #tpu.pipeline_mode<synchronous>, transform_indices = @transform_5, window_bounds = array<i64: 1, 256>}, {pipeline_mode = #tpu.pipeline_mode<synchronous>, transform_indices = @transform_6, window_bounds = array<i64: 256, 256>}, {pipeline_mode = #tpu.pipeline_mode<synchronous>, transform_indices = @transform_7, window_bounds = array<i64: 1, 256>}, {pipeline_mode = #tpu.pipeline_mode<synchronous>, transform_indices = @transform_8, window_bounds = array<i64: 256, 512>}, {pipeline_mode = #tpu.pipeline_mode<synchronous>, transform_indices = @transform_9, window_bounds = array<i64: 1, 512>}, {pipeline_mode = #tpu.pipeline_mode<synchronous>, transform_indices = @transform_10, window_bounds = array<i64: 512, 256>}, {pipeline_mode = #tpu.pipeline_mode<synchronous>, transform_indices = @transform_11, window_bounds = array<i64: 1, 256>}, {pipeline_mode = #tpu.pipeline_mode<synchronous>, transform_indices = @transform_12, window_bounds = array<i64: 256, 16>}, {pipeline_mode = #tpu.pipeline_mode<synchronous>, transform_indices = @transform_13, window_bounds = array<i64: 1, 16>}, {transform_indices = @transform_14, window_bounds = array<i64: 5>}, {transform_indices = @transform_15, window_bounds = array<i64: 8, 16>}]} {
    %c0 = arith.constant 0 : index
    %c0_0 = arith.constant 0 : index
    %0 = vector.load %arg1[%c0, %c0_0] : memref<8x64xf32, #tpu.memory_space<vmem>>, vector<8x64xf32>
    %c0_1 = arith.constant 0 : index
    %c0_2 = arith.constant 0 : index
    %1 = vector.load %arg2[%c0_1, %c0_2] : memref<8x128xf32, #tpu.memory_space<vmem>>, vector<8x128xf32>
    %2 = arith.truncf %1 : vector<8x128xf32> to vector<8x128xbf16>
    %c0_3 = arith.constant 0 : index
    %c0_4 = arith.constant 0 : index
    %3 = vector.load %arg3[%c0_3, %c0_4] : memref<128x256xbf16, #tpu.memory_space<vmem>>, vector<128x256xbf16>
    %cst = arith.constant dense<0.000000e+00> : vector<8x256xf32>
    %4 = tpu.matmul %2, %3, %cst {dimension_numbers = #tpu.dot_dimension_numbers<[1], [0], [0], [1], [0, 0, 1, 1], [], []>} : vector<8x128xbf16>, vector<128x256xbf16>, vector<8x256xf32> -> vector<8x256xf32>
    %c0_5 = arith.constant 0 : index
    %c0_6 = arith.constant 0 : index
    %5 = vector.load %arg4[%c0_5, %c0_6] : memref<1x256xf32, #tpu.memory_space<vmem>>, vector<1x256xf32>
    %6 = vector.broadcast %5 : vector<1x256xf32> to vector<8x256xf32>
    %7 = arith.addf %4, %6 : vector<8x256xf32>
    %c0_7 = arith.constant 0 : index
    %8 = memref.load %arg15[%c0_7] : memref<5xf32, #tpu.memory_space<smem>>
    %cst_8 = arith.constant 0.000000e+00 : f32
    %9 = vector.broadcast %cst_8 : f32 to vector<8x256xf32>
    %10 = arith.cmpf ogt, %7, %9 : vector<8x256xf32>
    %11 = vector.broadcast %8 : f32 to vector<8x256xf32>
    %12 = arith.mulf %11, %7 : vector<8x256xf32>
    %13 = arith.select %10, %7, %12 : vector<8x256xi1>, vector<8x256xf32>
    %14 = vector.extract_strided_slice %13 {offsets = [0, 0], sizes = [8, 32], strides = [1, 1]} : vector<8x256xf32> to vector<8x32xf32>
    %15 = vector.extract_strided_slice %13 {offsets = [0, 32], sizes = [8, 32], strides = [1, 1]} : vector<8x256xf32> to vector<8x32xf32>
    %16 = vector.extract_strided_slice %13 {offsets = [0, 64], sizes = [8, 32], strides = [1, 1]} : vector<8x256xf32> to vector<8x32xf32>
    %17 = vector.extract_strided_slice %13 {offsets = [0, 96], sizes = [8, 32], strides = [1, 1]} : vector<8x256xf32> to vector<8x32xf32>
    %18 = vector.extract_strided_slice %13 {offsets = [0, 128], sizes = [8, 32], strides = [1, 1]} : vector<8x256xf32> to vector<8x32xf32>
    %19 = vector.extract_strided_slice %13 {offsets = [0, 160], sizes = [8, 32], strides = [1, 1]} : vector<8x256xf32> to vector<8x32xf32>
    %20 = vector.extract_strided_slice %13 {offsets = [0, 192], sizes = [8, 32], strides = [1, 1]} : vector<8x256xf32> to vector<8x32xf32>
    %21 = vector.extract_strided_slice %13 {offsets = [0, 224], sizes = [8, 32], strides = [1, 1]} : vector<8x256xf32> to vector<8x32xf32>
    %22 = vector.extract_strided_slice %0 {offsets = [0, 0], sizes = [8, 1], strides = [1, 1]} : vector<8x64xf32> to vector<8x1xf32>
    %23 = vector.broadcast %22 : vector<8x1xf32> to vector<8x32xf32>
    %24 = arith.mulf %23, %14 : vector<8x32xf32>
    %25 = vector.extract_strided_slice %0 {offsets = [0, 1], sizes = [8, 1], strides = [1, 1]} : vector<8x64xf32> to vector<8x1xf32>
    %26 = vector.broadcast %25 : vector<8x1xf32> to vector<8x32xf32>
    %27 = arith.mulf %26, %15 : vector<8x32xf32>
    %28 = arith.addf %24, %27 : vector<8x32xf32>
    %29 = vector.extract_strided_slice %0 {offsets = [0, 2], sizes = [8, 1], strides = [1, 1]} : vector<8x64xf32> to vector<8x1xf32>
    %30 = vector.broadcast %29 : vector<8x1xf32> to vector<8x32xf32>
    %31 = arith.mulf %30, %16 : vector<8x32xf32>
    %32 = arith.addf %28, %31 : vector<8x32xf32>
    %33 = vector.extract_strided_slice %0 {offsets = [0, 3], sizes = [8, 1], strides = [1, 1]} : vector<8x64xf32> to vector<8x1xf32>
    %34 = vector.broadcast %33 : vector<8x1xf32> to vector<8x32xf32>
    %35 = arith.mulf %34, %17 : vector<8x32xf32>
    %36 = arith.addf %32, %35 : vector<8x32xf32>
    %37 = vector.extract_strided_slice %0 {offsets = [0, 4], sizes = [8, 1], strides = [1, 1]} : vector<8x64xf32> to vector<8x1xf32>
    %38 = vector.broadcast %37 : vector<8x1xf32> to vector<8x32xf32>
    %39 = arith.mulf %38, %18 : vector<8x32xf32>
    %40 = arith.addf %36, %39 : vector<8x32xf32>
    %41 = vector.extract_strided_slice %0 {offsets = [0, 5], sizes = [8, 1], strides = [1, 1]} : vector<8x64xf32> to vector<8x1xf32>
    %42 = vector.broadcast %41 : vector<8x1xf32> to vector<8x32xf32>
    %43 = arith.mulf %42, %19 : vector<8x32xf32>
    %44 = arith.addf %40, %43 : vector<8x32xf32>
    %45 = vector.extract_strided_slice %0 {offsets = [0, 6], sizes = [8, 1], strides = [1, 1]} : vector<8x64xf32> to vector<8x1xf32>
    %46 = vector.broadcast %45 : vector<8x1xf32> to vector<8x32xf32>
    %47 = arith.mulf %46, %20 : vector<8x32xf32>
    %48 = arith.addf %44, %47 : vector<8x32xf32>
    %49 = vector.extract_strided_slice %0 {offsets = [0, 7], sizes = [8, 1], strides = [1, 1]} : vector<8x64xf32> to vector<8x1xf32>
    %50 = vector.broadcast %49 : vector<8x1xf32> to vector<8x32xf32>
    %51 = arith.mulf %50, %21 : vector<8x32xf32>
    %52 = arith.addf %48, %51 : vector<8x32xf32>
    %53 = vector.extract_strided_slice %0 {offsets = [0, 8], sizes = [8, 1], strides = [1, 1]} : vector<8x64xf32> to vector<8x1xf32>
    %54 = vector.broadcast %53 : vector<8x1xf32> to vector<8x32xf32>
    %55 = arith.mulf %54, %14 : vector<8x32xf32>
    %56 = vector.extract_strided_slice %0 {offsets = [0, 9], sizes = [8, 1], strides = [1, 1]} : vector<8x64xf32> to vector<8x1xf32>
    %57 = vector.broadcast %56 : vector<8x1xf32> to vector<8x32xf32>
    %58 = arith.mulf %57, %15 : vector<8x32xf32>
    %59 = arith.addf %55, %58 : vector<8x32xf32>
    %60 = vector.extract_strided_slice %0 {offsets = [0, 10], sizes = [8, 1], strides = [1, 1]} : vector<8x64xf32> to vector<8x1xf32>
    %61 = vector.broadcast %60 : vector<8x1xf32> to vector<8x32xf32>
    %62 = arith.mulf %61, %16 : vector<8x32xf32>
    %63 = arith.addf %59, %62 : vector<8x32xf32>
    %64 = vector.extract_strided_slice %0 {offsets = [0, 11], sizes = [8, 1], strides = [1, 1]} : vector<8x64xf32> to vector<8x1xf32>
    %65 = vector.broadcast %64 : vector<8x1xf32> to vector<8x32xf32>
    %66 = arith.mulf %65, %17 : vector<8x32xf32>
    %67 = arith.addf %63, %66 : vector<8x32xf32>
    %68 = vector.extract_strided_slice %0 {offsets = [0, 12], sizes = [8, 1], strides = [1, 1]} : vector<8x64xf32> to vector<8x1xf32>
    %69 = vector.broadcast %68 : vector<8x1xf32> to vector<8x32xf32>
    %70 = arith.mulf %69, %18 : vector<8x32xf32>
    %71 = arith.addf %67, %70 : vector<8x32xf32>
    %72 = vector.extract_strided_slice %0 {offsets = [0, 13], sizes = [8, 1], strides = [1, 1]} : vector<8x64xf32> to vector<8x1xf32>
    %73 = vector.broadcast %72 : vector<8x1xf32> to vector<8x32xf32>
    %74 = arith.mulf %73, %19 : vector<8x32xf32>
    %75 = arith.addf %71, %74 : vector<8x32xf32>
    %76 = vector.extract_strided_slice %0 {offsets = [0, 14], sizes = [8, 1], strides = [1, 1]} : vector<8x64xf32> to vector<8x1xf32>
    %77 = vector.broadcast %76 : vector<8x1xf32> to vector<8x32xf32>
    %78 = arith.mulf %77, %20 : vector<8x32xf32>
    %79 = arith.addf %75, %78 : vector<8x32xf32>
    %80 = vector.extract_strided_slice %0 {offsets = [0, 15], sizes = [8, 1], strides = [1, 1]} : vector<8x64xf32> to vector<8x1xf32>
    %81 = vector.broadcast %80 : vector<8x1xf32> to vector<8x32xf32>
    %82 = arith.mulf %81, %21 : vector<8x32xf32>
    %83 = arith.addf %79, %82 : vector<8x32xf32>
    %84 = vector.extract_strided_slice %0 {offsets = [0, 16], sizes = [8, 1], strides = [1, 1]} : vector<8x64xf32> to vector<8x1xf32>
    %85 = vector.broadcast %84 : vector<8x1xf32> to vector<8x32xf32>
    %86 = arith.mulf %85, %14 : vector<8x32xf32>
    %87 = vector.extract_strided_slice %0 {offsets = [0, 17], sizes = [8, 1], strides = [1, 1]} : vector<8x64xf32> to vector<8x1xf32>
    %88 = vector.broadcast %87 : vector<8x1xf32> to vector<8x32xf32>
    %89 = arith.mulf %88, %15 : vector<8x32xf32>
    %90 = arith.addf %86, %89 : vector<8x32xf32>
    %91 = vector.extract_strided_slice %0 {offsets = [0, 18], sizes = [8, 1], strides = [1, 1]} : vector<8x64xf32> to vector<8x1xf32>
    %92 = vector.broadcast %91 : vector<8x1xf32> to vector<8x32xf32>
    %93 = arith.mulf %92, %16 : vector<8x32xf32>
    %94 = arith.addf %90, %93 : vector<8x32xf32>
    %95 = vector.extract_strided_slice %0 {offsets = [0, 19], sizes = [8, 1], strides = [1, 1]} : vector<8x64xf32> to vector<8x1xf32>
    %96 = vector.broadcast %95 : vector<8x1xf32> to vector<8x32xf32>
    %97 = arith.mulf %96, %17 : vector<8x32xf32>
    %98 = arith.addf %94, %97 : vector<8x32xf32>
    %99 = vector.extract_strided_slice %0 {offsets = [0, 20], sizes = [8, 1], strides = [1, 1]} : vector<8x64xf32> to vector<8x1xf32>
    %100 = vector.broadcast %99 : vector<8x1xf32> to vector<8x32xf32>
    %101 = arith.mulf %100, %18 : vector<8x32xf32>
    %102 = arith.addf %98, %101 : vector<8x32xf32>
    %103 = vector.extract_strided_slice %0 {offsets = [0, 21], sizes = [8, 1], strides = [1, 1]} : vector<8x64xf32> to vector<8x1xf32>
    %104 = vector.broadcast %103 : vector<8x1xf32> to vector<8x32xf32>
    %105 = arith.mulf %104, %19 : vector<8x32xf32>
    %106 = arith.addf %102, %105 : vector<8x32xf32>
    %107 = vector.extract_strided_slice %0 {offsets = [0, 22], sizes = [8, 1], strides = [1, 1]} : vector<8x64xf32> to vector<8x1xf32>
    %108 = vector.broadcast %107 : vector<8x1xf32> to vector<8x32xf32>
    %109 = arith.mulf %108, %20 : vector<8x32xf32>
    %110 = arith.addf %106, %109 : vector<8x32xf32>
    %111 = vector.extract_strided_slice %0 {offsets = [0, 23], sizes = [8, 1], strides = [1, 1]} : vector<8x64xf32> to vector<8x1xf32>
    %112 = vector.broadcast %111 : vector<8x1xf32> to vector<8x32xf32>
    %113 = arith.mulf %112, %21 : vector<8x32xf32>
    %114 = arith.addf %110, %113 : vector<8x32xf32>
    %115 = vector.extract_strided_slice %0 {offsets = [0, 24], sizes = [8, 1], strides = [1, 1]} : vector<8x64xf32> to vector<8x1xf32>
    %116 = vector.broadcast %115 : vector<8x1xf32> to vector<8x32xf32>
    %117 = arith.mulf %116, %14 : vector<8x32xf32>
    %118 = vector.extract_strided_slice %0 {offsets = [0, 25], sizes = [8, 1], strides = [1, 1]} : vector<8x64xf32> to vector<8x1xf32>
    %119 = vector.broadcast %118 : vector<8x1xf32> to vector<8x32xf32>
    %120 = arith.mulf %119, %15 : vector<8x32xf32>
    %121 = arith.addf %117, %120 : vector<8x32xf32>
    %122 = vector.extract_strided_slice %0 {offsets = [0, 26], sizes = [8, 1], strides = [1, 1]} : vector<8x64xf32> to vector<8x1xf32>
    %123 = vector.broadcast %122 : vector<8x1xf32> to vector<8x32xf32>
    %124 = arith.mulf %123, %16 : vector<8x32xf32>
    %125 = arith.addf %121, %124 : vector<8x32xf32>
    %126 = vector.extract_strided_slice %0 {offsets = [0, 27], sizes = [8, 1], strides = [1, 1]} : vector<8x64xf32> to vector<8x1xf32>
    %127 = vector.broadcast %126 : vector<8x1xf32> to vector<8x32xf32>
    %128 = arith.mulf %127, %17 : vector<8x32xf32>
    %129 = arith.addf %125, %128 : vector<8x32xf32>
    %130 = vector.extract_strided_slice %0 {offsets = [0, 28], sizes = [8, 1], strides = [1, 1]} : vector<8x64xf32> to vector<8x1xf32>
    %131 = vector.broadcast %130 : vector<8x1xf32> to vector<8x32xf32>
    %132 = arith.mulf %131, %18 : vector<8x32xf32>
    %133 = arith.addf %129, %132 : vector<8x32xf32>
    %134 = vector.extract_strided_slice %0 {offsets = [0, 29], sizes = [8, 1], strides = [1, 1]} : vector<8x64xf32> to vector<8x1xf32>
    %135 = vector.broadcast %134 : vector<8x1xf32> to vector<8x32xf32>
    %136 = arith.mulf %135, %19 : vector<8x32xf32>
    %137 = arith.addf %133, %136 : vector<8x32xf32>
    %138 = vector.extract_strided_slice %0 {offsets = [0, 30], sizes = [8, 1], strides = [1, 1]} : vector<8x64xf32> to vector<8x1xf32>
    %139 = vector.broadcast %138 : vector<8x1xf32> to vector<8x32xf32>
    %140 = arith.mulf %139, %20 : vector<8x32xf32>
    %141 = arith.addf %137, %140 : vector<8x32xf32>
    %142 = vector.extract_strided_slice %0 {offsets = [0, 31], sizes = [8, 1], strides = [1, 1]} : vector<8x64xf32> to vector<8x1xf32>
    %143 = vector.broadcast %142 : vector<8x1xf32> to vector<8x32xf32>
    %144 = arith.mulf %143, %21 : vector<8x32xf32>
    %145 = arith.addf %141, %144 : vector<8x32xf32>
    %146 = vector.extract_strided_slice %0 {offsets = [0, 32], sizes = [8, 1], strides = [1, 1]} : vector<8x64xf32> to vector<8x1xf32>
    %147 = vector.broadcast %146 : vector<8x1xf32> to vector<8x32xf32>
    %148 = arith.mulf %147, %14 : vector<8x32xf32>
    %149 = vector.extract_strided_slice %0 {offsets = [0, 33], sizes = [8, 1], strides = [1, 1]} : vector<8x64xf32> to vector<8x1xf32>
    %150 = vector.broadcast %149 : vector<8x1xf32> to vector<8x32xf32>
    %151 = arith.mulf %150, %15 : vector<8x32xf32>
    %152 = arith.addf %148, %151 : vector<8x32xf32>
    %153 = vector.extract_strided_slice %0 {offsets = [0, 34], sizes = [8, 1], strides = [1, 1]} : vector<8x64xf32> to vector<8x1xf32>
    %154 = vector.broadcast %153 : vector<8x1xf32> to vector<8x32xf32>
    %155 = arith.mulf %154, %16 : vector<8x32xf32>
    %156 = arith.addf %152, %155 : vector<8x32xf32>
    %157 = vector.extract_strided_slice %0 {offsets = [0, 35], sizes = [8, 1], strides = [1, 1]} : vector<8x64xf32> to vector<8x1xf32>
    %158 = vector.broadcast %157 : vector<8x1xf32> to vector<8x32xf32>
    %159 = arith.mulf %158, %17 : vector<8x32xf32>
    %160 = arith.addf %156, %159 : vector<8x32xf32>
    %161 = vector.extract_strided_slice %0 {offsets = [0, 36], sizes = [8, 1], strides = [1, 1]} : vector<8x64xf32> to vector<8x1xf32>
    %162 = vector.broadcast %161 : vector<8x1xf32> to vector<8x32xf32>
    %163 = arith.mulf %162, %18 : vector<8x32xf32>
    %164 = arith.addf %160, %163 : vector<8x32xf32>
    %165 = vector.extract_strided_slice %0 {offsets = [0, 37], sizes = [8, 1], strides = [1, 1]} : vector<8x64xf32> to vector<8x1xf32>
    %166 = vector.broadcast %165 : vector<8x1xf32> to vector<8x32xf32>
    %167 = arith.mulf %166, %19 : vector<8x32xf32>
    %168 = arith.addf %164, %167 : vector<8x32xf32>
    %169 = vector.extract_strided_slice %0 {offsets = [0, 38], sizes = [8, 1], strides = [1, 1]} : vector<8x64xf32> to vector<8x1xf32>
    %170 = vector.broadcast %169 : vector<8x1xf32> to vector<8x32xf32>
    %171 = arith.mulf %170, %20 : vector<8x32xf32>
    %172 = arith.addf %168, %171 : vector<8x32xf32>
    %173 = vector.extract_strided_slice %0 {offsets = [0, 39], sizes = [8, 1], strides = [1, 1]} : vector<8x64xf32> to vector<8x1xf32>
    %174 = vector.broadcast %173 : vector<8x1xf32> to vector<8x32xf32>
    %175 = arith.mulf %174, %21 : vector<8x32xf32>
    %176 = arith.addf %172, %175 : vector<8x32xf32>
    %177 = vector.extract_strided_slice %0 {offsets = [0, 40], sizes = [8, 1], strides = [1, 1]} : vector<8x64xf32> to vector<8x1xf32>
    %178 = vector.broadcast %177 : vector<8x1xf32> to vector<8x32xf32>
    %179 = arith.mulf %178, %14 : vector<8x32xf32>
    %180 = vector.extract_strided_slice %0 {offsets = [0, 41], sizes = [8, 1], strides = [1, 1]} : vector<8x64xf32> to vector<8x1xf32>
    %181 = vector.broadcast %180 : vector<8x1xf32> to vector<8x32xf32>
    %182 = arith.mulf %181, %15 : vector<8x32xf32>
    %183 = arith.addf %179, %182 : vector<8x32xf32>
    %184 = vector.extract_strided_slice %0 {offsets = [0, 42], sizes = [8, 1], strides = [1, 1]} : vector<8x64xf32> to vector<8x1xf32>
    %185 = vector.broadcast %184 : vector<8x1xf32> to vector<8x32xf32>
    %186 = arith.mulf %185, %16 : vector<8x32xf32>
    %187 = arith.addf %183, %186 : vector<8x32xf32>
    %188 = vector.extract_strided_slice %0 {offsets = [0, 43], sizes = [8, 1], strides = [1, 1]} : vector<8x64xf32> to vector<8x1xf32>
    %189 = vector.broadcast %188 : vector<8x1xf32> to vector<8x32xf32>
    %190 = arith.mulf %189, %17 : vector<8x32xf32>
    %191 = arith.addf %187, %190 : vector<8x32xf32>
    %192 = vector.extract_strided_slice %0 {offsets = [0, 44], sizes = [8, 1], strides = [1, 1]} : vector<8x64xf32> to vector<8x1xf32>
    %193 = vector.broadcast %192 : vector<8x1xf32> to vector<8x32xf32>
    %194 = arith.mulf %193, %18 : vector<8x32xf32>
    %195 = arith.addf %191, %194 : vector<8x32xf32>
    %196 = vector.extract_strided_slice %0 {offsets = [0, 45], sizes = [8, 1], strides = [1, 1]} : vector<8x64xf32> to vector<8x1xf32>
    %197 = vector.broadcast %196 : vector<8x1xf32> to vector<8x32xf32>
    %198 = arith.mulf %197, %19 : vector<8x32xf32>
    %199 = arith.addf %195, %198 : vector<8x32xf32>
    %200 = vector.extract_strided_slice %0 {offsets = [0, 46], sizes = [8, 1], strides = [1, 1]} : vector<8x64xf32> to vector<8x1xf32>
    %201 = vector.broadcast %200 : vector<8x1xf32> to vector<8x32xf32>
    %202 = arith.mulf %201, %20 : vector<8x32xf32>
    %203 = arith.addf %199, %202 : vector<8x32xf32>
    %204 = vector.extract_strided_slice %0 {offsets = [0, 47], sizes = [8, 1], strides = [1, 1]} : vector<8x64xf32> to vector<8x1xf32>
    %205 = vector.broadcast %204 : vector<8x1xf32> to vector<8x32xf32>
    %206 = arith.mulf %205, %21 : vector<8x32xf32>
    %207 = arith.addf %203, %206 : vector<8x32xf32>
    %208 = vector.extract_strided_slice %0 {offsets = [0, 48], sizes = [8, 1], strides = [1, 1]} : vector<8x64xf32> to vector<8x1xf32>
    %209 = vector.broadcast %208 : vector<8x1xf32> to vector<8x32xf32>
    %210 = arith.mulf %209, %14 : vector<8x32xf32>
    %211 = vector.extract_strided_slice %0 {offsets = [0, 49], sizes = [8, 1], strides = [1, 1]} : vector<8x64xf32> to vector<8x1xf32>
    %212 = vector.broadcast %211 : vector<8x1xf32> to vector<8x32xf32>
    %213 = arith.mulf %212, %15 : vector<8x32xf32>
    %214 = arith.addf %210, %213 : vector<8x32xf32>
    %215 = vector.extract_strided_slice %0 {offsets = [0, 50], sizes = [8, 1], strides = [1, 1]} : vector<8x64xf32> to vector<8x1xf32>
    %216 = vector.broadcast %215 : vector<8x1xf32> to vector<8x32xf32>
    %217 = arith.mulf %216, %16 : vector<8x32xf32>
    %218 = arith.addf %214, %217 : vector<8x32xf32>
    %219 = vector.extract_strided_slice %0 {offsets = [0, 51], sizes = [8, 1], strides = [1, 1]} : vector<8x64xf32> to vector<8x1xf32>
    %220 = vector.broadcast %219 : vector<8x1xf32> to vector<8x32xf32>
    %221 = arith.mulf %220, %17 : vector<8x32xf32>
    %222 = arith.addf %218, %221 : vector<8x32xf32>
    %223 = vector.extract_strided_slice %0 {offsets = [0, 52], sizes = [8, 1], strides = [1, 1]} : vector<8x64xf32> to vector<8x1xf32>
    %224 = vector.broadcast %223 : vector<8x1xf32> to vector<8x32xf32>
    %225 = arith.mulf %224, %18 : vector<8x32xf32>
    %226 = arith.addf %222, %225 : vector<8x32xf32>
    %227 = vector.extract_strided_slice %0 {offsets = [0, 53], sizes = [8, 1], strides = [1, 1]} : vector<8x64xf32> to vector<8x1xf32>
    %228 = vector.broadcast %227 : vector<8x1xf32> to vector<8x32xf32>
    %229 = arith.mulf %228, %19 : vector<8x32xf32>
    %230 = arith.addf %226, %229 : vector<8x32xf32>
    %231 = vector.extract_strided_slice %0 {offsets = [0, 54], sizes = [8, 1], strides = [1, 1]} : vector<8x64xf32> to vector<8x1xf32>
    %232 = vector.broadcast %231 : vector<8x1xf32> to vector<8x32xf32>
    %233 = arith.mulf %232, %20 : vector<8x32xf32>
    %234 = arith.addf %230, %233 : vector<8x32xf32>
    %235 = vector.extract_strided_slice %0 {offsets = [0, 55], sizes = [8, 1], strides = [1, 1]} : vector<8x64xf32> to vector<8x1xf32>
    %236 = vector.broadcast %235 : vector<8x1xf32> to vector<8x32xf32>
    %237 = arith.mulf %236, %21 : vector<8x32xf32>
    %238 = arith.addf %234, %237 : vector<8x32xf32>
    %239 = vector.extract_strided_slice %0 {offsets = [0, 56], sizes = [8, 1], strides = [1, 1]} : vector<8x64xf32> to vector<8x1xf32>
    %240 = vector.broadcast %239 : vector<8x1xf32> to vector<8x32xf32>
    %241 = arith.mulf %240, %14 : vector<8x32xf32>
    %242 = vector.extract_strided_slice %0 {offsets = [0, 57], sizes = [8, 1], strides = [1, 1]} : vector<8x64xf32> to vector<8x1xf32>
    %243 = vector.broadcast %242 : vector<8x1xf32> to vector<8x32xf32>
    %244 = arith.mulf %243, %15 : vector<8x32xf32>
    %245 = arith.addf %241, %244 : vector<8x32xf32>
    %246 = vector.extract_strided_slice %0 {offsets = [0, 58], sizes = [8, 1], strides = [1, 1]} : vector<8x64xf32> to vector<8x1xf32>
    %247 = vector.broadcast %246 : vector<8x1xf32> to vector<8x32xf32>
    %248 = arith.mulf %247, %16 : vector<8x32xf32>
    %249 = arith.addf %245, %248 : vector<8x32xf32>
    %250 = vector.extract_strided_slice %0 {offsets = [0, 59], sizes = [8, 1], strides = [1, 1]} : vector<8x64xf32> to vector<8x1xf32>
    %251 = vector.broadcast %250 : vector<8x1xf32> to vector<8x32xf32>
    %252 = arith.mulf %251, %17 : vector<8x32xf32>
    %253 = arith.addf %249, %252 : vector<8x32xf32>
    %254 = vector.extract_strided_slice %0 {offsets = [0, 60], sizes = [8, 1], strides = [1, 1]} : vector<8x64xf32> to vector<8x1xf32>
    %255 = vector.broadcast %254 : vector<8x1xf32> to vector<8x32xf32>
    %256 = arith.mulf %255, %18 : vector<8x32xf32>
    %257 = arith.addf %253, %256 : vector<8x32xf32>
    %258 = vector.extract_strided_slice %0 {offsets = [0, 61], sizes = [8, 1], strides = [1, 1]} : vector<8x64xf32> to vector<8x1xf32>
    %259 = vector.broadcast %258 : vector<8x1xf32> to vector<8x32xf32>
    %260 = arith.mulf %259, %19 : vector<8x32xf32>
    %261 = arith.addf %257, %260 : vector<8x32xf32>
    %262 = vector.extract_strided_slice %0 {offsets = [0, 62], sizes = [8, 1], strides = [1, 1]} : vector<8x64xf32> to vector<8x1xf32>
    %263 = vector.broadcast %262 : vector<8x1xf32> to vector<8x32xf32>
    %264 = arith.mulf %263, %20 : vector<8x32xf32>
    %265 = arith.addf %261, %264 : vector<8x32xf32>
    %266 = vector.extract_strided_slice %0 {offsets = [0, 63], sizes = [8, 1], strides = [1, 1]} : vector<8x64xf32> to vector<8x1xf32>
    %267 = vector.broadcast %266 : vector<8x1xf32> to vector<8x32xf32>
    %268 = arith.mulf %267, %21 : vector<8x32xf32>
    %269 = arith.addf %265, %268 : vector<8x32xf32>
    %270 = tpu.concatenate %52, %83, %114, %145, %176, %207, %238, %269 in 1 : vector<8x32xf32>, vector<8x32xf32>, vector<8x32xf32>, vector<8x32xf32>, vector<8x32xf32>, vector<8x32xf32>, vector<8x32xf32>, vector<8x32xf32> -> vector<8x256xf32>
    %271 = arith.truncf %270 : vector<8x256xf32> to vector<8x256xbf16>
    %c0_9 = arith.constant 0 : index
    %c0_10 = arith.constant 0 : index
    %272 = vector.load %arg5[%c0_9, %c0_10] : memref<256x256xbf16, #tpu.memory_space<vmem>>, vector<256x256xbf16>
    %cst_11 = arith.constant dense<0.000000e+00> : vector<8x256xf32>
    %273 = tpu.matmul %271, %272, %cst_11 {dimension_numbers = #tpu.dot_dimension_numbers<[1], [0], [0], [1], [0, 0, 1, 1], [], []>} : vector<8x256xbf16>, vector<256x256xbf16>, vector<8x256xf32> -> vector<8x256xf32>
    %c0_12 = arith.constant 0 : index
    %c0_13 = arith.constant 0 : index
    %274 = vector.load %arg6[%c0_12, %c0_13] : memref<1x256xf32, #tpu.memory_space<vmem>>, vector<1x256xf32>
    %275 = vector.broadcast %274 : vector<1x256xf32> to vector<8x256xf32>
    %276 = arith.addf %273, %275 : vector<8x256xf32>
    %c1 = arith.constant 1 : index
    %277 = memref.load %arg15[%c1] : memref<5xf32, #tpu.memory_space<smem>>
    %cst_14 = arith.constant 0.000000e+00 : f32
    %278 = vector.broadcast %cst_14 : f32 to vector<8x256xf32>
    %279 = arith.cmpf ogt, %276, %278 : vector<8x256xf32>
    %280 = vector.broadcast %277 : f32 to vector<8x256xf32>
    %281 = arith.mulf %280, %276 : vector<8x256xf32>
    %282 = arith.select %279, %276, %281 : vector<8x256xi1>, vector<8x256xf32>
    %283 = vector.extract_strided_slice %282 {offsets = [0, 0], sizes = [8, 32], strides = [1, 1]} : vector<8x256xf32> to vector<8x32xf32>
    %284 = vector.extract_strided_slice %282 {offsets = [0, 32], sizes = [8, 32], strides = [1, 1]} : vector<8x256xf32> to vector<8x32xf32>
    %285 = vector.extract_strided_slice %282 {offsets = [0, 64], sizes = [8, 32], strides = [1, 1]} : vector<8x256xf32> to vector<8x32xf32>
    %286 = vector.extract_strided_slice %282 {offsets = [0, 96], sizes = [8, 32], strides = [1, 1]} : vector<8x256xf32> to vector<8x32xf32>
    %287 = vector.extract_strided_slice %282 {offsets = [0, 128], sizes = [8, 32], strides = [1, 1]} : vector<8x256xf32> to vector<8x32xf32>
    %288 = vector.extract_strided_slice %282 {offsets = [0, 160], sizes = [8, 32], strides = [1, 1]} : vector<8x256xf32> to vector<8x32xf32>
    %289 = vector.extract_strided_slice %282 {offsets = [0, 192], sizes = [8, 32], strides = [1, 1]} : vector<8x256xf32> to vector<8x32xf32>
    %290 = vector.extract_strided_slice %282 {offsets = [0, 224], sizes = [8, 32], strides = [1, 1]} : vector<8x256xf32> to vector<8x32xf32>
    %291 = vector.extract_strided_slice %0 {offsets = [0, 0], sizes = [8, 1], strides = [1, 1]} : vector<8x64xf32> to vector<8x1xf32>
    %292 = vector.broadcast %291 : vector<8x1xf32> to vector<8x32xf32>
    %293 = arith.mulf %292, %283 : vector<8x32xf32>
    %294 = vector.extract_strided_slice %0 {offsets = [0, 1], sizes = [8, 1], strides = [1, 1]} : vector<8x64xf32> to vector<8x1xf32>
    %295 = vector.broadcast %294 : vector<8x1xf32> to vector<8x32xf32>
    %296 = arith.mulf %295, %284 : vector<8x32xf32>
    %297 = arith.addf %293, %296 : vector<8x32xf32>
    %298 = vector.extract_strided_slice %0 {offsets = [0, 2], sizes = [8, 1], strides = [1, 1]} : vector<8x64xf32> to vector<8x1xf32>
    %299 = vector.broadcast %298 : vector<8x1xf32> to vector<8x32xf32>
    %300 = arith.mulf %299, %285 : vector<8x32xf32>
    %301 = arith.addf %297, %300 : vector<8x32xf32>
    %302 = vector.extract_strided_slice %0 {offsets = [0, 3], sizes = [8, 1], strides = [1, 1]} : vector<8x64xf32> to vector<8x1xf32>
    %303 = vector.broadcast %302 : vector<8x1xf32> to vector<8x32xf32>
    %304 = arith.mulf %303, %286 : vector<8x32xf32>
    %305 = arith.addf %301, %304 : vector<8x32xf32>
    %306 = vector.extract_strided_slice %0 {offsets = [0, 4], sizes = [8, 1], strides = [1, 1]} : vector<8x64xf32> to vector<8x1xf32>
    %307 = vector.broadcast %306 : vector<8x1xf32> to vector<8x32xf32>
    %308 = arith.mulf %307, %287 : vector<8x32xf32>
    %309 = arith.addf %305, %308 : vector<8x32xf32>
    %310 = vector.extract_strided_slice %0 {offsets = [0, 5], sizes = [8, 1], strides = [1, 1]} : vector<8x64xf32> to vector<8x1xf32>
    %311 = vector.broadcast %310 : vector<8x1xf32> to vector<8x32xf32>
    %312 = arith.mulf %311, %288 : vector<8x32xf32>
    %313 = arith.addf %309, %312 : vector<8x32xf32>
    %314 = vector.extract_strided_slice %0 {offsets = [0, 6], sizes = [8, 1], strides = [1, 1]} : vector<8x64xf32> to vector<8x1xf32>
    %315 = vector.broadcast %314 : vector<8x1xf32> to vector<8x32xf32>
    %316 = arith.mulf %315, %289 : vector<8x32xf32>
    %317 = arith.addf %313, %316 : vector<8x32xf32>
    %318 = vector.extract_strided_slice %0 {offsets = [0, 7], sizes = [8, 1], strides = [1, 1]} : vector<8x64xf32> to vector<8x1xf32>
    %319 = vector.broadcast %318 : vector<8x1xf32> to vector<8x32xf32>
    %320 = arith.mulf %319, %290 : vector<8x32xf32>
    %321 = arith.addf %317, %320 : vector<8x32xf32>
    %322 = vector.extract_strided_slice %0 {offsets = [0, 8], sizes = [8, 1], strides = [1, 1]} : vector<8x64xf32> to vector<8x1xf32>
    %323 = vector.broadcast %322 : vector<8x1xf32> to vector<8x32xf32>
    %324 = arith.mulf %323, %283 : vector<8x32xf32>
    %325 = vector.extract_strided_slice %0 {offsets = [0, 9], sizes = [8, 1], strides = [1, 1]} : vector<8x64xf32> to vector<8x1xf32>
    %326 = vector.broadcast %325 : vector<8x1xf32> to vector<8x32xf32>
    %327 = arith.mulf %326, %284 : vector<8x32xf32>
    %328 = arith.addf %324, %327 : vector<8x32xf32>
    %329 = vector.extract_strided_slice %0 {offsets = [0, 10], sizes = [8, 1], strides = [1, 1]} : vector<8x64xf32> to vector<8x1xf32>
    %330 = vector.broadcast %329 : vector<8x1xf32> to vector<8x32xf32>
    %331 = arith.mulf %330, %285 : vector<8x32xf32>
    %332 = arith.addf %328, %331 : vector<8x32xf32>
    %333 = vector.extract_strided_slice %0 {offsets = [0, 11], sizes = [8, 1], strides = [1, 1]} : vector<8x64xf32> to vector<8x1xf32>
    %334 = vector.broadcast %333 : vector<8x1xf32> to vector<8x32xf32>
    %335 = arith.mulf %334, %286 : vector<8x32xf32>
    %336 = arith.addf %332, %335 : vector<8x32xf32>
    %337 = vector.extract_strided_slice %0 {offsets = [0, 12], sizes = [8, 1], strides = [1, 1]} : vector<8x64xf32> to vector<8x1xf32>
    %338 = vector.broadcast %337 : vector<8x1xf32> to vector<8x32xf32>
    %339 = arith.mulf %338, %287 : vector<8x32xf32>
    %340 = arith.addf %336, %339 : vector<8x32xf32>
    %341 = vector.extract_strided_slice %0 {offsets = [0, 13], sizes = [8, 1], strides = [1, 1]} : vector<8x64xf32> to vector<8x1xf32>
    %342 = vector.broadcast %341 : vector<8x1xf32> to vector<8x32xf32>
    %343 = arith.mulf %342, %288 : vector<8x32xf32>
    %344 = arith.addf %340, %343 : vector<8x32xf32>
    %345 = vector.extract_strided_slice %0 {offsets = [0, 14], sizes = [8, 1], strides = [1, 1]} : vector<8x64xf32> to vector<8x1xf32>
    %346 = vector.broadcast %345 : vector<8x1xf32> to vector<8x32xf32>
    %347 = arith.mulf %346, %289 : vector<8x32xf32>
    %348 = arith.addf %344, %347 : vector<8x32xf32>
    %349 = vector.extract_strided_slice %0 {offsets = [0, 15], sizes = [8, 1], strides = [1, 1]} : vector<8x64xf32> to vector<8x1xf32>
    %350 = vector.broadcast %349 : vector<8x1xf32> to vector<8x32xf32>
    %351 = arith.mulf %350, %290 : vector<8x32xf32>
    %352 = arith.addf %348, %351 : vector<8x32xf32>
    %353 = vector.extract_strided_slice %0 {offsets = [0, 16], sizes = [8, 1], strides = [1, 1]} : vector<8x64xf32> to vector<8x1xf32>
    %354 = vector.broadcast %353 : vector<8x1xf32> to vector<8x32xf32>
    %355 = arith.mulf %354, %283 : vector<8x32xf32>
    %356 = vector.extract_strided_slice %0 {offsets = [0, 17], sizes = [8, 1], strides = [1, 1]} : vector<8x64xf32> to vector<8x1xf32>
    %357 = vector.broadcast %356 : vector<8x1xf32> to vector<8x32xf32>
    %358 = arith.mulf %357, %284 : vector<8x32xf32>
    %359 = arith.addf %355, %358 : vector<8x32xf32>
    %360 = vector.extract_strided_slice %0 {offsets = [0, 18], sizes = [8, 1], strides = [1, 1]} : vector<8x64xf32> to vector<8x1xf32>
    %361 = vector.broadcast %360 : vector<8x1xf32> to vector<8x32xf32>
    %362 = arith.mulf %361, %285 : vector<8x32xf32>
    %363 = arith.addf %359, %362 : vector<8x32xf32>
    %364 = vector.extract_strided_slice %0 {offsets = [0, 19], sizes = [8, 1], strides = [1, 1]} : vector<8x64xf32> to vector<8x1xf32>
    %365 = vector.broadcast %364 : vector<8x1xf32> to vector<8x32xf32>
    %366 = arith.mulf %365, %286 : vector<8x32xf32>
    %367 = arith.addf %363, %366 : vector<8x32xf32>
    %368 = vector.extract_strided_slice %0 {offsets = [0, 20], sizes = [8, 1], strides = [1, 1]} : vector<8x64xf32> to vector<8x1xf32>
    %369 = vector.broadcast %368 : vector<8x1xf32> to vector<8x32xf32>
    %370 = arith.mulf %369, %287 : vector<8x32xf32>
    %371 = arith.addf %367, %370 : vector<8x32xf32>
    %372 = vector.extract_strided_slice %0 {offsets = [0, 21], sizes = [8, 1], strides = [1, 1]} : vector<8x64xf32> to vector<8x1xf32>
    %373 = vector.broadcast %372 : vector<8x1xf32> to vector<8x32xf32>
    %374 = arith.mulf %373, %288 : vector<8x32xf32>
    %375 = arith.addf %371, %374 : vector<8x32xf32>
    %376 = vector.extract_strided_slice %0 {offsets = [0, 22], sizes = [8, 1], strides = [1, 1]} : vector<8x64xf32> to vector<8x1xf32>
    %377 = vector.broadcast %376 : vector<8x1xf32> to vector<8x32xf32>
    %378 = arith.mulf %377, %289 : vector<8x32xf32>
    %379 = arith.addf %375, %378 : vector<8x32xf32>
    %380 = vector.extract_strided_slice %0 {offsets = [0, 23], sizes = [8, 1], strides = [1, 1]} : vector<8x64xf32> to vector<8x1xf32>
    %381 = vector.broadcast %380 : vector<8x1xf32> to vector<8x32xf32>
    %382 = arith.mulf %381, %290 : vector<8x32xf32>
    %383 = arith.addf %379, %382 : vector<8x32xf32>
    %384 = vector.extract_strided_slice %0 {offsets = [0, 24], sizes = [8, 1], strides = [1, 1]} : vector<8x64xf32> to vector<8x1xf32>
    %385 = vector.broadcast %384 : vector<8x1xf32> to vector<8x32xf32>
    %386 = arith.mulf %385, %283 : vector<8x32xf32>
    %387 = vector.extract_strided_slice %0 {offsets = [0, 25], sizes = [8, 1], strides = [1, 1]} : vector<8x64xf32> to vector<8x1xf32>
    %388 = vector.broadcast %387 : vector<8x1xf32> to vector<8x32xf32>
    %389 = arith.mulf %388, %284 : vector<8x32xf32>
    %390 = arith.addf %386, %389 : vector<8x32xf32>
    %391 = vector.extract_strided_slice %0 {offsets = [0, 26], sizes = [8, 1], strides = [1, 1]} : vector<8x64xf32> to vector<8x1xf32>
    %392 = vector.broadcast %391 : vector<8x1xf32> to vector<8x32xf32>
    %393 = arith.mulf %392, %285 : vector<8x32xf32>
    %394 = arith.addf %390, %393 : vector<8x32xf32>
    %395 = vector.extract_strided_slice %0 {offsets = [0, 27], sizes = [8, 1], strides = [1, 1]} : vector<8x64xf32> to vector<8x1xf32>
    %396 = vector.broadcast %395 : vector<8x1xf32> to vector<8x32xf32>
    %397 = arith.mulf %396, %286 : vector<8x32xf32>
    %398 = arith.addf %394, %397 : vector<8x32xf32>
    %399 = vector.extract_strided_slice %0 {offsets = [0, 28], sizes = [8, 1], strides = [1, 1]} : vector<8x64xf32> to vector<8x1xf32>
    %400 = vector.broadcast %399 : vector<8x1xf32> to vector<8x32xf32>
    %401 = arith.mulf %400, %287 : vector<8x32xf32>
    %402 = arith.addf %398, %401 : vector<8x32xf32>
    %403 = vector.extract_strided_slice %0 {offsets = [0, 29], sizes = [8, 1], strides = [1, 1]} : vector<8x64xf32> to vector<8x1xf32>
    %404 = vector.broadcast %403 : vector<8x1xf32> to vector<8x32xf32>
    %405 = arith.mulf %404, %288 : vector<8x32xf32>
    %406 = arith.addf %402, %405 : vector<8x32xf32>
    %407 = vector.extract_strided_slice %0 {offsets = [0, 30], sizes = [8, 1], strides = [1, 1]} : vector<8x64xf32> to vector<8x1xf32>
    %408 = vector.broadcast %407 : vector<8x1xf32> to vector<8x32xf32>
    %409 = arith.mulf %408, %289 : vector<8x32xf32>
    %410 = arith.addf %406, %409 : vector<8x32xf32>
    %411 = vector.extract_strided_slice %0 {offsets = [0, 31], sizes = [8, 1], strides = [1, 1]} : vector<8x64xf32> to vector<8x1xf32>
    %412 = vector.broadcast %411 : vector<8x1xf32> to vector<8x32xf32>
    %413 = arith.mulf %412, %290 : vector<8x32xf32>
    %414 = arith.addf %410, %413 : vector<8x32xf32>
    %415 = vector.extract_strided_slice %0 {offsets = [0, 32], sizes = [8, 1], strides = [1, 1]} : vector<8x64xf32> to vector<8x1xf32>
    %416 = vector.broadcast %415 : vector<8x1xf32> to vector<8x32xf32>
    %417 = arith.mulf %416, %283 : vector<8x32xf32>
    %418 = vector.extract_strided_slice %0 {offsets = [0, 33], sizes = [8, 1], strides = [1, 1]} : vector<8x64xf32> to vector<8x1xf32>
    %419 = vector.broadcast %418 : vector<8x1xf32> to vector<8x32xf32>
    %420 = arith.mulf %419, %284 : vector<8x32xf32>
    %421 = arith.addf %417, %420 : vector<8x32xf32>
    %422 = vector.extract_strided_slice %0 {offsets = [0, 34], sizes = [8, 1], strides = [1, 1]} : vector<8x64xf32> to vector<8x1xf32>
    %423 = vector.broadcast %422 : vector<8x1xf32> to vector<8x32xf32>
    %424 = arith.mulf %423, %285 : vector<8x32xf32>
    %425 = arith.addf %421, %424 : vector<8x32xf32>
    %426 = vector.extract_strided_slice %0 {offsets = [0, 35], sizes = [8, 1], strides = [1, 1]} : vector<8x64xf32> to vector<8x1xf32>
    %427 = vector.broadcast %426 : vector<8x1xf32> to vector<8x32xf32>
    %428 = arith.mulf %427, %286 : vector<8x32xf32>
    %429 = arith.addf %425, %428 : vector<8x32xf32>
    %430 = vector.extract_strided_slice %0 {offsets = [0, 36], sizes = [8, 1], strides = [1, 1]} : vector<8x64xf32> to vector<8x1xf32>
    %431 = vector.broadcast %430 : vector<8x1xf32> to vector<8x32xf32>
    %432 = arith.mulf %431, %287 : vector<8x32xf32>
    %433 = arith.addf %429, %432 : vector<8x32xf32>
    %434 = vector.extract_strided_slice %0 {offsets = [0, 37], sizes = [8, 1], strides = [1, 1]} : vector<8x64xf32> to vector<8x1xf32>
    %435 = vector.broadcast %434 : vector<8x1xf32> to vector<8x32xf32>
    %436 = arith.mulf %435, %288 : vector<8x32xf32>
    %437 = arith.addf %433, %436 : vector<8x32xf32>
    %438 = vector.extract_strided_slice %0 {offsets = [0, 38], sizes = [8, 1], strides = [1, 1]} : vector<8x64xf32> to vector<8x1xf32>
    %439 = vector.broadcast %438 : vector<8x1xf32> to vector<8x32xf32>
    %440 = arith.mulf %439, %289 : vector<8x32xf32>
    %441 = arith.addf %437, %440 : vector<8x32xf32>
    %442 = vector.extract_strided_slice %0 {offsets = [0, 39], sizes = [8, 1], strides = [1, 1]} : vector<8x64xf32> to vector<8x1xf32>
    %443 = vector.broadcast %442 : vector<8x1xf32> to vector<8x32xf32>
    %444 = arith.mulf %443, %290 : vector<8x32xf32>
    %445 = arith.addf %441, %444 : vector<8x32xf32>
    %446 = vector.extract_strided_slice %0 {offsets = [0, 40], sizes = [8, 1], strides = [1, 1]} : vector<8x64xf32> to vector<8x1xf32>
    %447 = vector.broadcast %446 : vector<8x1xf32> to vector<8x32xf32>
    %448 = arith.mulf %447, %283 : vector<8x32xf32>
    %449 = vector.extract_strided_slice %0 {offsets = [0, 41], sizes = [8, 1], strides = [1, 1]} : vector<8x64xf32> to vector<8x1xf32>
    %450 = vector.broadcast %449 : vector<8x1xf32> to vector<8x32xf32>
    %451 = arith.mulf %450, %284 : vector<8x32xf32>
    %452 = arith.addf %448, %451 : vector<8x32xf32>
    %453 = vector.extract_strided_slice %0 {offsets = [0, 42], sizes = [8, 1], strides = [1, 1]} : vector<8x64xf32> to vector<8x1xf32>
    %454 = vector.broadcast %453 : vector<8x1xf32> to vector<8x32xf32>
    %455 = arith.mulf %454, %285 : vector<8x32xf32>
    %456 = arith.addf %452, %455 : vector<8x32xf32>
    %457 = vector.extract_strided_slice %0 {offsets = [0, 43], sizes = [8, 1], strides = [1, 1]} : vector<8x64xf32> to vector<8x1xf32>
    %458 = vector.broadcast %457 : vector<8x1xf32> to vector<8x32xf32>
    %459 = arith.mulf %458, %286 : vector<8x32xf32>
    %460 = arith.addf %456, %459 : vector<8x32xf32>
    %461 = vector.extract_strided_slice %0 {offsets = [0, 44], sizes = [8, 1], strides = [1, 1]} : vector<8x64xf32> to vector<8x1xf32>
    %462 = vector.broadcast %461 : vector<8x1xf32> to vector<8x32xf32>
    %463 = arith.mulf %462, %287 : vector<8x32xf32>
    %464 = arith.addf %460, %463 : vector<8x32xf32>
    %465 = vector.extract_strided_slice %0 {offsets = [0, 45], sizes = [8, 1], strides = [1, 1]} : vector<8x64xf32> to vector<8x1xf32>
    %466 = vector.broadcast %465 : vector<8x1xf32> to vector<8x32xf32>
    %467 = arith.mulf %466, %288 : vector<8x32xf32>
    %468 = arith.addf %464, %467 : vector<8x32xf32>
    %469 = vector.extract_strided_slice %0 {offsets = [0, 46], sizes = [8, 1], strides = [1, 1]} : vector<8x64xf32> to vector<8x1xf32>
    %470 = vector.broadcast %469 : vector<8x1xf32> to vector<8x32xf32>
    %471 = arith.mulf %470, %289 : vector<8x32xf32>
    %472 = arith.addf %468, %471 : vector<8x32xf32>
    %473 = vector.extract_strided_slice %0 {offsets = [0, 47], sizes = [8, 1], strides = [1, 1]} : vector<8x64xf32> to vector<8x1xf32>
    %474 = vector.broadcast %473 : vector<8x1xf32> to vector<8x32xf32>
    %475 = arith.mulf %474, %290 : vector<8x32xf32>
    %476 = arith.addf %472, %475 : vector<8x32xf32>
    %477 = vector.extract_strided_slice %0 {offsets = [0, 48], sizes = [8, 1], strides = [1, 1]} : vector<8x64xf32> to vector<8x1xf32>
    %478 = vector.broadcast %477 : vector<8x1xf32> to vector<8x32xf32>
    %479 = arith.mulf %478, %283 : vector<8x32xf32>
    %480 = vector.extract_strided_slice %0 {offsets = [0, 49], sizes = [8, 1], strides = [1, 1]} : vector<8x64xf32> to vector<8x1xf32>
    %481 = vector.broadcast %480 : vector<8x1xf32> to vector<8x32xf32>
    %482 = arith.mulf %481, %284 : vector<8x32xf32>
    %483 = arith.addf %479, %482 : vector<8x32xf32>
    %484 = vector.extract_strided_slice %0 {offsets = [0, 50], sizes = [8, 1], strides = [1, 1]} : vector<8x64xf32> to vector<8x1xf32>
    %485 = vector.broadcast %484 : vector<8x1xf32> to vector<8x32xf32>
    %486 = arith.mulf %485, %285 : vector<8x32xf32>
    %487 = arith.addf %483, %486 : vector<8x32xf32>
    %488 = vector.extract_strided_slice %0 {offsets = [0, 51], sizes = [8, 1], strides = [1, 1]} : vector<8x64xf32> to vector<8x1xf32>
    %489 = vector.broadcast %488 : vector<8x1xf32> to vector<8x32xf32>
    %490 = arith.mulf %489, %286 : vector<8x32xf32>
    %491 = arith.addf %487, %490 : vector<8x32xf32>
    %492 = vector.extract_strided_slice %0 {offsets = [0, 52], sizes = [8, 1], strides = [1, 1]} : vector<8x64xf32> to vector<8x1xf32>
    %493 = vector.broadcast %492 : vector<8x1xf32> to vector<8x32xf32>
    %494 = arith.mulf %493, %287 : vector<8x32xf32>
    %495 = arith.addf %491, %494 : vector<8x32xf32>
    %496 = vector.extract_strided_slice %0 {offsets = [0, 53], sizes = [8, 1], strides = [1, 1]} : vector<8x64xf32> to vector<8x1xf32>
    %497 = vector.broadcast %496 : vector<8x1xf32> to vector<8x32xf32>
    %498 = arith.mulf %497, %288 : vector<8x32xf32>
    %499 = arith.addf %495, %498 : vector<8x32xf32>
    %500 = vector.extract_strided_slice %0 {offsets = [0, 54], sizes = [8, 1], strides = [1, 1]} : vector<8x64xf32> to vector<8x1xf32>
    %501 = vector.broadcast %500 : vector<8x1xf32> to vector<8x32xf32>
    %502 = arith.mulf %501, %289 : vector<8x32xf32>
    %503 = arith.addf %499, %502 : vector<8x32xf32>
    %504 = vector.extract_strided_slice %0 {offsets = [0, 55], sizes = [8, 1], strides = [1, 1]} : vector<8x64xf32> to vector<8x1xf32>
    %505 = vector.broadcast %504 : vector<8x1xf32> to vector<8x32xf32>
    %506 = arith.mulf %505, %290 : vector<8x32xf32>
    %507 = arith.addf %503, %506 : vector<8x32xf32>
    %508 = vector.extract_strided_slice %0 {offsets = [0, 56], sizes = [8, 1], strides = [1, 1]} : vector<8x64xf32> to vector<8x1xf32>
    %509 = vector.broadcast %508 : vector<8x1xf32> to vector<8x32xf32>
    %510 = arith.mulf %509, %283 : vector<8x32xf32>
    %511 = vector.extract_strided_slice %0 {offsets = [0, 57], sizes = [8, 1], strides = [1, 1]} : vector<8x64xf32> to vector<8x1xf32>
    %512 = vector.broadcast %511 : vector<8x1xf32> to vector<8x32xf32>
    %513 = arith.mulf %512, %284 : vector<8x32xf32>
    %514 = arith.addf %510, %513 : vector<8x32xf32>
    %515 = vector.extract_strided_slice %0 {offsets = [0, 58], sizes = [8, 1], strides = [1, 1]} : vector<8x64xf32> to vector<8x1xf32>
    %516 = vector.broadcast %515 : vector<8x1xf32> to vector<8x32xf32>
    %517 = arith.mulf %516, %285 : vector<8x32xf32>
    %518 = arith.addf %514, %517 : vector<8x32xf32>
    %519 = vector.extract_strided_slice %0 {offsets = [0, 59], sizes = [8, 1], strides = [1, 1]} : vector<8x64xf32> to vector<8x1xf32>
    %520 = vector.broadcast %519 : vector<8x1xf32> to vector<8x32xf32>
    %521 = arith.mulf %520, %286 : vector<8x32xf32>
    %522 = arith.addf %518, %521 : vector<8x32xf32>
    %523 = vector.extract_strided_slice %0 {offsets = [0, 60], sizes = [8, 1], strides = [1, 1]} : vector<8x64xf32> to vector<8x1xf32>
    %524 = vector.broadcast %523 : vector<8x1xf32> to vector<8x32xf32>
    %525 = arith.mulf %524, %287 : vector<8x32xf32>
    %526 = arith.addf %522, %525 : vector<8x32xf32>
    %527 = vector.extract_strided_slice %0 {offsets = [0, 61], sizes = [8, 1], strides = [1, 1]} : vector<8x64xf32> to vector<8x1xf32>
    %528 = vector.broadcast %527 : vector<8x1xf32> to vector<8x32xf32>
    %529 = arith.mulf %528, %288 : vector<8x32xf32>
    %530 = arith.addf %526, %529 : vector<8x32xf32>
    %531 = vector.extract_strided_slice %0 {offsets = [0, 62], sizes = [8, 1], strides = [1, 1]} : vector<8x64xf32> to vector<8x1xf32>
    %532 = vector.broadcast %531 : vector<8x1xf32> to vector<8x32xf32>
    %533 = arith.mulf %532, %289 : vector<8x32xf32>
    %534 = arith.addf %530, %533 : vector<8x32xf32>
    %535 = vector.extract_strided_slice %0 {offsets = [0, 63], sizes = [8, 1], strides = [1, 1]} : vector<8x64xf32> to vector<8x1xf32>
    %536 = vector.broadcast %535 : vector<8x1xf32> to vector<8x32xf32>
    %537 = arith.mulf %536, %290 : vector<8x32xf32>
    %538 = arith.addf %534, %537 : vector<8x32xf32>
    %539 = tpu.concatenate %321, %352, %383, %414, %445, %476, %507, %538 in 1 : vector<8x32xf32>, vector<8x32xf32>, vector<8x32xf32>, vector<8x32xf32>, vector<8x32xf32>, vector<8x32xf32>, vector<8x32xf32>, vector<8x32xf32> -> vector<8x256xf32>
    %540 = arith.truncf %539 : vector<8x256xf32> to vector<8x256xbf16>
    %c0_15 = arith.constant 0 : index
    %c0_16 = arith.constant 0 : index
    %541 = vector.load %arg7[%c0_15, %c0_16] : memref<256x256xbf16, #tpu.memory_space<vmem>>, vector<256x256xbf16>
    %cst_17 = arith.constant dense<0.000000e+00> : vector<8x256xf32>
    %542 = tpu.matmul %540, %541, %cst_17 {dimension_numbers = #tpu.dot_dimension_numbers<[1], [0], [0], [1], [0, 0, 1, 1], [], []>} : vector<8x256xbf16>, vector<256x256xbf16>, vector<8x256xf32> -> vector<8x256xf32>
    %c0_18 = arith.constant 0 : index
    %c0_19 = arith.constant 0 : index
    %543 = vector.load %arg8[%c0_18, %c0_19] : memref<1x256xf32, #tpu.memory_space<vmem>>, vector<1x256xf32>
    %544 = vector.broadcast %543 : vector<1x256xf32> to vector<8x256xf32>
    %545 = arith.addf %542, %544 : vector<8x256xf32>
    %c2 = arith.constant 2 : index
    %546 = memref.load %arg15[%c2] : memref<5xf32, #tpu.memory_space<smem>>
    %cst_20 = arith.constant 0.000000e+00 : f32
    %547 = vector.broadcast %cst_20 : f32 to vector<8x256xf32>
    %548 = arith.cmpf ogt, %545, %547 : vector<8x256xf32>
    %549 = vector.broadcast %546 : f32 to vector<8x256xf32>
    %550 = arith.mulf %549, %545 : vector<8x256xf32>
    %551 = arith.select %548, %545, %550 : vector<8x256xi1>, vector<8x256xf32>
    %552 = vector.extract_strided_slice %551 {offsets = [0, 0], sizes = [8, 32], strides = [1, 1]} : vector<8x256xf32> to vector<8x32xf32>
    %553 = vector.extract_strided_slice %551 {offsets = [0, 32], sizes = [8, 32], strides = [1, 1]} : vector<8x256xf32> to vector<8x32xf32>
    %554 = vector.extract_strided_slice %551 {offsets = [0, 64], sizes = [8, 32], strides = [1, 1]} : vector<8x256xf32> to vector<8x32xf32>
    %555 = vector.extract_strided_slice %551 {offsets = [0, 96], sizes = [8, 32], strides = [1, 1]} : vector<8x256xf32> to vector<8x32xf32>
    %556 = vector.extract_strided_slice %551 {offsets = [0, 128], sizes = [8, 32], strides = [1, 1]} : vector<8x256xf32> to vector<8x32xf32>
    %557 = vector.extract_strided_slice %551 {offsets = [0, 160], sizes = [8, 32], strides = [1, 1]} : vector<8x256xf32> to vector<8x32xf32>
    %558 = vector.extract_strided_slice %551 {offsets = [0, 192], sizes = [8, 32], strides = [1, 1]} : vector<8x256xf32> to vector<8x32xf32>
    %559 = vector.extract_strided_slice %551 {offsets = [0, 224], sizes = [8, 32], strides = [1, 1]} : vector<8x256xf32> to vector<8x32xf32>
    %560 = vector.extract_strided_slice %0 {offsets = [0, 0], sizes = [8, 1], strides = [1, 1]} : vector<8x64xf32> to vector<8x1xf32>
    %561 = vector.broadcast %560 : vector<8x1xf32> to vector<8x32xf32>
    %562 = arith.mulf %561, %552 : vector<8x32xf32>
    %563 = vector.extract_strided_slice %0 {offsets = [0, 1], sizes = [8, 1], strides = [1, 1]} : vector<8x64xf32> to vector<8x1xf32>
    %564 = vector.broadcast %563 : vector<8x1xf32> to vector<8x32xf32>
    %565 = arith.mulf %564, %553 : vector<8x32xf32>
    %566 = arith.addf %562, %565 : vector<8x32xf32>
    %567 = vector.extract_strided_slice %0 {offsets = [0, 2], sizes = [8, 1], strides = [1, 1]} : vector<8x64xf32> to vector<8x1xf32>
    %568 = vector.broadcast %567 : vector<8x1xf32> to vector<8x32xf32>
    %569 = arith.mulf %568, %554 : vector<8x32xf32>
    %570 = arith.addf %566, %569 : vector<8x32xf32>
    %571 = vector.extract_strided_slice %0 {offsets = [0, 3], sizes = [8, 1], strides = [1, 1]} : vector<8x64xf32> to vector<8x1xf32>
    %572 = vector.broadcast %571 : vector<8x1xf32> to vector<8x32xf32>
    %573 = arith.mulf %572, %555 : vector<8x32xf32>
    %574 = arith.addf %570, %573 : vector<8x32xf32>
    %575 = vector.extract_strided_slice %0 {offsets = [0, 4], sizes = [8, 1], strides = [1, 1]} : vector<8x64xf32> to vector<8x1xf32>
    %576 = vector.broadcast %575 : vector<8x1xf32> to vector<8x32xf32>
    %577 = arith.mulf %576, %556 : vector<8x32xf32>
    %578 = arith.addf %574, %577 : vector<8x32xf32>
    %579 = vector.extract_strided_slice %0 {offsets = [0, 5], sizes = [8, 1], strides = [1, 1]} : vector<8x64xf32> to vector<8x1xf32>
    %580 = vector.broadcast %579 : vector<8x1xf32> to vector<8x32xf32>
    %581 = arith.mulf %580, %557 : vector<8x32xf32>
    %582 = arith.addf %578, %581 : vector<8x32xf32>
    %583 = vector.extract_strided_slice %0 {offsets = [0, 6], sizes = [8, 1], strides = [1, 1]} : vector<8x64xf32> to vector<8x1xf32>
    %584 = vector.broadcast %583 : vector<8x1xf32> to vector<8x32xf32>
    %585 = arith.mulf %584, %558 : vector<8x32xf32>
    %586 = arith.addf %582, %585 : vector<8x32xf32>
    %587 = vector.extract_strided_slice %0 {offsets = [0, 7], sizes = [8, 1], strides = [1, 1]} : vector<8x64xf32> to vector<8x1xf32>
    %588 = vector.broadcast %587 : vector<8x1xf32> to vector<8x32xf32>
    %589 = arith.mulf %588, %559 : vector<8x32xf32>
    %590 = arith.addf %586, %589 : vector<8x32xf32>
    %591 = vector.extract_strided_slice %0 {offsets = [0, 8], sizes = [8, 1], strides = [1, 1]} : vector<8x64xf32> to vector<8x1xf32>
    %592 = vector.broadcast %591 : vector<8x1xf32> to vector<8x32xf32>
    %593 = arith.mulf %592, %552 : vector<8x32xf32>
    %594 = vector.extract_strided_slice %0 {offsets = [0, 9], sizes = [8, 1], strides = [1, 1]} : vector<8x64xf32> to vector<8x1xf32>
    %595 = vector.broadcast %594 : vector<8x1xf32> to vector<8x32xf32>
    %596 = arith.mulf %595, %553 : vector<8x32xf32>
    %597 = arith.addf %593, %596 : vector<8x32xf32>
    %598 = vector.extract_strided_slice %0 {offsets = [0, 10], sizes = [8, 1], strides = [1, 1]} : vector<8x64xf32> to vector<8x1xf32>
    %599 = vector.broadcast %598 : vector<8x1xf32> to vector<8x32xf32>
    %600 = arith.mulf %599, %554 : vector<8x32xf32>
    %601 = arith.addf %597, %600 : vector<8x32xf32>
    %602 = vector.extract_strided_slice %0 {offsets = [0, 11], sizes = [8, 1], strides = [1, 1]} : vector<8x64xf32> to vector<8x1xf32>
    %603 = vector.broadcast %602 : vector<8x1xf32> to vector<8x32xf32>
    %604 = arith.mulf %603, %555 : vector<8x32xf32>
    %605 = arith.addf %601, %604 : vector<8x32xf32>
    %606 = vector.extract_strided_slice %0 {offsets = [0, 12], sizes = [8, 1], strides = [1, 1]} : vector<8x64xf32> to vector<8x1xf32>
    %607 = vector.broadcast %606 : vector<8x1xf32> to vector<8x32xf32>
    %608 = arith.mulf %607, %556 : vector<8x32xf32>
    %609 = arith.addf %605, %608 : vector<8x32xf32>
    %610 = vector.extract_strided_slice %0 {offsets = [0, 13], sizes = [8, 1], strides = [1, 1]} : vector<8x64xf32> to vector<8x1xf32>
    %611 = vector.broadcast %610 : vector<8x1xf32> to vector<8x32xf32>
    %612 = arith.mulf %611, %557 : vector<8x32xf32>
    %613 = arith.addf %609, %612 : vector<8x32xf32>
    %614 = vector.extract_strided_slice %0 {offsets = [0, 14], sizes = [8, 1], strides = [1, 1]} : vector<8x64xf32> to vector<8x1xf32>
    %615 = vector.broadcast %614 : vector<8x1xf32> to vector<8x32xf32>
    %616 = arith.mulf %615, %558 : vector<8x32xf32>
    %617 = arith.addf %613, %616 : vector<8x32xf32>
    %618 = vector.extract_strided_slice %0 {offsets = [0, 15], sizes = [8, 1], strides = [1, 1]} : vector<8x64xf32> to vector<8x1xf32>
    %619 = vector.broadcast %618 : vector<8x1xf32> to vector<8x32xf32>
    %620 = arith.mulf %619, %559 : vector<8x32xf32>
    %621 = arith.addf %617, %620 : vector<8x32xf32>
    %622 = vector.extract_strided_slice %0 {offsets = [0, 16], sizes = [8, 1], strides = [1, 1]} : vector<8x64xf32> to vector<8x1xf32>
    %623 = vector.broadcast %622 : vector<8x1xf32> to vector<8x32xf32>
    %624 = arith.mulf %623, %552 : vector<8x32xf32>
    %625 = vector.extract_strided_slice %0 {offsets = [0, 17], sizes = [8, 1], strides = [1, 1]} : vector<8x64xf32> to vector<8x1xf32>
    %626 = vector.broadcast %625 : vector<8x1xf32> to vector<8x32xf32>
    %627 = arith.mulf %626, %553 : vector<8x32xf32>
    %628 = arith.addf %624, %627 : vector<8x32xf32>
    %629 = vector.extract_strided_slice %0 {offsets = [0, 18], sizes = [8, 1], strides = [1, 1]} : vector<8x64xf32> to vector<8x1xf32>
    %630 = vector.broadcast %629 : vector<8x1xf32> to vector<8x32xf32>
    %631 = arith.mulf %630, %554 : vector<8x32xf32>
    %632 = arith.addf %628, %631 : vector<8x32xf32>
    %633 = vector.extract_strided_slice %0 {offsets = [0, 19], sizes = [8, 1], strides = [1, 1]} : vector<8x64xf32> to vector<8x1xf32>
    %634 = vector.broadcast %633 : vector<8x1xf32> to vector<8x32xf32>
    %635 = arith.mulf %634, %555 : vector<8x32xf32>
    %636 = arith.addf %632, %635 : vector<8x32xf32>
    %637 = vector.extract_strided_slice %0 {offsets = [0, 20], sizes = [8, 1], strides = [1, 1]} : vector<8x64xf32> to vector<8x1xf32>
    %638 = vector.broadcast %637 : vector<8x1xf32> to vector<8x32xf32>
    %639 = arith.mulf %638, %556 : vector<8x32xf32>
    %640 = arith.addf %636, %639 : vector<8x32xf32>
    %641 = vector.extract_strided_slice %0 {offsets = [0, 21], sizes = [8, 1], strides = [1, 1]} : vector<8x64xf32> to vector<8x1xf32>
    %642 = vector.broadcast %641 : vector<8x1xf32> to vector<8x32xf32>
    %643 = arith.mulf %642, %557 : vector<8x32xf32>
    %644 = arith.addf %640, %643 : vector<8x32xf32>
    %645 = vector.extract_strided_slice %0 {offsets = [0, 22], sizes = [8, 1], strides = [1, 1]} : vector<8x64xf32> to vector<8x1xf32>
    %646 = vector.broadcast %645 : vector<8x1xf32> to vector<8x32xf32>
    %647 = arith.mulf %646, %558 : vector<8x32xf32>
    %648 = arith.addf %644, %647 : vector<8x32xf32>
    %649 = vector.extract_strided_slice %0 {offsets = [0, 23], sizes = [8, 1], strides = [1, 1]} : vector<8x64xf32> to vector<8x1xf32>
    %650 = vector.broadcast %649 : vector<8x1xf32> to vector<8x32xf32>
    %651 = arith.mulf %650, %559 : vector<8x32xf32>
    %652 = arith.addf %648, %651 : vector<8x32xf32>
    %653 = vector.extract_strided_slice %0 {offsets = [0, 24], sizes = [8, 1], strides = [1, 1]} : vector<8x64xf32> to vector<8x1xf32>
    %654 = vector.broadcast %653 : vector<8x1xf32> to vector<8x32xf32>
    %655 = arith.mulf %654, %552 : vector<8x32xf32>
    %656 = vector.extract_strided_slice %0 {offsets = [0, 25], sizes = [8, 1], strides = [1, 1]} : vector<8x64xf32> to vector<8x1xf32>
    %657 = vector.broadcast %656 : vector<8x1xf32> to vector<8x32xf32>
    %658 = arith.mulf %657, %553 : vector<8x32xf32>
    %659 = arith.addf %655, %658 : vector<8x32xf32>
    %660 = vector.extract_strided_slice %0 {offsets = [0, 26], sizes = [8, 1], strides = [1, 1]} : vector<8x64xf32> to vector<8x1xf32>
    %661 = vector.broadcast %660 : vector<8x1xf32> to vector<8x32xf32>
    %662 = arith.mulf %661, %554 : vector<8x32xf32>
    %663 = arith.addf %659, %662 : vector<8x32xf32>
    %664 = vector.extract_strided_slice %0 {offsets = [0, 27], sizes = [8, 1], strides = [1, 1]} : vector<8x64xf32> to vector<8x1xf32>
    %665 = vector.broadcast %664 : vector<8x1xf32> to vector<8x32xf32>
    %666 = arith.mulf %665, %555 : vector<8x32xf32>
    %667 = arith.addf %663, %666 : vector<8x32xf32>
    %668 = vector.extract_strided_slice %0 {offsets = [0, 28], sizes = [8, 1], strides = [1, 1]} : vector<8x64xf32> to vector<8x1xf32>
    %669 = vector.broadcast %668 : vector<8x1xf32> to vector<8x32xf32>
    %670 = arith.mulf %669, %556 : vector<8x32xf32>
    %671 = arith.addf %667, %670 : vector<8x32xf32>
    %672 = vector.extract_strided_slice %0 {offsets = [0, 29], sizes = [8, 1], strides = [1, 1]} : vector<8x64xf32> to vector<8x1xf32>
    %673 = vector.broadcast %672 : vector<8x1xf32> to vector<8x32xf32>
    %674 = arith.mulf %673, %557 : vector<8x32xf32>
    %675 = arith.addf %671, %674 : vector<8x32xf32>
    %676 = vector.extract_strided_slice %0 {offsets = [0, 30], sizes = [8, 1], strides = [1, 1]} : vector<8x64xf32> to vector<8x1xf32>
    %677 = vector.broadcast %676 : vector<8x1xf32> to vector<8x32xf32>
    %678 = arith.mulf %677, %558 : vector<8x32xf32>
    %679 = arith.addf %675, %678 : vector<8x32xf32>
    %680 = vector.extract_strided_slice %0 {offsets = [0, 31], sizes = [8, 1], strides = [1, 1]} : vector<8x64xf32> to vector<8x1xf32>
    %681 = vector.broadcast %680 : vector<8x1xf32> to vector<8x32xf32>
    %682 = arith.mulf %681, %559 : vector<8x32xf32>
    %683 = arith.addf %679, %682 : vector<8x32xf32>
    %684 = vector.extract_strided_slice %0 {offsets = [0, 32], sizes = [8, 1], strides = [1, 1]} : vector<8x64xf32> to vector<8x1xf32>
    %685 = vector.broadcast %684 : vector<8x1xf32> to vector<8x32xf32>
    %686 = arith.mulf %685, %552 : vector<8x32xf32>
    %687 = vector.extract_strided_slice %0 {offsets = [0, 33], sizes = [8, 1], strides = [1, 1]} : vector<8x64xf32> to vector<8x1xf32>
    %688 = vector.broadcast %687 : vector<8x1xf32> to vector<8x32xf32>
    %689 = arith.mulf %688, %553 : vector<8x32xf32>
    %690 = arith.addf %686, %689 : vector<8x32xf32>
    %691 = vector.extract_strided_slice %0 {offsets = [0, 34], sizes = [8, 1], strides = [1, 1]} : vector<8x64xf32> to vector<8x1xf32>
    %692 = vector.broadcast %691 : vector<8x1xf32> to vector<8x32xf32>
    %693 = arith.mulf %692, %554 : vector<8x32xf32>
    %694 = arith.addf %690, %693 : vector<8x32xf32>
    %695 = vector.extract_strided_slice %0 {offsets = [0, 35], sizes = [8, 1], strides = [1, 1]} : vector<8x64xf32> to vector<8x1xf32>
    %696 = vector.broadcast %695 : vector<8x1xf32> to vector<8x32xf32>
    %697 = arith.mulf %696, %555 : vector<8x32xf32>
    %698 = arith.addf %694, %697 : vector<8x32xf32>
    %699 = vector.extract_strided_slice %0 {offsets = [0, 36], sizes = [8, 1], strides = [1, 1]} : vector<8x64xf32> to vector<8x1xf32>
    %700 = vector.broadcast %699 : vector<8x1xf32> to vector<8x32xf32>
    %701 = arith.mulf %700, %556 : vector<8x32xf32>
    %702 = arith.addf %698, %701 : vector<8x32xf32>
    %703 = vector.extract_strided_slice %0 {offsets = [0, 37], sizes = [8, 1], strides = [1, 1]} : vector<8x64xf32> to vector<8x1xf32>
    %704 = vector.broadcast %703 : vector<8x1xf32> to vector<8x32xf32>
    %705 = arith.mulf %704, %557 : vector<8x32xf32>
    %706 = arith.addf %702, %705 : vector<8x32xf32>
    %707 = vector.extract_strided_slice %0 {offsets = [0, 38], sizes = [8, 1], strides = [1, 1]} : vector<8x64xf32> to vector<8x1xf32>
    %708 = vector.broadcast %707 : vector<8x1xf32> to vector<8x32xf32>
    %709 = arith.mulf %708, %558 : vector<8x32xf32>
    %710 = arith.addf %706, %709 : vector<8x32xf32>
    %711 = vector.extract_strided_slice %0 {offsets = [0, 39], sizes = [8, 1], strides = [1, 1]} : vector<8x64xf32> to vector<8x1xf32>
    %712 = vector.broadcast %711 : vector<8x1xf32> to vector<8x32xf32>
    %713 = arith.mulf %712, %559 : vector<8x32xf32>
    %714 = arith.addf %710, %713 : vector<8x32xf32>
    %715 = vector.extract_strided_slice %0 {offsets = [0, 40], sizes = [8, 1], strides = [1, 1]} : vector<8x64xf32> to vector<8x1xf32>
    %716 = vector.broadcast %715 : vector<8x1xf32> to vector<8x32xf32>
    %717 = arith.mulf %716, %552 : vector<8x32xf32>
    %718 = vector.extract_strided_slice %0 {offsets = [0, 41], sizes = [8, 1], strides = [1, 1]} : vector<8x64xf32> to vector<8x1xf32>
    %719 = vector.broadcast %718 : vector<8x1xf32> to vector<8x32xf32>
    %720 = arith.mulf %719, %553 : vector<8x32xf32>
    %721 = arith.addf %717, %720 : vector<8x32xf32>
    %722 = vector.extract_strided_slice %0 {offsets = [0, 42], sizes = [8, 1], strides = [1, 1]} : vector<8x64xf32> to vector<8x1xf32>
    %723 = vector.broadcast %722 : vector<8x1xf32> to vector<8x32xf32>
    %724 = arith.mulf %723, %554 : vector<8x32xf32>
    %725 = arith.addf %721, %724 : vector<8x32xf32>
    %726 = vector.extract_strided_slice %0 {offsets = [0, 43], sizes = [8, 1], strides = [1, 1]} : vector<8x64xf32> to vector<8x1xf32>
    %727 = vector.broadcast %726 : vector<8x1xf32> to vector<8x32xf32>
    %728 = arith.mulf %727, %555 : vector<8x32xf32>
    %729 = arith.addf %725, %728 : vector<8x32xf32>
    %730 = vector.extract_strided_slice %0 {offsets = [0, 44], sizes = [8, 1], strides = [1, 1]} : vector<8x64xf32> to vector<8x1xf32>
    %731 = vector.broadcast %730 : vector<8x1xf32> to vector<8x32xf32>
    %732 = arith.mulf %731, %556 : vector<8x32xf32>
    %733 = arith.addf %729, %732 : vector<8x32xf32>
    %734 = vector.extract_strided_slice %0 {offsets = [0, 45], sizes = [8, 1], strides = [1, 1]} : vector<8x64xf32> to vector<8x1xf32>
    %735 = vector.broadcast %734 : vector<8x1xf32> to vector<8x32xf32>
    %736 = arith.mulf %735, %557 : vector<8x32xf32>
    %737 = arith.addf %733, %736 : vector<8x32xf32>
    %738 = vector.extract_strided_slice %0 {offsets = [0, 46], sizes = [8, 1], strides = [1, 1]} : vector<8x64xf32> to vector<8x1xf32>
    %739 = vector.broadcast %738 : vector<8x1xf32> to vector<8x32xf32>
    %740 = arith.mulf %739, %558 : vector<8x32xf32>
    %741 = arith.addf %737, %740 : vector<8x32xf32>
    %742 = vector.extract_strided_slice %0 {offsets = [0, 47], sizes = [8, 1], strides = [1, 1]} : vector<8x64xf32> to vector<8x1xf32>
    %743 = vector.broadcast %742 : vector<8x1xf32> to vector<8x32xf32>
    %744 = arith.mulf %743, %559 : vector<8x32xf32>
    %745 = arith.addf %741, %744 : vector<8x32xf32>
    %746 = vector.extract_strided_slice %0 {offsets = [0, 48], sizes = [8, 1], strides = [1, 1]} : vector<8x64xf32> to vector<8x1xf32>
    %747 = vector.broadcast %746 : vector<8x1xf32> to vector<8x32xf32>
    %748 = arith.mulf %747, %552 : vector<8x32xf32>
    %749 = vector.extract_strided_slice %0 {offsets = [0, 49], sizes = [8, 1], strides = [1, 1]} : vector<8x64xf32> to vector<8x1xf32>
    %750 = vector.broadcast %749 : vector<8x1xf32> to vector<8x32xf32>
    %751 = arith.mulf %750, %553 : vector<8x32xf32>
    %752 = arith.addf %748, %751 : vector<8x32xf32>
    %753 = vector.extract_strided_slice %0 {offsets = [0, 50], sizes = [8, 1], strides = [1, 1]} : vector<8x64xf32> to vector<8x1xf32>
    %754 = vector.broadcast %753 : vector<8x1xf32> to vector<8x32xf32>
    %755 = arith.mulf %754, %554 : vector<8x32xf32>
    %756 = arith.addf %752, %755 : vector<8x32xf32>
    %757 = vector.extract_strided_slice %0 {offsets = [0, 51], sizes = [8, 1], strides = [1, 1]} : vector<8x64xf32> to vector<8x1xf32>
    %758 = vector.broadcast %757 : vector<8x1xf32> to vector<8x32xf32>
    %759 = arith.mulf %758, %555 : vector<8x32xf32>
    %760 = arith.addf %756, %759 : vector<8x32xf32>
    %761 = vector.extract_strided_slice %0 {offsets = [0, 52], sizes = [8, 1], strides = [1, 1]} : vector<8x64xf32> to vector<8x1xf32>
    %762 = vector.broadcast %761 : vector<8x1xf32> to vector<8x32xf32>
    %763 = arith.mulf %762, %556 : vector<8x32xf32>
    %764 = arith.addf %760, %763 : vector<8x32xf32>
    %765 = vector.extract_strided_slice %0 {offsets = [0, 53], sizes = [8, 1], strides = [1, 1]} : vector<8x64xf32> to vector<8x1xf32>
    %766 = vector.broadcast %765 : vector<8x1xf32> to vector<8x32xf32>
    %767 = arith.mulf %766, %557 : vector<8x32xf32>
    %768 = arith.addf %764, %767 : vector<8x32xf32>
    %769 = vector.extract_strided_slice %0 {offsets = [0, 54], sizes = [8, 1], strides = [1, 1]} : vector<8x64xf32> to vector<8x1xf32>
    %770 = vector.broadcast %769 : vector<8x1xf32> to vector<8x32xf32>
    %771 = arith.mulf %770, %558 : vector<8x32xf32>
    %772 = arith.addf %768, %771 : vector<8x32xf32>
    %773 = vector.extract_strided_slice %0 {offsets = [0, 55], sizes = [8, 1], strides = [1, 1]} : vector<8x64xf32> to vector<8x1xf32>
    %774 = vector.broadcast %773 : vector<8x1xf32> to vector<8x32xf32>
    %775 = arith.mulf %774, %559 : vector<8x32xf32>
    %776 = arith.addf %772, %775 : vector<8x32xf32>
    %777 = vector.extract_strided_slice %0 {offsets = [0, 56], sizes = [8, 1], strides = [1, 1]} : vector<8x64xf32> to vector<8x1xf32>
    %778 = vector.broadcast %777 : vector<8x1xf32> to vector<8x32xf32>
    %779 = arith.mulf %778, %552 : vector<8x32xf32>
    %780 = vector.extract_strided_slice %0 {offsets = [0, 57], sizes = [8, 1], strides = [1, 1]} : vector<8x64xf32> to vector<8x1xf32>
    %781 = vector.broadcast %780 : vector<8x1xf32> to vector<8x32xf32>
    %782 = arith.mulf %781, %553 : vector<8x32xf32>
    %783 = arith.addf %779, %782 : vector<8x32xf32>
    %784 = vector.extract_strided_slice %0 {offsets = [0, 58], sizes = [8, 1], strides = [1, 1]} : vector<8x64xf32> to vector<8x1xf32>
    %785 = vector.broadcast %784 : vector<8x1xf32> to vector<8x32xf32>
    %786 = arith.mulf %785, %554 : vector<8x32xf32>
    %787 = arith.addf %783, %786 : vector<8x32xf32>
    %788 = vector.extract_strided_slice %0 {offsets = [0, 59], sizes = [8, 1], strides = [1, 1]} : vector<8x64xf32> to vector<8x1xf32>
    %789 = vector.broadcast %788 : vector<8x1xf32> to vector<8x32xf32>
    %790 = arith.mulf %789, %555 : vector<8x32xf32>
    %791 = arith.addf %787, %790 : vector<8x32xf32>
    %792 = vector.extract_strided_slice %0 {offsets = [0, 60], sizes = [8, 1], strides = [1, 1]} : vector<8x64xf32> to vector<8x1xf32>
    %793 = vector.broadcast %792 : vector<8x1xf32> to vector<8x32xf32>
    %794 = arith.mulf %793, %556 : vector<8x32xf32>
    %795 = arith.addf %791, %794 : vector<8x32xf32>
    %796 = vector.extract_strided_slice %0 {offsets = [0, 61], sizes = [8, 1], strides = [1, 1]} : vector<8x64xf32> to vector<8x1xf32>
    %797 = vector.broadcast %796 : vector<8x1xf32> to vector<8x32xf32>
    %798 = arith.mulf %797, %557 : vector<8x32xf32>
    %799 = arith.addf %795, %798 : vector<8x32xf32>
    %800 = vector.extract_strided_slice %0 {offsets = [0, 62], sizes = [8, 1], strides = [1, 1]} : vector<8x64xf32> to vector<8x1xf32>
    %801 = vector.broadcast %800 : vector<8x1xf32> to vector<8x32xf32>
    %802 = arith.mulf %801, %558 : vector<8x32xf32>
    %803 = arith.addf %799, %802 : vector<8x32xf32>
    %804 = vector.extract_strided_slice %0 {offsets = [0, 63], sizes = [8, 1], strides = [1, 1]} : vector<8x64xf32> to vector<8x1xf32>
    %805 = vector.broadcast %804 : vector<8x1xf32> to vector<8x32xf32>
    %806 = arith.mulf %805, %559 : vector<8x32xf32>
    %807 = arith.addf %803, %806 : vector<8x32xf32>
    %808 = tpu.concatenate %590, %621, %652, %683, %714, %745, %776, %807 in 1 : vector<8x32xf32>, vector<8x32xf32>, vector<8x32xf32>, vector<8x32xf32>, vector<8x32xf32>, vector<8x32xf32>, vector<8x32xf32>, vector<8x32xf32> -> vector<8x256xf32>
    %809 = arith.truncf %808 : vector<8x256xf32> to vector<8x256xbf16>
    %c0_21 = arith.constant 0 : index
    %c0_22 = arith.constant 0 : index
    %810 = vector.load %arg9[%c0_21, %c0_22] : memref<256x512xbf16, #tpu.memory_space<vmem>>, vector<256x512xbf16>
    %cst_23 = arith.constant dense<0.000000e+00> : vector<8x512xf32>
    %811 = tpu.matmul %809, %810, %cst_23 {dimension_numbers = #tpu.dot_dimension_numbers<[1], [0], [0], [1], [0, 0, 1, 1], [], []>} : vector<8x256xbf16>, vector<256x512xbf16>, vector<8x512xf32> -> vector<8x512xf32>
    %c0_24 = arith.constant 0 : index
    %c0_25 = arith.constant 0 : index
    %812 = vector.load %arg10[%c0_24, %c0_25] : memref<1x512xf32, #tpu.memory_space<vmem>>, vector<1x512xf32>
    %813 = vector.broadcast %812 : vector<1x512xf32> to vector<8x512xf32>
    %814 = arith.addf %811, %813 : vector<8x512xf32>
    %c3 = arith.constant 3 : index
    %815 = memref.load %arg15[%c3] : memref<5xf32, #tpu.memory_space<smem>>
    %cst_26 = arith.constant 0.000000e+00 : f32
    %816 = vector.broadcast %cst_26 : f32 to vector<8x512xf32>
    %817 = arith.cmpf ogt, %814, %816 : vector<8x512xf32>
    %818 = vector.broadcast %815 : f32 to vector<8x512xf32>
    %819 = arith.mulf %818, %814 : vector<8x512xf32>
    %820 = arith.select %817, %814, %819 : vector<8x512xi1>, vector<8x512xf32>
    %821 = arith.truncf %820 : vector<8x512xf32> to vector<8x512xbf16>
    %c0_27 = arith.constant 0 : index
    %c0_28 = arith.constant 0 : index
    %822 = vector.load %arg11[%c0_27, %c0_28] : memref<512x256xbf16, #tpu.memory_space<vmem>>, vector<512x256xbf16>
    %cst_29 = arith.constant dense<0.000000e+00> : vector<8x256xf32>
    %823 = tpu.matmul %821, %822, %cst_29 {dimension_numbers = #tpu.dot_dimension_numbers<[1], [0], [0], [1], [0, 0, 1, 1], [], []>} : vector<8x512xbf16>, vector<512x256xbf16>, vector<8x256xf32> -> vector<8x256xf32>
    %c0_30 = arith.constant 0 : index
    %c0_31 = arith.constant 0 : index
    %824 = vector.load %arg12[%c0_30, %c0_31] : memref<1x256xf32, #tpu.memory_space<vmem>>, vector<1x256xf32>
    %825 = vector.broadcast %824 : vector<1x256xf32> to vector<8x256xf32>
    %826 = arith.addf %823, %825 : vector<8x256xf32>
    %c4 = arith.constant 4 : index
    %827 = memref.load %arg15[%c4] : memref<5xf32, #tpu.memory_space<smem>>
    %cst_32 = arith.constant 0.000000e+00 : f32
    %828 = vector.broadcast %cst_32 : f32 to vector<8x256xf32>
    %829 = arith.cmpf ogt, %826, %828 : vector<8x256xf32>
    %830 = vector.broadcast %827 : f32 to vector<8x256xf32>
    %831 = arith.mulf %830, %826 : vector<8x256xf32>
    %832 = arith.select %829, %826, %831 : vector<8x256xi1>, vector<8x256xf32>
    %833 = arith.truncf %832 : vector<8x256xf32> to vector<8x256xbf16>
    %c0_33 = arith.constant 0 : index
    %c0_34 = arith.constant 0 : index
    %834 = vector.load %arg13[%c0_33, %c0_34] : memref<256x16xbf16, #tpu.memory_space<vmem>>, vector<256x16xbf16>
    %cst_35 = arith.constant dense<0.000000e+00> : vector<8x16xf32>
    %835 = tpu.matmul %833, %834, %cst_35 {dimension_numbers = #tpu.dot_dimension_numbers<[1], [0], [0], [1], [0, 0, 1, 1], [], []>} : vector<8x256xbf16>, vector<256x16xbf16>, vector<8x16xf32> -> vector<8x16xf32>
    %c0_36 = arith.constant 0 : index
    %c0_37 = arith.constant 0 : index
    %836 = vector.load %arg14[%c0_36, %c0_37] : memref<1x16xf32, #tpu.memory_space<vmem>>, vector<1x16xf32>
    %837 = vector.broadcast %836 : vector<1x16xf32> to vector<8x16xf32>
    %838 = arith.addf %835, %837 : vector<8x16xf32>
    %839 = arith.mulf %838, %838 : vector<8x16xf32>
    %cst_38 = arith.constant dense<0.000000e+00> : vector<8xf32>
    %840 = vector.multi_reduction <add>, %839, %cst_38 [1] : vector<8x16xf32> to vector<8xf32>
    %841 = vector.shape_cast %840 : vector<8xf32> to vector<8x1xf32>
    %842 = math.sqrt %841 : vector<8x1xf32>
    %cst_39 = arith.constant 9.99999996E-13 : f32
    %843 = vector.broadcast %cst_39 : f32 to vector<8x1xf32>
    %844 = arith.maximumf %842, %843 : vector<8x1xf32>
    %845 = vector.broadcast %844 : vector<8x1xf32> to vector<8x16xf32>
    %846 = arith.divf %838, %845 : vector<8x16xf32>
    %c0_40 = arith.constant 0 : index
    %c0_41 = arith.constant 0 : index
    %847 = vector.load %arg16[%c0_40, %c0_41] : memref<8x16xf32, #tpu.memory_space<vmem>>, vector<8x16xf32>
    tpu.vector_store %arg16[%c0_40, %c0_41], %846 {strides = array<i32>} : memref<8x16xf32, #tpu.memory_space<vmem>>, vector<8x16xf32>,
    return
  }
  func.func @transform_0(%arg0: i32) -> (i32, i32) {
    %c0_i32 = arith.constant 0 : i32
    %c0_i32_0 = arith.constant 0 : i32
    return %arg0, %c0_i32 : i32, i32
  }
  func.func @transform_1(%arg0: i32) -> (i32, i32) {
    %c0_i32 = arith.constant 0 : i32
    %c0_i32_0 = arith.constant 0 : i32
    return %arg0, %c0_i32 : i32, i32
  }
  func.func @transform_2(%arg0: i32) -> (i32, i32) {
    %c0_i32 = arith.constant 0 : i32
    %c0_i32_0 = arith.constant 0 : i32
    %c0_i32_1 = arith.constant 0 : i32
    return %c0_i32, %c0_i32_0 : i32, i32
  }
  func.func @transform_3(%arg0: i32) -> (i32, i32) {
    %c0_i32 = arith.constant 0 : i32
    %c0_i32_0 = arith.constant 0 : i32
    %c0_i32_1 = arith.constant 0 : i32
    return %c0_i32, %c0_i32_0 : i32, i32
  }
  func.func @transform_4(%arg0: i32) -> (i32, i32) {
    %c0_i32 = arith.constant 0 : i32
    %c0_i32_0 = arith.constant 0 : i32
    %c0_i32_1 = arith.constant 0 : i32
    return %c0_i32, %c0_i32_0 : i32, i32
  }
  func.func @transform_5(%arg0: i32) -> (i32, i32) {
    %c0_i32 = arith.constant 0 : i32
    %c0_i32_0 = arith.constant 0 : i32
    %c0_i32_1 = arith.constant 0 : i32
    return %c0_i32, %c0_i32_0 : i32, i32
  }
  func.func @transform_6(%arg0: i32) -> (i32, i32) {
    %c0_i32 = arith.constant 0 : i32
    %c0_i32_0 = arith.constant 0 : i32
    %c0_i32_1 = arith.constant 0 : i32
    return %c0_i32, %c0_i32_0 : i32, i32
  }
  func.func @transform_7(%arg0: i32) -> (i32, i32) {
    %c0_i32 = arith.constant 0 : i32
    %c0_i32_0 = arith.constant 0 : i32
    %c0_i32_1 = arith.constant 0 : i32
    return %c0_i32, %c0_i32_0 : i32, i32
  }
  func.func @transform_8(%arg0: i32) -> (i32, i32) {
    %c0_i32 = arith.constant 0 : i32
    %c0_i32_0 = arith.constant 0 : i32
    %c0_i32_1 = arith.constant 0 : i32
    return %c0_i32, %c0_i32_0 : i32, i32
  }
  func.func @transform_9(%arg0: i32) -> (i32, i32) {
    %c0_i32 = arith.constant 0 : i32
    %c0_i32_0 = arith.constant 0 : i32
    %c0_i32_1 = arith.constant 0 : i32
    return %c0_i32, %c0_i32_0 : i32, i32
  }
  func.func @transform_10(%arg0: i32) -> (i32, i32) {
    %c0_i32 = arith.constant 0 : i32
    %c0_i32_0 = arith.constant 0 : i32
    %c0_i32_1 = arith.constant 0 : i32
    return %c0_i32, %c0_i32_0 : i32, i32
  }
  func.func @transform_11(%arg0: i32) -> (i32, i32) {
    %c0_i32 = arith.constant 0 : i32
    %c0_i32_0 = arith.constant 0 : i32
    %c0_i32_1 = arith.constant 0 : i32
    return %c0_i32, %c0_i32_0 : i32, i32
  }
  func.func @transform_12(%arg0: i32) -> (i32, i32) {
    %c0_i32 = arith.constant 0 : i32
    %c0_i32_0 = arith.constant 0 : i32
    %c0_i32_1 = arith.constant 0 : i32
    return %c0_i32, %c0_i32_0 : i32, i32
  }
  func.func @transform_13(%arg0: i32) -> (i32, i32) {
    %c0_i32 = arith.constant 0 : i32
    %c0_i32_0 = arith.constant 0 : i32
    %c0_i32_1 = arith.constant 0 : i32
    return %c0_i32, %c0_i32_0 : i32, i32
  }
  func.func @transform_14(%arg0: i32) -> i32 {
    %c0_i32 = arith.constant 0 : i32
    %c0_i32_0 = arith.constant 0 : i32
    return %c0_i32 : i32
  }
  func.func @transform_15(%arg0: i32) -> (i32, i32) {
    %c0_i32 = arith.constant 0 : i32
    %c0_i32_0 = arith.constant 0 : i32
    return %arg0, %c0_i32 : i32, i32
  }
}

</mosaic_0001>

<bundles_post_ra>
// kernel: mul.61
= control target key start
LH: loop header
LB: loop body
LE: loop exit
PB: predicated region body
PF: predicated region fallthrough
CT: control target
= control target key end

     0   :  { %s7_s6 = smov 3  ;;  %s14_s9 = smov 3  ;;  %vm4_vm0 = vcmask 261120   ;;  %vm11_vm1 = vcmask 1048320   ;;  %vm18_vm2 = vcmask 785920   ;;  %vm25_vm3 = vcmask 523520   ;;  %s67_s0 = inlined_call_operand.vmem [shape: f32[8,32], index: 0, kind: input, shape index: {}]   ;;  %s68_s1 = inlined_call_operand.vmem [shape: f32[256], index: 1, kind: output, shape index: {}]  }
   0x1   :  { %v33_v0 = vld [vmem:[%s67_s0 + $0x3] ss:$4 sm:%s7_s6]   ;;  %s39_s10 = smov 96   ;;  %s21_s11 = smov 3  ;;  %v34_v1 = vld [vmem:[%s67_s0 + $0x2] ss:$4 sm:%s14_s9]  }
   0x2   :  { %9 = vrot.lane.b32.xlu0 %v33_v0, %s39_s10  ;;  %v35_v2 = vld [vmem:[%s67_s0 + $0x1] ss:$4 sm:%s21_s11]   ;;  %s2_s16 = smov 3  ;;  %s40_s17 = smov 32  }
   0x3   :  { %23 = vrot.lane.b32.xlu1 %v35_v2, %s40_s17  ;;  %v3_v3 = vld [vmem:[%s67_s0] ss:$4 sm:%s2_s16]   ;;  %s41_s0 = smov 64  }
   0x4   :  { %5 = vst.msk [vmem:[#allocation0] sm:$0x3] %vm4_vm0, %v3_v3  }
   0x6   :  { %16 = vrot.lane.b32.xlu0 %v34_v1, %s41_s0 }
  0x74   :  { %v10_v4 = vpop.permute.xlu0 %9  }
  0x75   :  { %12 = vst.msk [vmem:[#allocation0] sm:$0x3] %vm11_vm1, %v10_v4   ;;  %v24_v5 = vpop.permute.xlu1 %23  }
  0x78   :  { %v17_v6 = vpop.permute.xlu0 %16  }
  0x79   :  { %19 = vst.msk [vmem:[#allocation0] sm:$0x3] %vm18_vm2, %v17_v6  }
  0x7a   :  { %26 = vst.msk [vmem:[#allocation0] sm:$0x3] %vm25_vm3, %v24_v5  }
  0x81   :  { %v30_v7 = vld [vmem:[#allocation0] sm:$0x3] }
  0x82   :  { %32 = vst [vmem:[%s68_s1] sm:$0x3] %v30_v7 }

// kernel: gnn_forward.1
= control target key start
LH: loop header
LB: loop body
LE: loop exit
PB: predicated region body
PF: predicated region fallthrough
CT: control target
= control target key end

     0   :  { %20 = vsyncpa [#allocation3], 0  ;;  %s5685_s0 = inlined_call_operand.vmem [shape: f32[8,64], index: 0, kind: input, shape index: {}]   ;;  %s5686_s1 = inlined_call_operand.vmem [shape: f32[8,128], index: 1, kind: input, shape index: {}]   ;;  %s5687_s2 = inlined_call_operand.vmem [shape: bf16[128,256], index: 2, kind: input, shape index: {}]   ;;  %s5688_s3 = inlined_call_operand.vmem [shape: f32[1,256], index: 3, kind: input, shape index: {}]   ;;  %s5689_s4 = inlined_call_operand.vmem [shape: bf16[256,256], index: 4, kind: input, shape index: {}]   ;;  %s5690_s5 = inlined_call_operand.vmem [shape: f32[1,256], index: 5, kind: input, shape index: {}]   ;;  %s5691_s6 = inlined_call_operand.vmem [shape: bf16[256,256], index: 6, kind: input, shape index: {}]   ;;  %s5692_s7 = inlined_call_operand.vmem [shape: f32[1,256], index: 7, kind: input, shape index: {}]   ;;  %s5693_s8 = inlined_call_operand.vmem [shape: bf16[256,512], index: 8, kind: input, shape index: {}]   ;;  %s5694_s9 = inlined_call_operand.vmem [shape: f32[1,512], index: 9, kind: input, shape index: {}]   ;;  %s5695_s10 = inlined_call_operand.vmem [shape: bf16[512,256], index: 10, kind: input, shape index: {}]   ;;  %s5696_s11 = inlined_call_operand.vmem [shape: f32[1,256], index: 11, kind: input, shape index: {}]   ;;  %s5697_s12 = inlined_call_operand.vmem [shape: bf16[256,16], index: 12, kind: input, shape index: {}]   ;;  %s5698_s13 = inlined_call_operand.vmem [shape: f32[1,16], index: 13, kind: input, shape index: {}]   ;;  %s5699_s14 = inlined_call_operand.vmem [shape: f32[5], index: 14, kind: input, shape index: {}]   ;;  %s5700_s15 = inlined_call_operand.vmem [shape: f32[8,16], index: 15, kind: output, shape index: {}]  }
   0x1   :  { %s55_s20 = sshll.u32 %s5699_s14, 4  ;;  %s56_s20 = int_to_ptr.vmem [resolvable:$true] %s55_s20 }
   0x2   :  { %s3980_s21 = scalar_lea.vmem %s56_s20, 16  ;;  %p3985_p1 = scmp.lt.s32.totalorder %s56_s20, %s56_s20 }
   0x3   :  { %p3981_p0 = scmp.ne.s32.totalorder %s56_s20, %s3980_s21  ;;  %p3986_p2 = scmp.lt.s32.totalorder %s3980_s21, %s3980_s21 }
   0x5   :  { %p3987_p3 = por %p3986_p2, %p3985_p1 }
   0x7   :  { %p3988_p4 = pnand %p3987_p3, %p3981_p0 }
   0x9   :  { %3991 = shalt.err (!%p3988_p4)
}
   0xa   :  { %s3994_s22 = smov [#allocation2]  }
   0xb   :  { %58 = dma.vmem_to_smem %s56_s20, 16, %s3994_s22, [#allocation3]  }
   0xc   :  { %3992 = dma.done.wait [#allocation3], 16  }
   0xd   :  { %3993 = vsyncadd [#allocation3], 4294967280 }
   0xe   :  { %62 = sfence }
   0xf   :  { %v4148_v0 = vld [vmem:[%s5685_s0] sm:$0xff]  ;;  %v3995_v1 = vmov 49   ;;  %v3650_v4 = vld [vmem:[%s5687_s2 + $0x14] ss:$8 sps:$4 sm:$0xff]   ;;  %v3652_v5 = vld [vmem:[%s5687_s2 + $0x10] ss:$8 sps:$4 sm:$0xff]  }
  0x10   :  { %3539 = vset.pattern.permute.xlu1 %v3995_v1  ;;  %v3647_v2 = vld [vmem:[%s5687_s2 + $0x4] ss:$8 sps:$4 sm:$0xff]   ;;  %v3649_v3 = vld [vmem:[%s5687_s2] ss:$8 sps:$4 sm:$0xff]   ;;  %v3996_v6 = vmov 41   ;;  %v3997_v8 = vmov 17  }
  0x11   :  { %657 = vperm.xlu1 %3539, %v4148_v0   ;;  %175 = vmatprep.subr.bf16.mxu0 %v3647_v2  ;;  %v3653_v7 = vld [vmem:[%s5687_s2 + $0x24] ss:$8 sps:$4 sm:$0xff]   ;;  %v3998_v9 = vmov 0   ;;  %v3655_v10 = vld [vmem:[%s5687_s2 + $0x20] ss:$8 sps:$4 sm:$0xff]   ;;  %v3999_v12 = vmov 9  }
  0x12   :  { %176 = vmatpush1.bf16.msra.mxu0 %v3649_v3  ;;  %3537 = vset.pattern.permute.xlu0 %v3996_v6  ;;  %v3656_v11 = vld [vmem:[%s5687_s2 + $0x34] ss:$8 sps:$4 sm:$0xff]   ;;  %v4000_v13 = vmov 42   ;;  %v3658_v14 = vld [vmem:[%s5687_s2 + $0x30] ss:$8 sps:$4 sm:$0xff]   ;;  %v4001_v16 = vmov 57  }
  0x13   :  { %177 = vmatprep.subr.bf16.mxu0 %v3650_v4  ;;  %586 = vperm.xlu0 %3537, %v4148_v0   ;;  %v3659_v15 = vld [vmem:[%s5687_s2 + $0x44] ss:$8 sps:$4 sm:$0xff]   ;;  %v4002_v17 = vmov 10   ;;  %v3661_v18 = vld [vmem:[%s5687_s2 + $0x40] ss:$8 sps:$4 sm:$0xff]   ;;  %v4003_v22 = vmov 50  }
  0x14   :  { %207 = vmatprep.mubr.bf16.mxu0 %v3998_v9  ;;  %v3662_v19 = vld [vmem:[%s5687_s2 + $0x54] ss:$8 sps:$4 sm:$0xff]   ;;  %v3664_v20 = vld [vmem:[%s5687_s2 + $0x50] ss:$8 sps:$4 sm:$0xff]   ;;  %v3665_v21 = vld [vmem:[%s5687_s2 + $0x64] ss:$8 sps:$4 sm:$0xff]  }
  0x15   :  { %3540 = vset.pattern.permute.xlu1 %v3997_v8  ;;  %v4004_v23 = vmov 25   ;;  %v3667_v24 = vld [vmem:[%s5687_s2 + $0x60] ss:$8 sps:$4 sm:$0xff]   ;;  %v3668_v25 = vld [vmem:[%s5687_s2 + $0x74] ss:$8 sps:$4 sm:$0xff]   ;;  %v4005_v26 = vmov 58  }
  0x16   :  { %373 = vperm.xlu1 %3540, %v4148_v0   ;;  %178 = vmatpush1.bf16.msra.mxu0 %v3652_v5  ;;  %v4006_v27 = vmov 18   ;;  %v3670_v28 = vld [vmem:[%s5687_s2 + $0x70] ss:$8 sps:$4 sm:$0xff]   ;;  %v65_v29 = vld [vmem:[%s5686_s1] sm:$0xff]  ;;  %v4007_v30 = vmov 51   ;;  %v4008_v31 = vmov 43  }
  0x17   :  { %179 = vmatprep.subr.bf16.mxu0 %v3653_v7  ;;  %3538 = vset.pattern.permute.xlu0 %v3999_v12  ;;  %v66_v32 = vpack.c.bf16 %v65_v29, %v65_v29  ;;  %v4009_v33 = vmov 27   ;;  %v4010_v34 = vmov 11   ;;  %v4011_v35 = vmov 53   ;;  %s4308_s1 = sld [smem:[#allocation2]]  ;;  %s4058_s27 = smov 64  }
  0x18   :  { %302 = vperm.xlu0 %3538, %v4148_v0   ;;  %v4012_v36 = vmov 26   ;;  %v4013_v37 = vmov 61   ;;  %v4014_v38 = vmov 19   ;;  %v4015_v39 = vmov 54   ;;  %s4059_s28 = smov 32   ;;  %s3358_s30 = sld [smem:[#allocation2 + $0x3]] }
  0x19   :  { %v4016_v40 = vmov 59   ;;  %v4017_v41 = vmov 62   ;;  %v4018_v42 = vmov 45   ;;  %v4019_v43 = vmov 55  }
  0x1a   :  { %3541 = vset.pattern.permute.xlu1 %v4000_v13  ;;  %180 = vmatpush1.bf16.msra.mxu0 %v3655_v10  ;;  %v4020_v44 = vmov 13   ;;  %v4021_v45 = vmov 31   ;;  %v4022_v46 = vmov 21   ;;  %v4023_v47 = vmov 1  }
  0x1b   :  { %596 = vperm.xlu1 %3541, %v4148_v0   ;;  %181 = vmatprep.subr.bf16.mxu0 %v3656_v11  ;;  %v4024_v48 = vmov 46   ;;  %v4025_v49 = vmov 16   ;;  %v4026_v50 = vmov 14   ;;  %v4027_v51 = vmov 2  }
  0x1c   :  { %3542 = vset.pattern.permute.xlu0 %v4001_v16  ;;  %v4028_v52 = vmov 29   ;;  %v4029_v53 = vmov 3   ;;  %v4030_v54 = vmov 22   ;;  %v4031_v55 = vmov 52  }
  0x1d   :  { %728 = vperm.xlu0 %3542, %v4148_v0   ;;  %v4032_v56 = vmov 47   ;;  %v4033_v57 = vmov 60   ;;  %v4034_v58 = vmov 15   ;;  %v4035_v59 = vmov 38  }
  0x1e   :  { %182 = vmatpush1.bf16.msra.mxu0 %v3658_v14  ;;  %v4036_v60 = vmov 30   ;;  %v4037_v61 = vmov 23   ;;  %v5701_v62 = vmov 63   ;;  %v4039_v63 = vmov 33  }
  0x1f   :  { %3543 = vset.pattern.permute.xlu1 %v4002_v17  ;;  %183 = vmatprep.subr.bf16.mxu0 %v3659_v15  ;;  %v4040_v1 = vmov 40   ;;  %v4041_v2 = vmov 8   ;;  %v4042_v4 = vmov 48   ;;  %v4043_v6 = vmov 34  }
  0x20   :  { %312 = vperm.xlu1 %3543, %v4148_v0   ;;  %v4044_v8 = vmov 56   ;;  %v4045_v10 = vmov 24   ;;  %v4046_v12 = vmov 35   ;;  %v4047_v14 = vmov 44  }
  0x21   :  { %3545 = vset.pattern.permute.xlu0 %v4003_v22  ;;  %v4048_v16 = vmov 12   ;;  %v4051_v22 = vmov 5   ;;  %v4055_v29 = vmov 7   ;;  %vm817_vm2 = vcmask 261120  }
  0x22   :  { %184 = vmatpush1.bf16.msra.mxu0 %v3661_v18  ;;  %667 = vperm.xlu0 %3545, %v4148_v0   ;;  %v4049_v18 = vmov 20   ;;  %vm819_vm3 = vcmask 523264   ;;  %vm821_vm4 = vcmask 785408   ;;  %vm3192_vm15 = vcmask 130048  }
  0x23   :  { %185 = vmatprep.subr.bf16.mxu0 %v3662_v19 }
  0x24   :  { %3544 = vset.pattern.permute.xlu1 %v4004_v23 }
  0x25   :  { %444 = vperm.xlu1 %3544, %v4148_v0  }
  0x26   :  { %186 = vmatpush1.bf16.msra.mxu0 %v3664_v20  ;;  %3548 = vset.pattern.permute.xlu0 %v4005_v26  ;;  %v4050_v20 = vmov 37  }
  0x27   :  { %187 = vmatprep.subr.bf16.mxu0 %v3665_v21  ;;  %738 = vperm.xlu0 %3548, %v4148_v0  }
  0x29   :  { %3546 = vset.pattern.permute.xlu1 %v4006_v27  ;;  %v4054_v27 = vmov 39  }
  0x2a   :  { %383 = vperm.xlu1 %3546, %v4148_v0   ;;  %188 = vmatpush1.bf16.msra.mxu0 %v3667_v24  ;;  %v4052_v24 = vmov 28  }
  0x2b   :  { %189 = vmatprep.subr.bf16.mxu0 %v3668_v25  ;;  %3551 = vset.pattern.permute.xlu0 %v4007_v30  ;;  %v4053_v25 = vmov 6  }
  0x2c   :  { %677 = vperm.xlu0 %3551, %v4148_v0  }
  0x2e   :  { %3547 = vset.pattern.permute.xlu1 %v4008_v31  ;;  %190 = vmatpush1.bf16.msra.mxu0 %v3670_v28  ;;  %v4056_v31 = vmov 32  }
  0x2f   :  { %606 = vperm.xlu1 %3547, %v4148_v0  }
  0x30   :  { %3554 = vset.pattern.permute.xlu0 %v4009_v33 }
  0x31   :  { %208 = vmatmul.mubr.bf16.vlgmr.msra.gmra.mrb[0].mxu0 %v66_v32  ;;  %464 = vperm.xlu0 %3554, %v4148_v0  }
  0x33   :  { %3549 = vset.pattern.permute.xlu1 %v4010_v34 }
  0x34   :  { %322 = vperm.xlu1 %3549, %v4148_v0  }
  0x35   :  { %3557 = vset.pattern.permute.xlu0 %v4011_v35 }
  0x36   :  { %693 = vperm.xlu0 %3557, %v4148_v0  }
  0x38   :  { %3550 = vset.pattern.permute.xlu1 %v4012_v36 }
  0x39   :  { %454 = vperm.xlu1 %3550, %v4148_v0  }
  0x3a   :  { %3560 = vset.pattern.permute.xlu0 %v4013_v37  ;;  %v85_v37 = vlaneseq }
  0x3b   :  { %764 = vperm.xlu0 %3560, %v4148_v0  }
  0x3d   :  { %3552 = vset.pattern.permute.xlu1 %v4014_v38 }
  0x3e   :  { %393 = vperm.xlu1 %3552, %v4148_v0  }
  0x3f   :  { %3563 = vset.pattern.permute.xlu0 %v4015_v39 }
  0x40   :  { %703 = vperm.xlu0 %3563, %v4148_v0  }
  0x42   :  { %3553 = vset.pattern.permute.xlu1 %v4016_v40 }
  0x43   :  { %748 = vperm.xlu1 %3553, %v4148_v0  }
  0x44   :  { %3566 = vset.pattern.permute.xlu0 %v4017_v41 }
  0x45   :  { %774 = vperm.xlu0 %3566, %v4148_v0  }
  0x47   :  { %3555 = vset.pattern.permute.xlu1 %v4018_v42 }
  0x48   :  { %622 = vperm.xlu1 %3555, %v4148_v0  }
  0x49   :  { %3569 = vset.pattern.permute.xlu0 %v4019_v43  ;;  %v83_v43 = vld [vmem:[%s5688_s3] sm:$0x3]  ;;  %s4057_s3 = smov 96  }
  0x4a   :  { %713 = vperm.xlu0 %3569, %v4148_v0  }
  0x4c   :  { %3556 = vset.pattern.permute.xlu1 %v4020_v44 }
  0x4d   :  { %338 = vperm.xlu1 %3556, %v4148_v0  }
  0x4e   :  { %3572 = vset.pattern.permute.xlu0 %v4021_v45 }
  0x4f   :  { %500 = vperm.xlu0 %3572, %v4148_v0  }
  0x51   :  { %3558 = vset.pattern.permute.xlu1 %v4022_v46 }
  0x52   :  { %409 = vperm.xlu1 %3558, %v4148_v0  }
  0x53   :  { %3575 = vset.pattern.permute.xlu0 %v4023_v47 }
  0x54   :  { %231 = vperm.xlu0 %3575, %v4148_v0  }
  0x56   :  { %3559 = vset.pattern.permute.xlu1 %v4024_v48  ;;  %v219_v48 = vstv %s4308_s1  ;;  %s3423_s1 = sld [smem:[#allocation2 + $0x4]] }
  0x57   :  { %632 = vperm.xlu1 %3559, %v4148_v0  }
  0x58   :  { %3578 = vset.pattern.permute.xlu0 %v4025_v49 }
  0x59   :  { %368 = vperm.xlu0 %3578, %v4148_v0  }
  0x5b   :  { %3561 = vset.pattern.permute.xlu1 %v4026_v50 }
  0x5c   :  { %348 = vperm.xlu1 %3561, %v4148_v0  }
  0x5d   :  { %3581 = vset.pattern.permute.xlu0 %v4027_v51 }
  0x5e   :  { %241 = vperm.xlu0 %3581, %v4148_v0  }
  0x60   :  { %3562 = vset.pattern.permute.xlu1 %v4028_v52 }
  0x61   :  { %480 = vperm.xlu1 %3562, %v4148_v0  }
  0x62   :  { %3584 = vset.pattern.permute.xlu0 %v4029_v53 }
  0x63   :  { %251 = vperm.xlu0 %3584, %v4148_v0  }
  0x65   :  { %3564 = vset.pattern.permute.xlu1 %v4030_v54 }
  0x66   :  { %419 = vperm.xlu1 %3564, %v4148_v0  }
  0x67   :  { %3587 = vset.pattern.permute.xlu0 %v4031_v55 }
  0x68   :  { %687 = vperm.xlu0 %3587, %v4148_v0  }
  0x6a   :  { %3565 = vset.pattern.permute.xlu1 %v4032_v56 }
  0x6b   :  { %642 = vperm.xlu1 %3565, %v4148_v0  }
  0x6c   :  { %3590 = vset.pattern.permute.xlu0 %v4033_v57 }
  0x6d   :  { %758 = vperm.xlu0 %3590, %v4148_v0  }
  0x6f   :  { %3567 = vset.pattern.permute.xlu1 %v4034_v58 }
  0x70   :  { %358 = vperm.xlu1 %3567, %v4148_v0  }
  0x71   :  { %3593 = vset.pattern.permute.xlu0 %v4035_v59 }
  0x72   :  { %561 = vperm.xlu0 %3593, %v4148_v0  }
  0x74   :  { %3568 = vset.pattern.permute.xlu1 %v4036_v60 }
  0x75   :  { %490 = vperm.xlu1 %3568, %v4148_v0  }
  0x76   :  { %3598 = vset.pattern.permute.xlu0 %v3998_v9 }
  0x79   :  { %3570 = vset.pattern.permute.xlu1 %v4037_v61 }
  0x7a   :  { %429 = vperm.xlu1 %3570, %v4148_v0  }
  0x7e   :  { %3571 = vset.pattern.permute.xlu1 %v5701_v62 }
  0x7f   :  { %784 = vperm.xlu1 %3571, %v4148_v0  }
  0x83   :  { %3573 = vset.pattern.permute.xlu1 %v4039_v63 }
  0x84   :  { %515 = vperm.xlu1 %3573, %v4148_v0  }
  0x88   :  { %3574 = vset.pattern.permute.xlu1 %v4040_v1 }
  0x89   :  { %581 = vperm.xlu1 %3574, %v4148_v0  }
  0x8d   :  { %3576 = vset.pattern.permute.xlu1 %v4041_v2 }
  0x8e   :  { %297 = vperm.xlu1 %3576, %v4148_v0  }
  0x90   :  { %v4250_v3 = vpop.permute.xlu1 %657 }
  0x92   :  { %3577 = vset.pattern.permute.xlu1 %v4042_v4  ;;  %v4302_v38 = vpop.permute.xlu0 %586 }
  0x93   :  { %652 = vperm.xlu1 %3577, %v4148_v0  }
  0x95   :  { %v4253_v5 = vpop.permute.xlu1 %373 }
  0x97   :  { %3579 = vset.pattern.permute.xlu1 %v4043_v6  ;;  %v4310_v40 = vpop.permute.xlu0 %302 }
  0x98   :  { %525 = vperm.xlu1 %3579, %v4148_v0  }
  0x9a   :  { %v4256_v7 = vpop.permute.xlu1 %596 }
  0x9c   :  { %3580 = vset.pattern.permute.xlu1 %v4044_v8  ;;  %v4321_v45 = vpop.permute.xlu0 %728 }
  0x9d   :  { %723 = vperm.xlu1 %3580, %v4148_v0  }
  0x9f   :  { %v4259_v9 = vpop.permute.xlu1 %312 }
  0xa1   :  { %3582 = vset.pattern.permute.xlu1 %v4045_v10  ;;  %v4326_v54 = vpop.permute.xlu0 %667 }
  0xa2   :  { %439 = vperm.xlu1 %3582, %v4148_v0  }
  0xa4   :  { %v4262_v11 = vpop.permute.xlu1 %444 }
  0xa6   :  { %3583 = vset.pattern.permute.xlu1 %v4046_v12  ;;  %v4338_v59 = vpop.permute.xlu0 %738 }
  0xa7   :  { %535 = vperm.xlu1 %3583, %v4148_v0   ;;  %5803 = vst [vmem:[#allocation21_spill] sm:$0xff] %v4338_v59 }
  0xa9   :  { %v4265_v13 = vpop.permute.xlu1 %383 }
  0xab   :  { %3585 = vset.pattern.permute.xlu1 %v4047_v14  ;;  %v4352_v4 = vpop.permute.xlu0 %677 }
  0xac   :  { %616 = vperm.xlu1 %3585, %v4148_v0  }
  0xae   :  { %v4268_v15 = vpop.permute.xlu1 %606 }
  0xb0   :  { %3586 = vset.pattern.permute.xlu1 %v4048_v16  ;;  %v4367_v14 = vpop.permute.xlu0 %464 }
  0xb1   :  { %332 = vperm.xlu1 %3586, %v4148_v0   ;;  %5806 = vst [vmem:[#allocation24_spill] sm:$0xff] %v4367_v14 }
  0xb3   :  { %v4271_v17 = vpop.permute.xlu1 %322 }
  0xb5   :  { %3588 = vset.pattern.permute.xlu1 %v4049_v18 }
  0xb6   :  { %403 = vperm.xlu1 %3588, %v4148_v0  }
  0xb8   :  { %v4274_v19 = vpop.permute.xlu1 %454 }
  0xb9   :  { %5787 = vst [vmem:[#allocation5_spill] sm:$0xff] %v4274_v19 }
  0xba   :  { %3589 = vset.pattern.permute.xlu1 %v4050_v20 }
  0xbb   :  { %551 = vperm.xlu1 %3589, %v4148_v0  }
  0xbd   :  { %v4277_v21 = vpop.permute.xlu1 %393 }
  0xbe   :  { %5788 = vst [vmem:[#allocation6_spill] sm:$0xff] %v4277_v21 }
  0xbf   :  { %3591 = vset.pattern.permute.xlu1 %v4051_v22 }
  0xc0   :  { %267 = vperm.xlu1 %3591, %v4148_v0  }
  0xc2   :  { %v4280_v23 = vpop.permute.xlu1 %748 }
  0xc3   :  { %5789 = vst [vmem:[#allocation7_spill] sm:$0xff] %v4280_v23 }
  0xc4   :  { %3592 = vset.pattern.permute.xlu1 %v4052_v24 }
  0xc5   :  { %474 = vperm.xlu1 %3592, %v4148_v0  }
  0xc7   :  { %v4283_v26 = vpop.permute.xlu1 %622 }
  0xc8   :  { %5790 = vst [vmem:[#allocation8_spill] sm:$0xff] %v4283_v26 }
  0xc9   :  { %3594 = vset.pattern.permute.xlu1 %v4053_v25 }
  0xca   :  { %277 = vperm.xlu1 %3594, %v4148_v0  }
  0xcc   :  { %v4287_v28 = vpop.permute.xlu1 %338 }
  0xcd   :  { %5791 = vst [vmem:[#allocation9_spill] sm:$0xff] %v4287_v28 }
  0xce   :  { %3595 = vset.pattern.permute.xlu1 %v4054_v27  ;;  %v4382_v27 = vpop.permute.xlu0 %693 }
  0xcf   :  { %571 = vperm.xlu1 %3595, %v4148_v0   ;;  %5808 = vst [vmem:[#allocation26_spill] sm:$0xff] %v4382_v27 }
  0xd1   :  { %v4290_v30 = vpop.permute.xlu1 %409 }
  0xd2   :  { %5792 = vst [vmem:[#allocation10_spill] sm:$0xff] %v4290_v30 }
  0xd3   :  { %3596 = vset.pattern.permute.xlu1 %v4055_v29 }
  0xd4   :  { %287 = vperm.xlu1 %3596, %v4148_v0   ;;  %v4306_v0 = vshrl.u32 %v85_v37, 7 }
  0xd6   :  { %v4292_v32 = vpop.permute.xlu1 %632  ;;  %5799 = vst [vmem:[#allocation17_spill] sm:$0xff] %v4306_v0  ;;  %v4313_v41 = vsub.s32 0, %v4306_v0  ;;  %v4363_v12 = vsub.s32 1, %v4306_v0 }
  0xd7   :  { %5793 = vst [vmem:[#allocation11_spill] sm:$0xff] %v4292_v32 }
  0xd8   :  { %3597 = vset.pattern.permute.xlu1 %v4056_v31  ;;  %v88_v44 = vrot.slane %v83_v43, %v4313_v41  ;;  %v92_v22 = vrot.slane %v83_v43, %v4363_v12 }
  0xdb   :  { %v4294_v33 = vpop.permute.xlu1 %348 }
  0xdc   :  { %5794 = vst [vmem:[#allocation12_spill] sm:$0xff] %v4294_v33 }
  0xe0   :  { %v4296_v34 = vpop.permute.xlu1 %480 }
  0xe1   :  { %5795 = vst [vmem:[#allocation13_spill] sm:$0xff] %v4296_v34 }
  0xe5   :  { %v4298_v35 = vpop.permute.xlu1 %419 }
  0xe6   :  { %5796 = vst [vmem:[#allocation14_spill] sm:$0xff] %v4298_v35 }
  0xea   :  { %v4300_v36 = vpop.permute.xlu1 %642 }
  0xeb   :  { %5797 = vst [vmem:[#allocation15_spill] sm:$0xff] %v4300_v36 }
  0xef   :  { %v4304_v39 = vpop.permute.xlu1 %358 }
  0xf0   :  { %5798 = vst [vmem:[#allocation16_spill] sm:$0xff] %v4304_v39 }
  0xf4   :  { %v4315_v42 = vpop.permute.xlu1 %490 }
  0xf5   :  { %5800 = vst [vmem:[#allocation18_spill] sm:$0xff] %v4315_v42 }
  0xf9   :  { %v4323_v46 = vpop.permute.xlu1 %429 }
  0xfa   :  { %5801 = vst [vmem:[#allocation19_spill] sm:$0xff] %v4323_v46 }
  0xfe   :  { %v4328_v55 = vpop.permute.xlu1 %784 }
  0xff   :  { %5802 = vst [vmem:[#allocation20_spill] sm:$0xff] %v4328_v55 }
 0x103   :  { %v4340_v60 = vpop.permute.xlu1 %515 }
 0x104   :  { %v209_v47 = vpop.f32.mrb[0].mxu0  ;;  %5804 = vst [vmem:[#allocation22_spill] sm:$0xff] %v4340_v60 }
 0x105   :  { %v210_v49 = vadd.f32 %v209_v47, %v88_v44  ;;  %v211_v50 = vpop.f32.mrb[1].mxu0  ;;  %v4394_v47 = vpop.permute.xlu0 %764 }
 0x106   :  { %v213_v51 = vpop.f32.mrb[2].mxu0  ;;  %v212_v29 = vadd.f32 %v211_v50, %v92_v22  ;;  %5809 = vst [vmem:[#allocation27_spill] sm:$0xff] %v4394_v47 }
 0x107   :  { %vm217_vm0 = vcmp.gt.f32.partialorder %v210_v49, 0.0  ;;  %v220_v52 = vmul.f32 %v219_v48, %v210_v49  ;;  %v214_v53 = vpop.f32.mrb[3].mxu0 }
 0x108   :  { %v4354_v6 = vpop.permute.xlu1 %581  ;;  %v221_v44 = vmul.f32 %v219_v48, %v212_v29  ;;  %vm218_vm1 = vcmp.gt.f32.partialorder %v212_v29, 0.0 }
 0x109   :  { %v4330_v56 = vsel %vm217_vm0, %v210_v49, %v220_v52  ;;  %5805 = vst [vmem:[#allocation23_spill] sm:$0xff] %v4354_v6 }
 0x10a   :  { %v589_v57 = vmul.f32 %v4302_v38, %v4330_v56  ;;  %v305_v58 = vmul.f32 %v4310_v40, %v4330_v56  ;;  %v376_v61 = vmul.f32 %v4253_v5, %v4330_v56  ;;  %v660_v63 = vmul.f32 %v4250_v3, %v4330_v56 }
 0x10b   :  { %v599_v1 = vmul.f32 %v4256_v7, %v4330_v56  ;;  %v731_v2 = vmul.f32 %v4321_v45, %v4330_v56  ;;  %v315_v8 = vmul.f32 %v4259_v9, %v4330_v56  ;;  %v447_v10 = vmul.f32 %v4262_v11, %v4330_v56 }
 0x10c   :  { %591 = vrot.lane.b32.xlu0 %v589_v57, %s4057_s3  ;;  %307 = vrot.lane.b32.xlu1 %v305_v58, %s4057_s3  ;;  %v609_v18 = vmul.f32 %v4268_v15, %v4330_v56  ;;  %v670_v20 = vmul.f32 %v4326_v54, %v4330_v56  ;;  %v325_v24 = vmul.f32 %v4271_v17, %v4330_v56  ;;  %v4410_v57 = vpop.permute.xlu0 %703 }
 0x10d   :  { %v4369_v16 = vpop.permute.xlu1 %297  ;;  %v386_v25 = vmul.f32 %v4265_v13, %v4330_v56  ;;  %v741_v37 = vmul.f32 %v4338_v59, %v4330_v56  ;;  %v680_v43 = vmul.f32 %v4352_v4, %v4330_v56  ;;  %v457_v50 = vmul.f32 %v4274_v19, %v4330_v56  ;;  %5811 = vst [vmem:[#allocation29_spill] sm:$0xff] %v4410_v57 }
 0x10e   :  { %5807 = vst [vmem:[#allocation25_spill] sm:$0xff] %v4369_v16  ;;  %v751_v51 = vmul.f32 %v4280_v23, %v4330_v56  ;;  %v4402_v52 = vsel %vm218_vm1, %v212_v29, %v221_v44  ;;  %v396_v48 = vmul.f32 %v4277_v21, %v4330_v56 }
 0x10f   :  { %v625_v53 = vmul.f32 %v4283_v26, %v4402_v52  ;;  %v767_v29 = vmul.f32 %v4394_v47, %v4402_v52  ;;  %v645_v44 = vmul.f32 %v4300_v36, %v4402_v52 }
 0x110   :  { %378 = vrot.lane.b32.xlu0 %v376_v61, %s4057_s3  ;;  %662 = vrot.lane.b32.xlu1 %v660_v63, %s4057_s3  ;;  %v696_v61 = vmul.f32 %v4382_v27, %v4402_v52  ;;  %v467_v63 = vmul.f32 %v4367_v14, %v4330_v56 }
 0x112   :  { %v4384_v31 = vpop.permute.xlu1 %652 }
 0x114   :  { %601 = vrot.lane.b32.xlu1 %v599_v1, %s4058_s27  ;;  %733 = vrot.lane.b32.xlu0 %v731_v2, %s4057_s3  ;;  %v4422_v1 = vpop.permute.xlu0 %774 }
 0x115   :  { %5813 = vst [vmem:[#allocation31_spill] sm:$0xff] %v4422_v1 }
 0x117   :  { %v4396_v49 = vpop.permute.xlu1 %525 }
 0x118   :  { %317 = vrot.lane.b32.xlu1 %v315_v8, %s4058_s27  ;;  %449 = vrot.lane.b32.xlu0 %v447_v10, %s4057_s3  ;;  %5810 = vst [vmem:[#allocation28_spill] sm:$0xff] %v4396_v49  ;;  %v635_v8 = vmul.f32 %v4292_v32, %v4402_v52  ;;  %v341_v10 = vmul.f32 %v4287_v28, %v4402_v52  ;;  %v4436_v22 = vpop.permute.xlu0 %713 }
 0x119   :  { %5814 = vst [vmem:[#allocation32_spill] sm:$0xff] %v4436_v22 }
 0x11c   :  { %611 = vrot.lane.b32.xlu1 %v609_v18, %s4059_s28  ;;  %672 = vrot.lane.b32.xlu0 %v670_v20, %s4058_s27  ;;  %v4412_v58 = vpop.permute.xlu1 %723  ;;  %v351_v18 = vmul.f32 %v4294_v33, %v4402_v52  ;;  %v412_v20 = vmul.f32 %v4290_v30, %v4402_v52  ;;  %v584_v33 = vmul.f32 %v4354_v6, %v4330_v56 }
 0x11d   :  { %5812 = vst [vmem:[#allocation30_spill] sm:$0xff] %v4412_v58 }
 0x120   :  { %327 = vrot.lane.b32.xlu1 %v325_v24, %s4059_s28  ;;  %388 = vrot.lane.b32.xlu0 %v386_v25, %s4058_s27  ;;  %v706_v25 = vmul.f32 %v4410_v57, %v4402_v52 }
 0x121   :  { %v4424_v2 = vpop.permute.xlu1 %439 }
 0x124   :  { %743 = vrot.lane.b32.xlu0 %v741_v37, %s4058_s27  ;;  %682 = vrot.lane.b32.xlu1 %v680_v43, %s4059_s28  ;;  %v4448_v37 = vpop.permute.xlu0 %500 }
 0x125   :  { %5816 = vst [vmem:[#allocation34_spill] sm:$0xff] %v4448_v37 }
 0x126   :  { %v4438_v24 = vpop.permute.xlu1 %535 }
 0x127   :  { %5815 = vst [vmem:[#allocation33_spill] sm:$0xff] %v4438_v24 }
 0x128   :  { %459 = vrot.lane.b32.xlu0 %v457_v50, %s4058_s27  ;;  %753 = vrot.lane.b32.xlu1 %v751_v51, %s4059_s28  ;;  %v483_v50 = vmul.f32 %v4296_v34, %v4402_v52  ;;  %v361_v51 = vmul.f32 %v4304_v39, %v4402_v52 }
 0x12b   :  { %v4450_v43 = vpop.permute.xlu1 %616 }
 0x12c   :  { %398 = vrot.lane.b32.xlu0 %v396_v48, %s4059_s28  ;;  %627 = vrot.lane.b32.xlu1 %v625_v53, %s4057_s3  ;;  %5817 = vst [vmem:[#allocation35_spill] sm:$0xff] %v4450_v43  ;;  %v422_v48 = vmul.f32 %v4298_v35, %v4402_v52  ;;  %v4462_v53 = vpop.permute.xlu0 %231  ;;  %v619_v59 = vmul.f32 %v4450_v43, %v4402_v52 }
 0x12d   :  { %5818 = vst [vmem:[#allocation36_spill] sm:$0xff] %v4462_v53 }
 0x130   :  { %469 = vrot.lane.b32.xlu0 %v467_v63, %s4059_s28  ;;  %698 = vrot.lane.b32.xlu1 %v696_v61, %s4057_s3  ;;  %v4464_v61 = vpop.permute.xlu1 %332  ;;  %v716_v63 = vmul.f32 %v4436_v22, %v4402_v52 }
 0x131   :  { %5819 = vst [vmem:[#allocation37_spill] sm:$0xff] %v4464_v61 }
 0x134   :  { %343 = vrot.lane.b32.xlu0 %v341_v10, %s4057_s3  ;;  %637 = vrot.lane.b32.xlu1 %v635_v8, %s4058_s27  ;;  %v777_v8 = vmul.f32 %v4422_v1, %v4402_v52  ;;  %v4474_v10 = vpop.permute.xlu0 %368 }
 0x135   :  { %5820 = vst [vmem:[#allocation38_spill] sm:$0xff] %v4474_v10 }
 0x138   :  { %414 = vrot.lane.b32.xlu0 %v412_v20, %s4057_s3  ;;  %353 = vrot.lane.b32.xlu1 %v351_v18, %s4058_s27  ;;  %v4476_v18 = vpop.permute.xlu1 %403  ;;  %v787_v20 = vmul.f32 %v4328_v55, %v4402_v52 }
 0x139   :  { %5821 = vst [vmem:[#allocation39_spill] sm:$0xff] %v4476_v18 }
 0x13c   :  { %769 = vrot.lane.b32.xlu0 %v767_v29, %s4057_s3  ;;  %708 = vrot.lane.b32.xlu1 %v706_v25, %s4058_s27  ;;  %v493_v25 = vmul.f32 %v4315_v42, %v4402_v52  ;;  %v432_v29 = vmul.f32 %v4323_v46, %v4402_v52 }
 0x140   :  { %485 = vrot.lane.b32.xlu0 %v483_v50, %s4057_s3  ;;  %647 = vrot.lane.b32.xlu1 %v645_v44, %s4059_s28  ;;  %v4486_v44 = vpop.permute.xlu0 %241  ;;  %v4488_v50 = vpop.permute.xlu1 %551 }
 0x141   :  { %5822 = vst [vmem:[#allocation40_spill] sm:$0xff] %v4486_v44  ;;  %5823 = vst [vmem:[#allocation41_spill] sm:$0xff] %v4488_v50 }
 0x144   :  { %424 = vrot.lane.b32.xlu0 %v422_v48, %s4058_s27  ;;  %363 = vrot.lane.b32.xlu1 %v361_v51, %s4059_s28  ;;  %v3979_v51 = vld [vmem:[%s5685_s0] sm:$0xff]  ;;  %v503_v48 = vmul.f32 %v4448_v37, %v4402_v52 }
 0x148   :  { %779 = vrot.lane.b32.xlu0 %v777_v8, %s4058_s27  ;;  %718 = vrot.lane.b32.xlu1 %v716_v63, %s4059_s28  ;;  %v4060_v63 = vmov 36   ;;  %v4497_v8 = vpop.permute.xlu0 %251 }
 0x149   :  { %5824 = vst [vmem:[#allocation42_spill] sm:$0xff] %v4497_v8 }
 0x14c   :  { %495 = vrot.lane.b32.xlu0 %v493_v25, %s4058_s27  ;;  %789 = vrot.lane.b32.xlu1 %v787_v20, %s4059_s28  ;;  %v4499_v20 = vpop.permute.xlu1 %267  ;;  %v4061_v25 = vmov 4   ;;  %v4503_v62 = vpop.permute.xlu0 %687 }
 0x14d   :  { %5825 = vst [vmem:[#allocation43_spill] sm:$0xff] %v4499_v20  ;;  %5826 = vst [vmem:[#allocation44_spill] sm:$0xff] %v4503_v62 }
 0x150   :  { %434 = vrot.lane.b32.xlu0 %v432_v29, %s4059_s28  ;;  %510 = vperm.xlu1 %3597, %v3979_v51   ;;  %v518_v29 = vmul.f32 %v4340_v60, %v4330_v56  ;;  %v4505_v0 = vpop.permute.xlu1 %474  ;;  %v4517_v37 = vpop.permute.xlu0 %758 }
 0x151   :  { %5827 = vst [vmem:[#allocation45_spill] sm:$0xff] %v4505_v0  ;;  %5829 = vst [vmem:[#allocation46_spill] sm:$0xff] %v4517_v37 }
 0x154   :  { %3599 = vset.pattern.permute.xlu1 %v4060_v63  ;;  %505 = vrot.lane.b32.xlu0 %v503_v48, %s4059_s28  ;;  %v234_v63 = vmul.f32 %v4462_v53, %v4330_v56  ;;  %v5828_v48 = vmov 63   ;;  %v4519_v46 = vpop.permute.xlu1 %277  ;;  %v3689_v53 = vld [vmem:[%s5689_s4 + $0x64] ss:$8 sps:$4 sm:$0xff]  }
 0x155   :  { %545 = vperm.xlu1 %3599, %v3979_v51   ;;  %5830 = vst [vmem:[#allocation47_spill] sm:$0xff] %v4519_v46 }
 0x158   :  { %226 = vperm.xlu0 %3598, %v3979_v51  }
 0x159   :  { %3600 = vset.pattern.permute.xlu1 %v4061_v25  ;;  %v528_v25 = vmul.f32 %v4396_v49, %v4330_v56 }
 0x15a   :  { %261 = vperm.xlu1 %3600, %v3979_v51   ;;  %v244_v51 = vmul.f32 %v4486_v44, %v4330_v56  ;;  %v4532_v44 = vpop.permute.xlu1 %571 }
 0x15b   :  { %5832 = vst [vmem:[#allocation49_spill] sm:$0xff] %v4532_v44 }
 0x15c   :  { %520 = vrot.lane.b32.xlu0 %v518_v29, %s4057_s3  ;;  %v538_v29 = vmul.f32 %v4438_v24, %v4330_v56 }
 0x15d   :  { %3646 = vset.pattern.permute.xlu0 %v5828_v48  ;;  %v554_v48 = vmul.f32 %v4488_v50, %v4402_v52  ;;  %v574_v50 = vmul.f32 %v4532_v44, %v4402_v52 }
 0x15e   :  { %236 = vrot.lane.b32.xlu1 %v234_v63, %s4057_s3  ;;  %v254_v63 = vmul.f32 %v4497_v8, %v4330_v56 }
 0x160   :  { %530 = vrot.lane.b32.xlu0 %v528_v25, %s4058_s27  ;;  %v4530_v25 = vpop.permute.xlu0 %561 }
 0x161   :  { %5831 = vst [vmem:[#allocation48_spill] sm:$0xff] %v4530_v25  ;;  %v564_v8 = vmul.f32 %v4530_v25, %v4402_v52 }
 0x162   :  { %246 = vrot.lane.b32.xlu1 %v244_v51, %s4058_s27  ;;  %v270_v51 = vmul.f32 %v4499_v20, %v4402_v52 }
 0x164   :  { %540 = vrot.lane.b32.xlu0 %v538_v29, %s4059_s28  ;;  %v280_v29 = vmul.f32 %v4519_v46, %v4402_v52 }
 0x166   :  { %256 = vrot.lane.b32.xlu1 %v254_v63, %s4059_s28  ;;  %v4543_v63 = vpop.permute.xlu1 %287 }
 0x167   :  { %5833 = vst [vmem:[#allocation50_spill] sm:$0xff] %v4543_v63 }
 0x168   :  { %556 = vrot.lane.b32.xlu0 %v554_v48, %s4057_s3  ;;  %v290_v48 = vmul.f32 %v4543_v63, %v4402_v52  ;;  %v3679_v63 = vld [vmem:[%s5689_s4 + $0x20] ss:$8 sps:$4 sm:$0xff]  }
 0x16a   :  { %272 = vrot.lane.b32.xlu1 %v270_v51, %s4057_s3  ;;  %v3671_v51 = vld [vmem:[%s5689_s4 + $0x4] ss:$8 sps:$4 sm:$0xff]  }
 0x16b   :  { %1032 = vmatprep.subr.bf16.mxu1 %v3671_v51  ;;  %v3680_v51 = vld [vmem:[%s5689_s4 + $0x34] ss:$8 sps:$4 sm:$0xff]  }
 0x16c   :  { %566 = vrot.lane.b32.xlu0 %v564_v8, %s4058_s27  ;;  %v3673_v8 = vld [vmem:[%s5689_s4] ss:$8 sps:$4 sm:$0xff]  }
 0x16d   :  { %1033 = vmatpush1.bf16.msra.mxu1 %v3673_v8  ;;  %v3682_v8 = vld [vmem:[%s5689_s4 + $0x30] ss:$8 sps:$4 sm:$0xff]  }
 0x16e   :  { %282 = vrot.lane.b32.xlu1 %v280_v29, %s4058_s27  ;;  %v3674_v29 = vld [vmem:[%s5689_s4 + $0x14] ss:$8 sps:$4 sm:$0xff]  }
 0x16f   :  { %1034 = vmatprep.subr.bf16.mxu1 %v3674_v29 }
 0x170   :  { %576 = vrot.lane.b32.xlu0 %v574_v50, %s4059_s28  ;;  %v3676_v50 = vld [vmem:[%s5689_s4 + $0x10] ss:$8 sps:$4 sm:$0xff]  }
 0x171   :  { %1035 = vmatpush1.bf16.msra.mxu1 %v3676_v50  ;;  %v3683_v50 = vld [vmem:[%s5689_s4 + $0x44] ss:$8 sps:$4 sm:$0xff]  }
 0x172   :  { %292 = vrot.lane.b32.xlu1 %v290_v48, %s4059_s28  ;;  %v3677_v48 = vld [vmem:[%s5689_s4 + $0x24] ss:$8 sps:$4 sm:$0xff]  }
 0x173   :  { %1036 = vmatprep.subr.bf16.mxu1 %v3677_v48  ;;  %v3685_v48 = vld [vmem:[%s5689_s4 + $0x40] ss:$8 sps:$4 sm:$0xff]  }
 0x175   :  { %1037 = vmatpush1.bf16.msra.mxu1 %v3679_v63  ;;  %v3686_v63 = vld [vmem:[%s5689_s4 + $0x54] ss:$8 sps:$4 sm:$0xff]  }
 0x176   :  { %1038 = vmatprep.subr.bf16.mxu1 %v3680_v51  ;;  %v3688_v51 = vld [vmem:[%s5689_s4 + $0x50] ss:$8 sps:$4 sm:$0xff]  }
 0x179   :  { %1039 = vmatpush1.bf16.msra.mxu1 %v3682_v8 }
 0x17a   :  { %1040 = vmatprep.subr.bf16.mxu1 %v3683_v50  ;;  %v3691_v50 = vld [vmem:[%s5689_s4 + $0x60] ss:$8 sps:$4 sm:$0xff]  }
 0x17d   :  { %1041 = vmatpush1.bf16.msra.mxu1 %v3685_v48  ;;  %v3692_v48 = vld [vmem:[%s5689_s4 + $0x74] ss:$8 sps:$4 sm:$0xff]  }
 0x17e   :  { %v308_v29 = vpop.permute.xlu1 %307  ;;  %v592_v46 = vpop.permute.xlu0 %591  ;;  %1042 = vmatprep.subr.bf16.mxu1 %v3686_v63  ;;  %v3694_v63 = vld [vmem:[%s5689_s4 + $0x70] ss:$8 sps:$4 sm:$0xff]  }
 0x17f   :  { %v594_v32 = vadd.f32 %v592_v46, %v584_v33  ;;  %v3704_v33 = vld [vmem:[%s5689_s4 + $0xb4] ss:$8 sps:$4 sm:$0xff]  }
 0x181   :  { %1043 = vmatpush1.bf16.msra.mxu1 %v3688_v51  ;;  %v3695_v51 = vld [vmem:[%s5689_s4 + $0x84] ss:$8 sps:$4 sm:$0xff]  }
 0x182   :  { %v4582_v20 = vpop.permute.xlu1 %662  ;;  %v4584_v44 = vpop.permute.xlu0 %378  ;;  %1044 = vmatprep.subr.bf16.mxu1 %v3689_v53  ;;  %v3697_v53 = vld [vmem:[%s5689_s4 + $0x80] ss:$8 sps:$4 sm:$0xff]  }
 0x185   :  { %1045 = vmatpush1.bf16.msra.mxu1 %v3691_v50  ;;  %v3698_v50 = vld [vmem:[%s5689_s4 + $0x94] ss:$8 sps:$4 sm:$0xff]  }
 0x186   :  { %v602_v25 = vpop.permute.xlu1 %601  ;;  %v4592_v8 = vpop.permute.xlu0 %733  ;;  %1046 = vmatprep.subr.bf16.mxu1 %v3692_v48  ;;  %v3700_v48 = vld [vmem:[%s5689_s4 + $0x90] ss:$8 sps:$4 sm:$0xff]  }
 0x189   :  { %1047 = vmatpush1.bf16.msra.mxu1 %v3694_v63  ;;  %v3701_v63 = vld [vmem:[%s5689_s4 + $0xa4] ss:$8 sps:$4 sm:$0xff]  }
 0x18a   :  { %v318_v24 = vpop.permute.xlu1 %317  ;;  %v4600_v49 = vpop.permute.xlu0 %449  ;;  %1048 = vmatprep.subr.bf16.mxu1 %v3695_v51  ;;  %v3703_v51 = vld [vmem:[%s5689_s4 + $0xa0] ss:$8 sps:$4 sm:$0xff]  }
 0x18d   :  { %1049 = vmatpush1.bf16.msra.mxu1 %v3697_v53 }
 0x18e   :  { %v612_v60 = vpop.permute.xlu1 %611  ;;  %v4608_v42 = vpop.permute.xlu0 %672  ;;  %1050 = vmatprep.subr.bf16.mxu1 %v3698_v50 }
 0x191   :  { %1051 = vmatpush1.bf16.msra.mxu1 %v3700_v48  ;;  %v300_v48 = vmul.f32 %v4369_v16, %v4330_v56  ;;  %v335_v16 = vmul.f32 %v4464_v61, %v4402_v52 }
 0x192   :  { %v328_v55 = vpop.permute.xlu1 %327  ;;  %v389_v1 = vpop.permute.xlu0 %388  ;;  %1052 = vmatprep.subr.bf16.mxu1 %v3701_v63  ;;  %v604_v63 = vadd.f32 %v602_v25, %v594_v32  ;;  %v3707_v32 = vld [vmem:[%s5689_s4 + $0xc4] ss:$8 sps:$4 sm:$0xff]   ;;  %v655_v25 = vmul.f32 %v4384_v31, %v4330_v56 }
 0x193   :  { %v310_v28 = vadd.f32 %v308_v29, %v300_v48  ;;  %v371_v29 = vmul.f32 %v4474_v10, %v4330_v56 }
 0x194   :  { %v614_v21 = vadd.f32 %v612_v60, %v604_v63 }
 0x195   :  { %1053 = vmatpush1.bf16.msra.mxu1 %v3703_v51  ;;  %v320_v51 = vadd.f32 %v318_v24, %v310_v28  ;;  %v3706_v28 = vld [vmem:[%s5689_s4 + $0xb0] ss:$8 sps:$4 sm:$0xff]  }
 0x196   :  { %v4622_v22 = vpop.permute.xlu1 %682  ;;  %v4624_v35 = vpop.permute.xlu0 %743  ;;  %v620_v46 = vadd.f32 %v619_v59, %v614_v21  ;;  %1054 = vmatprep.subr.bf16.mxu1 %v3704_v33  ;;  %v3710_v21 = vld [vmem:[%s5689_s4 + $0xd4] ss:$8 sps:$4 sm:$0xff]   ;;  %v381_v59 = vadd.f32 %v4584_v44, %v371_v29  ;;  %v3712_v44 = vld [vmem:[%s5689_s4 + $0xd0] ss:$8 sps:$4 sm:$0xff]  }
 0x197   :  { %v330_v26 = vadd.f32 %v328_v55, %v320_v51  ;;  %v3709_v51 = vld [vmem:[%s5689_s4 + $0xc0] ss:$8 sps:$4 sm:$0xff]  }
 0x199   :  { %v336_v55 = vadd.f32 %v335_v16, %v330_v26  ;;  %1055 = vmatpush1.bf16.msra.mxu1 %v3706_v28  ;;  %v665_v26 = vadd.f32 %v4582_v20, %v655_v25 }
 0x19a   :  { %v4632_v39 = vpop.permute.xlu1 %753  ;;  %v4634_v53 = vpop.permute.xlu0 %459  ;;  %1056 = vmatprep.subr.bf16.mxu1 %v3707_v32 }
 0x19b   :  { %v675_v32 = vadd.f32 %v4608_v42, %v665_v26  ;;  %v690_v42 = vmul.f32 %v4503_v62, %v4402_v52 }
 0x19d   :  { %1057 = vmatpush1.bf16.msra.mxu1 %v3709_v51  ;;  %v685_v20 = vadd.f32 %v4622_v22, %v675_v32 }
 0x19e   :  { %v628_v34 = vpop.permute.xlu1 %627  ;;  %v399_v36 = vpop.permute.xlu0 %398  ;;  %1058 = vmatprep.subr.bf16.mxu1 %v3710_v21 }
 0x19f   :  { %v630_v48 = vadd.f32 %v628_v34, %v620_v46  ;;  %v726_v34 = vmul.f32 %v4412_v58, %v4330_v56  ;;  %v691_v22 = vadd.f32 %v690_v42, %v685_v20 }
 0x1a1   :  { %1059 = vmatpush1.bf16.msra.mxu1 %v3712_v44 }
 0x1a2   :  { %v4636_v47 = vpop.permute.xlu1 %698  ;;  %v4638_v50 = vpop.permute.xlu0 %469 }
 0x1a3   :  { %v701_v21 = vadd.f32 %v4636_v47, %v691_v22 }
 0x1a6   :  { %v638_v57 = vpop.permute.xlu1 %637  ;;  %v344_v30 = vpop.permute.xlu0 %343 }
 0x1a7   :  { %v346_v63 = vadd.f32 %v344_v30, %v336_v55  ;;  %v640_v16 = vadd.f32 %v638_v57, %v630_v48  ;;  %v442_v30 = vmul.f32 %v4424_v2, %v4330_v56  ;;  %v391_v55 = vadd.f32 %v389_v1, %v381_v59 }
 0x1a8   :  { %v761_v59 = vmul.f32 %v4517_v37, %v4402_v52 }
 0x1a9   :  { %v452_v57 = vadd.f32 %v4600_v49, %v442_v30  ;;  %v401_v25 = vadd.f32 %v399_v36, %v391_v55  ;;  %v3715_v36 = vld [vmem:[%s5689_s4 + $0xe0] ss:$8 sps:$4 sm:$0xff]  }
 0x1aa   :  { %v354_v14 = vpop.permute.xlu1 %353  ;;  %v4644_v27 = vpop.permute.xlu0 %414 }
 0x1ab   :  { %v356_v33 = vadd.f32 %v354_v14, %v346_v63  ;;  %v736_v14 = vadd.f32 %v4592_v8, %v726_v34  ;;  %v462_v63 = vadd.f32 %v4634_v53, %v452_v57  ;;  %v406_v8 = vmul.f32 %v4476_v18, %v4402_v52  ;;  %v3716_v53 = vld [vmem:[%s5689_s4 + $0xf4] ss:$8 sps:$4 sm:$0xff]  }
 0x1ad   :  { %v746_v48 = vadd.f32 %v4624_v35, %v736_v14 }
 0x1ae   :  { %v4646_v19 = vpop.permute.xlu1 %708  ;;  %v4648_v23 = vpop.permute.xlu0 %769 }
 0x1af   :  { %v756_v49 = vadd.f32 %v4632_v39, %v746_v48  ;;  %v477_v39 = vmul.f32 %v4505_v0, %v4402_v52 }
 0x1b2   :  { %v648_v60 = vpop.permute.xlu1 %647  ;;  %v486_v24 = vpop.permute.xlu0 %485 }
 0x1b3   :  { %v650_v10 = vadd.f32 %v648_v60, %v640_v16  ;;  %v3713_v60 = vld [vmem:[%s5689_s4 + $0xe4] ss:$8 sps:$4 sm:$0xff]   ;;  %v711_v16 = vadd.f32 %v4646_v19, %v701_v21 }
 0x1b4   :  { %1060 = vmatprep.subr.bf16.mxu1 %v3713_v60 }
 0x1b5   :  { %1061 = vmatpush1.bf16.msra.mxu1 %v3715_v36 }
 0x1b6   :  { %v364_v28 = vpop.permute.xlu1 %363  ;;  %v425_v46 = vpop.permute.xlu0 %424  ;;  %1062 = vmatprep.subr.bf16.mxu1 %v3716_v53 }
 0x1b7   :  { %v366_v61 = vadd.f32 %v364_v28, %v356_v33  ;;  %v762_v33 = vadd.f32 %v761_v59, %v756_v49 }
 0x1b9   :  { %v3601_v29 = vpack.i.bf16 %v366_v61, %v650_v10  ;;  %v472_v61 = vadd.f32 %v4638_v50, %v462_v63  ;;  %v407_v10 = vadd.f32 %v406_v8, %v401_v25  ;;  %v3718_v50 = vld [vmem:[%s5689_s4 + $0xf0] ss:$8 sps:$4 sm:$0xff]   ;;  %s4739_s4 = sld [smem:[#allocation2 + $0x1]] }
 0x1ba   :  { %v780_v1 = vpop.permute.xlu0 %779  ;;  %v719_v35 = vpop.permute.xlu1 %718  ;;  %1063 = vmatpush1.bf16.msra.mxu1 %v3718_v50 }
 0x1bb   :  { %3602 = vrot.lane.b32.xlu0 %v3601_v29, %s4059_s28  ;;  %v417_v26 = vadd.f32 %v4644_v27, %v407_v10  ;;  %v478_v34 = vadd.f32 %v477_v39, %v472_v61  ;;  %v772_v27 = vadd.f32 %v4648_v23, %v762_v33  ;;  %v721_v32 = vadd.f32 %v719_v35, %v711_v16 }
 0x1bd   :  { %v427_v30 = vadd.f32 %v425_v46, %v417_v26  ;;  %v488_v28 = vadd.f32 %v486_v24, %v478_v34  ;;  %v782_v14 = vadd.f32 %v780_v1, %v772_v27 }
 0x1be   :  { %v496_v51 = vpop.permute.xlu0 %495  ;;  %v790_v44 = vpop.permute.xlu1 %789 }
 0x1bf   :  { %v498_v57 = vadd.f32 %v496_v51, %v488_v28  ;;  %v792_v29 = vadd.f32 %v790_v44, %v782_v14 }
 0x1c2   :  { %v435_v47 = vpop.permute.xlu0 %434 }
 0x1c3   :  { %v437_v55 = vadd.f32 %v435_v47, %v427_v30 }
 0x1c5   :  { %v3606_v20 = vpack.i.bf16 %v437_v55, %v721_v32 }
 0x1c6   :  { %v506_v25 = vpop.permute.xlu0 %505 }
 0x1c7   :  { %v508_v42 = vadd.f32 %v506_v25, %v498_v57  ;;  %3607 = vrot.lane.b32.xlu1 %v3606_v20, %s4058_s27 }
 0x1c9   :  { %v3611_v19 = vpack.i.bf16 %v508_v42, %v792_v29 }
 0x1cb   :  { %3612 = vrot.lane.b32.xlu0 %v3611_v19, %s4057_s3 }
 0x1cf   :  { %v4717_v46 = vpop.permute.xlu1 %510 }
 0x1d0   :  { %v513_v10 = vmul.f32 %v4717_v46, %v4330_v56 }
 0x1d4   :  { %v4719_v60 = vpop.permute.xlu1 %545 }
 0x1d5   :  { %v548_v33 = vmul.f32 %v4719_v60, %v4402_v52 }
 0x1d7   :  { %v4721_v23 = vpop.permute.xlu0 %226 }
 0x1d8   :  { %v229_v35 = vmul.f32 %v4721_v23, %v4330_v56 }
 0x1d9   :  { %v4723_v24 = vpop.permute.xlu1 %261 }
 0x1da   :  { %v264_v34 = vmul.f32 %v4723_v24, %v4402_v52 }
 0x1db   :  { %v521_v48 = vpop.permute.xlu0 %520 }
 0x1dc   :  { %v523_v51 = vadd.f32 %v521_v48, %v513_v10 }
 0x1dd   :  { %v237_v1 = vpop.permute.xlu1 %236 }
 0x1de   :  { %v239_v53 = vadd.f32 %v237_v1, %v229_v35 }
 0x1df   :  { %v531_v63 = vpop.permute.xlu0 %530 }
 0x1e0   :  { %v533_v26 = vadd.f32 %v531_v63, %v523_v51 }
 0x1e1   :  { %v247_v8 = vpop.permute.xlu1 %246 }
 0x1e2   :  { %v249_v59 = vadd.f32 %v247_v8, %v239_v53  ;;  %v860_v53 = vld [vmem:[%s5690_s5] sm:$0x3] }
 0x1e3   :  { %v541_v36 = vpop.permute.xlu0 %540 }
 0x1e4   :  { %v543_v50 = vadd.f32 %v541_v36, %v533_v26 }
 0x1e5   :  { %v257_v49 = vpop.permute.xlu1 %256 }
 0x1e6   :  { %v259_v16 = vadd.f32 %v257_v49, %v249_v59  ;;  %v549_v47 = vadd.f32 %v548_v33, %v543_v50  ;;  %v1076_v59 = vstv %s4739_s4 }
 0x1e7   :  { %v557_v22 = vpop.permute.xlu0 %556 }
 0x1e8   :  { %v265_v27 = vadd.f32 %v264_v34, %v259_v16  ;;  %v559_v56 = vadd.f32 %v557_v22, %v549_v47 }
 0x1e9   :  { %v273_v61 = vpop.permute.xlu1 %272 }
 0x1ea   :  { %v275_v55 = vadd.f32 %v273_v61, %v265_v27 }
 0x1eb   :  { %v567_v21 = vpop.permute.xlu0 %566 }
 0x1ec   :  { %v569_v14 = vadd.f32 %v567_v21, %v559_v56  ;;  %v865_v21 = vrot.slane %v860_v53, %v4313_v41 }
 0x1ed   :  { %v283_v39 = vpop.permute.xlu1 %282 }
 0x1ee   :  { %v285_v57 = vadd.f32 %v283_v39, %v275_v55 }
 0x1ef   :  { %v577_v30 = vpop.permute.xlu0 %576 }
 0x1f0   :  { %v579_v19 = vadd.f32 %v577_v30, %v569_v14 }
 0x1f1   :  { %v293_v28 = vpop.permute.xlu1 %292 }
 0x1f2   :  { %v295_v48 = vadd.f32 %v293_v28, %v285_v57 }
 0x22d   :  { %v3603_v32 = vpop.permute.xlu0 %3602 }
 0x22e   :  { %v3605_v20 = vunpack.i.h.bf16 %v3603_v32  ;;  %v3604_v25 = vunpack.i.l.bf16 %v3603_v32 }
 0x230   :  { %v818_v52 = vsel %vm817_vm2, %v295_v48, %v3605_v20  ;;  %v823_v36 = vsel %vm817_vm2, %v579_v19, %v3604_v25  ;;  %v869_v25 = vrot.slane %v860_v53, %v4363_v12 }
 0x239   :  { %v3608_v44 = vpop.permute.xlu1 %3607 }
 0x23a   :  { %v3610_v29 = vunpack.i.h.bf16 %v3608_v44  ;;  %v3609_v42 = vunpack.i.l.bf16 %v3608_v44 }
 0x23c   :  { %v824_v49 = vsel %vm819_vm3, %v823_v36, %v3609_v42  ;;  %v820_v22 = vsel %vm819_vm3, %v818_v52, %v3610_v29 }
 0x23d   :  { %v3613_v1 = vpop.permute.xlu0 %3612 }
 0x23e   :  { %v3615_v63 = vunpack.i.h.bf16 %v3613_v1  ;;  %v3614_v8 = vunpack.i.l.bf16 %v3613_v1  ;;  %v5834_v1 = vld [vmem:[#allocation21_spill] sm:$0xff] }
 0x240   :  { %v825_v61 = vsel %vm821_vm4, %v824_v49, %v3614_v8  ;;  %v822_v10 = vsel %vm821_vm4, %v820_v22, %v3615_v63  ;;  %v5835_v8 = vld [vmem:[#allocation7_spill] sm:$0xff]  ;;  %v5836_v49 = vld [vmem:[#allocation5_spill] sm:$0xff] }
 0x241   :  { %v827_v35 = vpack.c.bf16 %v825_v61, %v825_v61  ;;  %v826_v51 = vpack.c.bf16 %v822_v10, %v822_v10  ;;  %v5837_v10 = vld [vmem:[#allocation8_spill] sm:$0xff] }
 0x243   :  { %1064 = vmatprep.mubr.bf16.mxu1 %v827_v35 }
 0x244   :  { %1065 = vmatmul.mubr.bf16.vlgmr.msra.gmra.mrb[0].mxu1 %v826_v51  ;;  %v5838_v51 = vld [vmem:[#allocation6_spill] sm:$0xff] }
 0x317   :  { %v1066_v26 = vpop.f32.mrb[0].mxu1 }
 0x318   :  { %v1067_v39 = vadd.f32 %v1066_v26, %v865_v21  ;;  %v1068_v50 = vpop.f32.mrb[1].mxu1  ;;  %v5839_v21 = vld [vmem:[#allocation26_spill] sm:$0xff] }
 0x319   :  { %v1070_v16 = vpop.f32.mrb[2].mxu1  ;;  %v1069_v19 = vadd.f32 %v1068_v50, %v869_v25  ;;  %v5841_v50 = vld [vmem:[#allocation11_spill] sm:$0xff]  ;;  %v5848_v25 = vld [vmem:[#allocation13_spill] sm:$0xff] }
 0x31a   :  { %vm1074_vm5 = vcmp.gt.f32.partialorder %v1067_v39, 0.0  ;;  %v1077_v33 = vmul.f32 %v1076_v59, %v1067_v39  ;;  %v1071_v34 = vpop.f32.mrb[3].mxu1 }
 0x31b   :  { %v1078_v63 = vmul.f32 %v1076_v59, %v1069_v19  ;;  %vm1075_vm6 = vcmp.gt.f32.partialorder %v1069_v19, 0.0  ;;  %v5840_v59 = vld [vmem:[#allocation24_spill] sm:$0xff] }
 0x31c   :  { %v4746_v30 = vsel %vm1074_vm5, %v1067_v39, %v1077_v33  ;;  %v5842_v33 = vld [vmem:[#allocation9_spill] sm:$0xff] }
 0x31d   :  { %v1277_v47 = vmul.f32 %v4746_v30, %v4302_v38  ;;  %v1316_v27 = vmul.f32 %v4746_v30, %v4250_v3  ;;  %v1283_v28 = vmul.f32 %v4746_v30, %v4256_v7  ;;  %v1121_v32 = vmul.f32 %v4746_v30, %v4310_v40 }
 0x31e   :  { %v1127_v56 = vmul.f32 %v4746_v30, %v4259_v9  ;;  %v1160_v55 = vmul.f32 %v4746_v30, %v4253_v5  ;;  %v1322_v44 = vmul.f32 %v4746_v30, %v4326_v54  ;;  %v1355_v14 = vmul.f32 %v4746_v30, %v4321_v45 }
 0x31f   :  { %1279 = vrot.lane.b32.xlu1 %v1277_v47, %s4057_s3  ;;  %1123 = vrot.lane.b32.xlu0 %v1121_v32, %s4057_s3  ;;  %v1289_v57 = vmul.f32 %v4746_v30, %v4268_v15  ;;  %v1199_v20 = vmul.f32 %v4746_v30, %v4262_v11  ;;  %v1133_v29 = vmul.f32 %v4746_v30, %v4271_v17  ;;  %v5843_v47 = vld [vmem:[#allocation12_spill] sm:$0xff] }
 0x320   :  { %v1166_v42 = vmul.f32 %v4746_v30, %v4265_v13  ;;  %v1328_v48 = vmul.f32 %v4746_v30, %v4352_v4  ;;  %v1361_v52 = vmul.f32 %v4746_v30, %v5834_v1  ;;  %v1367_v36 = vmul.f32 %v4746_v30, %v5835_v8 }
 0x321   :  { %v1205_v22 = vmul.f32 %v4746_v30, %v5836_v49  ;;  %v4795_v61 = vsel %vm1075_vm6, %v1069_v19, %v1078_v63  ;;  %v1172_v53 = vmul.f32 %v4746_v30, %v5838_v51  ;;  %v1211_v39 = vmul.f32 %v4746_v30, %v5840_v59  ;;  %v5851_v63 = vld [vmem:[#allocation32_spill] sm:$0xff] }
 0x322   :  { %v1297_v35 = vmul.f32 %v4795_v61, %v5837_v10  ;;  %v1336_v26 = vmul.f32 %v4795_v61, %v5839_v21  ;;  %v1303_v16 = vmul.f32 %v4795_v61, %v5841_v50  ;;  %v1141_v34 = vmul.f32 %v4795_v61, %v5842_v33 }
 0x323   :  { %1318 = vrot.lane.b32.xlu1 %v1316_v27, %s4057_s3  ;;  %1162 = vrot.lane.b32.xlu0 %v1160_v55, %s4057_s3  ;;  %v1147_v27 = vmul.f32 %v4795_v61, %v5843_v47 }
 0x327   :  { %1285 = vrot.lane.b32.xlu1 %v1283_v28, %s4058_s27  ;;  %1357 = vrot.lane.b32.xlu0 %v1355_v14, %s4057_s3  ;;  %v5844_v28 = vld [vmem:[#allocation10_spill] sm:$0xff] }
 0x328   :  { %v1180_v32 = vmul.f32 %v4795_v61, %v5844_v28 }
 0x32b   :  { %1129 = vrot.lane.b32.xlu1 %v1127_v56, %s4058_s27  ;;  %1201 = vrot.lane.b32.xlu0 %v1199_v20, %s4057_s3  ;;  %v5845_v56 = vld [vmem:[#allocation29_spill] sm:$0xff] }
 0x32c   :  { %v1342_v55 = vmul.f32 %v4795_v61, %v5845_v56 }
 0x32f   :  { %1324 = vrot.lane.b32.xlu1 %v1322_v44, %s4058_s27  ;;  %1168 = vrot.lane.b32.xlu0 %v1166_v42, %s4058_s27  ;;  %v5846_v44 = vld [vmem:[#allocation27_spill] sm:$0xff]  ;;  %v5849_v42 = vld [vmem:[#allocation16_spill] sm:$0xff] }
 0x330   :  { %v1375_v14 = vmul.f32 %v4795_v61, %v5846_v44  ;;  %v1153_v19 = vmul.f32 %v4795_v61, %v5849_v42 }
 0x333   :  { %1291 = vrot.lane.b32.xlu1 %v1289_v57, %s4059_s28  ;;  %1363 = vrot.lane.b32.xlu0 %v1361_v52, %s4058_s27  ;;  %v5847_v57 = vld [vmem:[#allocation15_spill] sm:$0xff] }
 0x334   :  { %v1309_v20 = vmul.f32 %v4795_v61, %v5847_v57 }
 0x337   :  { %1135 = vrot.lane.b32.xlu1 %v1133_v29, %s4059_s28  ;;  %1207 = vrot.lane.b32.xlu0 %v1205_v22, %s4058_s27  ;;  %v1219_v29 = vmul.f32 %v4795_v61, %v5848_v25  ;;  %v5852_v22 = vld [vmem:[#allocation31_spill] sm:$0xff] }
 0x33b   :  { %1330 = vrot.lane.b32.xlu1 %v1328_v48, %s4059_s28  ;;  %1174 = vrot.lane.b32.xlu0 %v1172_v53, %s4059_s28  ;;  %v5850_v48 = vld [vmem:[#allocation14_spill] sm:$0xff]  ;;  %v5853_v53 = vld [vmem:[#allocation20_spill] sm:$0xff] }
 0x33c   :  { %v1186_v52 = vmul.f32 %v4795_v61, %v5850_v48 }
 0x33f   :  { %1369 = vrot.lane.b32.xlu1 %v1367_v36, %s4059_s28  ;;  %1213 = vrot.lane.b32.xlu0 %v1211_v39, %s4059_s28  ;;  %v1348_v36 = vmul.f32 %v4795_v61, %v5851_v63  ;;  %v5854_v39 = vld [vmem:[#allocation18_spill] sm:$0xff] }
 0x343   :  { %1299 = vrot.lane.b32.xlu1 %v1297_v35, %s4057_s3  ;;  %1143 = vrot.lane.b32.xlu0 %v1141_v34, %s4057_s3  ;;  %v1381_v35 = vmul.f32 %v4795_v61, %v5852_v22  ;;  %v5855_v34 = vld [vmem:[#allocation22_spill] sm:$0xff] }
 0x347   :  { %1338 = vrot.lane.b32.xlu1 %v1336_v26, %s4057_s3  ;;  %1182 = vrot.lane.b32.xlu0 %v1180_v32, %s4057_s3  ;;  %v1387_v26 = vmul.f32 %v4795_v61, %v5853_v53  ;;  %v5856_v32 = vld [vmem:[#allocation19_spill] sm:$0xff]  ;;  %v1276_v53 = vmul.f32 %v4746_v30, %v4354_v6 }
 0x34b   :  { %1305 = vrot.lane.b32.xlu1 %v1303_v16, %s4058_s27  ;;  %1377 = vrot.lane.b32.xlu0 %v1375_v14, %s4057_s3  ;;  %v1225_v16 = vmul.f32 %v4795_v61, %v5854_v39  ;;  %v5857_v14 = vld [vmem:[#allocation28_spill] sm:$0xff] }
 0x34f   :  { %1149 = vrot.lane.b32.xlu1 %v1147_v27, %s4058_s27  ;;  %1221 = vrot.lane.b32.xlu0 %v1219_v29, %s4057_s3  ;;  %v1238_v27 = vmul.f32 %v4746_v30, %v5855_v34  ;;  %v5858_v29 = vld [vmem:[#allocation34_spill] sm:$0xff] }
 0x353   :  { %1344 = vrot.lane.b32.xlu1 %v1342_v55, %s4058_s27  ;;  %1188 = vrot.lane.b32.xlu0 %v1186_v52, %s4058_s27  ;;  %v1192_v55 = vmul.f32 %v4795_v61, %v5856_v32  ;;  %v5859_v52 = vld [vmem:[#allocation33_spill] sm:$0xff] }
 0x354   :  { %v5869_v32 = vld [vmem:[#allocation25_spill] sm:$0xff] }
 0x355   :  { %v1120_v42 = vmul.f32 %v4746_v30, %v5869_v32 }
 0x357   :  { %1311 = vrot.lane.b32.xlu1 %v1309_v20, %s4059_s28  ;;  %1383 = vrot.lane.b32.xlu0 %v1381_v35, %s4058_s27  ;;  %v1244_v20 = vmul.f32 %v4746_v30, %v5857_v14  ;;  %v5860_v35 = vld [vmem:[#allocation36_spill] sm:$0xff] }
 0x35b   :  { %1155 = vrot.lane.b32.xlu1 %v1153_v19, %s4059_s28  ;;  %1227 = vrot.lane.b32.xlu0 %v1225_v16, %s4058_s27  ;;  %v1231_v19 = vmul.f32 %v4795_v61, %v5858_v29  ;;  %v5861_v16 = vld [vmem:[#allocation41_spill] sm:$0xff] }
 0x35f   :  { %1350 = vrot.lane.b32.xlu1 %v1348_v36, %s4059_s28  ;;  %1194 = vrot.lane.b32.xlu0 %v1192_v55, %s4059_s28  ;;  %v1250_v36 = vmul.f32 %v4746_v30, %v5859_v52  ;;  %v5862_v55 = vld [vmem:[#allocation40_spill] sm:$0xff]  ;;  %v5864_v52 = vld [vmem:[#allocation42_spill] sm:$0xff] }
 0x360   :  { %v1088_v14 = vmul.f32 %v4746_v30, %v5862_v55  ;;  %v1094_v34 = vmul.f32 %v4746_v30, %v5864_v52  ;;  %v3722_v52 = vld [vmem:[%s5691_s6 + $0x10] ss:$8 sps:$4 sm:$0xff]  }
 0x361   :  { %v5867_v55 = vld [vmem:[#allocation47_spill] sm:$0xff] }
 0x363   :  { %1389 = vrot.lane.b32.xlu1 %v1387_v26, %s4059_s28  ;;  %1233 = vrot.lane.b32.xlu0 %v1231_v19, %s4059_s28  ;;  %v1082_v26 = vmul.f32 %v4746_v30, %v5860_v35 }
 0x367   :  { %1240 = vrot.lane.b32.xlu1 %v1238_v27, %s4057_s3  ;;  %1084 = vrot.lane.b32.xlu0 %v1082_v26, %s4057_s3  ;;  %v1258_v27 = vmul.f32 %v4795_v61, %v5861_v16  ;;  %v3721_v26 = vld [vmem:[%s5691_s6 + $0x4] ss:$8 sps:$4 sm:$0xff]   ;;  %v5866_v16 = vld [vmem:[#allocation43_spill] sm:$0xff] }
 0x368   :  { %1629 = vmatprep.subr.bf16.mxu0 %v3721_v26  ;;  %v1108_v26 = vmul.f32 %v4795_v61, %v5867_v55 }
 0x36b   :  { %1246 = vrot.lane.b32.xlu1 %v1244_v20, %s4058_s27  ;;  %1090 = vrot.lane.b32.xlu0 %v1088_v14, %s4058_s27  ;;  %v5863_v20 = vld [vmem:[#allocation48_spill] sm:$0xff] }
 0x36c   :  { %v1264_v19 = vmul.f32 %v4795_v61, %v5863_v20  ;;  %v3724_v14 = vld [vmem:[%s5691_s6 + $0x14] ss:$8 sps:$4 sm:$0xff]  }
 0x36f   :  { %1252 = vrot.lane.b32.xlu1 %v1250_v36, %s4059_s28  ;;  %v3719_v36 = vld [vmem:[%s5691_s6] ss:$8 sps:$4 sm:$0xff]   ;;  %1096 = vrot.lane.b32.xlu0 %v1094_v34, %s4059_s28  ;;  %v3727_v34 = vld [vmem:[%s5691_s6 + $0x24] ss:$8 sps:$4 sm:$0xff]  }
 0x370   :  { %1630 = vmatpush1.bf16.msra.mxu0 %v3719_v36  ;;  %v3725_v36 = vld [vmem:[%s5691_s6 + $0x20] ss:$8 sps:$4 sm:$0xff]  }
 0x371   :  { %1631 = vmatprep.subr.bf16.mxu0 %v3724_v14  ;;  %v5868_v14 = vld [vmem:[#allocation50_spill] sm:$0xff] }
 0x373   :  { %1260 = vrot.lane.b32.xlu1 %v1258_v27, %s4057_s3  ;;  %v5865_v27 = vld [vmem:[#allocation49_spill] sm:$0xff] }
 0x374   :  { %v1270_v20 = vmul.f32 %v4795_v61, %v5865_v27  ;;  %1632 = vmatpush1.bf16.msra.mxu0 %v3722_v52  ;;  %v1114_v27 = vmul.f32 %v4795_v61, %v5868_v14  ;;  %v3733_v52 = vld [vmem:[%s5691_s6 + $0x44] ss:$8 sps:$4 sm:$0xff]  }
 0x375   :  { %1633 = vmatprep.subr.bf16.mxu0 %v3727_v34  ;;  %v3731_v34 = vld [vmem:[%s5691_s6 + $0x40] ss:$8 sps:$4 sm:$0xff]  }
 0x377   :  { %1266 = vrot.lane.b32.xlu1 %v1264_v19, %s4058_s27  ;;  %v1102_v19 = vmul.f32 %v4795_v61, %v5866_v16 }
 0x378   :  { %1634 = vmatpush1.bf16.msra.mxu0 %v3725_v36  ;;  %v3734_v36 = vld [vmem:[%s5691_s6 + $0x50] ss:$8 sps:$4 sm:$0xff]  }
 0x379   :  { %1104 = vrot.lane.b32.xlu0 %v1102_v19, %s4057_s3  ;;  %v3728_v19 = vld [vmem:[%s5691_s6 + $0x30] ss:$8 sps:$4 sm:$0xff]  }
 0x37b   :  { %1272 = vrot.lane.b32.xlu1 %v1270_v20, %s4059_s28  ;;  %v3730_v20 = vld [vmem:[%s5691_s6 + $0x34] ss:$8 sps:$4 sm:$0xff]  }
 0x37c   :  { %1635 = vmatprep.subr.bf16.mxu0 %v3730_v20  ;;  %v3737_v20 = vld [vmem:[%s5691_s6 + $0x60] ss:$8 sps:$4 sm:$0xff]  }
 0x37d   :  { %1110 = vrot.lane.b32.xlu0 %v1108_v26, %s4058_s27  ;;  %1636 = vmatpush1.bf16.msra.mxu0 %v3728_v19  ;;  %v3736_v26 = vld [vmem:[%s5691_s6 + $0x54] ss:$8 sps:$4 sm:$0xff]  }
 0x37e   :  { %1637 = vmatprep.subr.bf16.mxu0 %v3733_v52  ;;  %v3742_v19 = vld [vmem:[%s5691_s6 + $0x74] ss:$8 sps:$4 sm:$0xff]  }
 0x381   :  { %1116 = vrot.lane.b32.xlu0 %v1114_v27, %s4059_s28  ;;  %1638 = vmatpush1.bf16.msra.mxu0 %v3731_v34  ;;  %v3739_v27 = vld [vmem:[%s5691_s6 + $0x64] ss:$8 sps:$4 sm:$0xff]   ;;  %v3740_v34 = vld [vmem:[%s5691_s6 + $0x70] ss:$8 sps:$4 sm:$0xff]  }
 0x382   :  { %1639 = vmatprep.subr.bf16.mxu0 %v3736_v26  ;;  %v3745_v26 = vld [vmem:[%s5691_s6 + $0x84] ss:$8 sps:$4 sm:$0xff]  }
 0x385   :  { %1640 = vmatpush1.bf16.msra.mxu0 %v3734_v36 }
 0x386   :  { %1641 = vmatprep.subr.bf16.mxu0 %v3739_v27  ;;  %v3743_v27 = vld [vmem:[%s5691_s6 + $0x80] ss:$8 sps:$4 sm:$0xff]  }
 0x389   :  { %1642 = vmatpush1.bf16.msra.mxu0 %v3737_v20  ;;  %v3748_v20 = vld [vmem:[%s5691_s6 + $0x94] ss:$8 sps:$4 sm:$0xff]  }
 0x38a   :  { %1643 = vmatprep.subr.bf16.mxu0 %v3742_v19  ;;  %v3746_v19 = vld [vmem:[%s5691_s6 + $0x90] ss:$8 sps:$4 sm:$0xff]  }
 0x38d   :  { %1644 = vmatpush1.bf16.msra.mxu0 %v3740_v34  ;;  %v3751_v34 = vld [vmem:[%s5691_s6 + $0xa4] ss:$8 sps:$4 sm:$0xff]  }
 0x38e   :  { %1645 = vmatprep.subr.bf16.mxu0 %v3745_v26  ;;  %v3749_v26 = vld [vmem:[%s5691_s6 + $0xa0] ss:$8 sps:$4 sm:$0xff]  }
 0x391   :  { %v1280_v52 = vpop.permute.xlu1 %1279  ;;  %v1124_v55 = vpop.permute.xlu0 %1123  ;;  %1646 = vmatpush1.bf16.msra.mxu0 %v3743_v27  ;;  %v3754_v27 = vld [vmem:[%s5691_s6 + $0xb4] ss:$8 sps:$4 sm:$0xff]  }
 0x392   :  { %1647 = vmatprep.subr.bf16.mxu0 %v3748_v20  ;;  %v1282_v29 = vadd.f32 %v1280_v52, %v1276_v53  ;;  %v1126_v22 = vadd.f32 %v1124_v55, %v1120_v42  ;;  %v1295_v53 = vmul.f32 %v4795_v61, %v4450_v43  ;;  %v3755_v52 = vld [vmem:[%s5691_s6 + $0xc0] ss:$8 sps:$4 sm:$0xff]  }
 0x393   :  { %v5870_v55 = vld [vmem:[#allocation37_spill] sm:$0xff] }
 0x395   :  { %v1319_v36 = vpop.permute.xlu1 %1318  ;;  %v1163_v35 = vpop.permute.xlu0 %1162  ;;  %1648 = vmatpush1.bf16.msra.mxu0 %v3746_v19  ;;  %v3752_v19 = vld [vmem:[%s5691_s6 + $0xb0] ss:$8 sps:$4 sm:$0xff]  }
 0x396   :  { %1649 = vmatprep.subr.bf16.mxu0 %v3751_v34  ;;  %v3757_v34 = vld [vmem:[%s5691_s6 + $0xc4] ss:$8 sps:$4 sm:$0xff]  }
 0x399   :  { %v1286_v14 = vpop.permute.xlu1 %1285  ;;  %v1358_v63 = vpop.permute.xlu0 %1357  ;;  %1650 = vmatpush1.bf16.msra.mxu0 %v3749_v26  ;;  %v1315_v26 = vmul.f32 %v4746_v30, %v4384_v31 }
 0x39a   :  { %1651 = vmatprep.subr.bf16.mxu0 %v3754_v27  ;;  %v1288_v39 = vadd.f32 %v1286_v14, %v1282_v29 }
 0x39b   :  { %v1321_v29 = vadd.f32 %v1319_v36, %v1315_v26  ;;  %v5871_v36 = vld [vmem:[#allocation38_spill] sm:$0xff] }
 0x39d   :  { %v1130_v16 = vpop.permute.xlu1 %1129  ;;  %v1202_v6 = vpop.permute.xlu0 %1201  ;;  %1652 = vmatpush1.bf16.msra.mxu0 %v3752_v19 }
 0x39e   :  { %1653 = vmatprep.subr.bf16.mxu0 %v3757_v34  ;;  %v1132_v27 = vadd.f32 %v1130_v16, %v1126_v22 }
 0x3a1   :  { %v1325_v20 = vpop.permute.xlu1 %1324  ;;  %v1169_v14 = vpop.permute.xlu0 %1168  ;;  %1654 = vmatpush1.bf16.msra.mxu0 %v3755_v52 }
 0x3a2   :  { %v1327_v19 = vadd.f32 %v1325_v20, %v1321_v29 }
 0x3a5   :  { %v1292_v57 = vpop.permute.xlu1 %1291  ;;  %v1364_v25 = vpop.permute.xlu0 %1363 }
 0x3a6   :  { %v1294_v56 = vadd.f32 %v1292_v57, %v1288_v39  ;;  %v1139_v57 = vmul.f32 %v4795_v61, %v5870_v55  ;;  %v1354_v39 = vmul.f32 %v4746_v30, %v4412_v58  ;;  %v3761_v55 = vld [vmem:[%s5691_s6 + $0xe0] ss:$8 sps:$4 sm:$0xff]  }
 0x3a8   :  { %v1296_v48 = vadd.f32 %v1295_v53, %v1294_v56  ;;  %v1360_v34 = vadd.f32 %v1358_v63, %v1354_v39  ;;  %v1334_v56 = vmul.f32 %v4795_v61, %v4503_v62  ;;  %v1198_v63 = vmul.f32 %v4746_v30, %v4424_v2 }
 0x3a9   :  { %v1136_v32 = vpop.permute.xlu1 %1135  ;;  %v1208_v26 = vpop.permute.xlu0 %1207 }
 0x3aa   :  { %v1138_v42 = vadd.f32 %v1136_v32, %v1132_v27  ;;  %v1366_v22 = vadd.f32 %v1364_v25, %v1360_v34  ;;  %v1159_v32 = vmul.f32 %v4746_v30, %v5871_v36  ;;  %v1373_v27 = vmul.f32 %v4795_v61, %v4517_v37 }
 0x3ab   :  { %v1204_v39 = vadd.f32 %v1202_v6, %v1198_v63  ;;  %v3758_v6 = vld [vmem:[%s5691_s6 + $0xd0] ss:$8 sps:$4 sm:$0xff]  }
 0x3ac   :  { %v1140_v43 = vadd.f32 %v1139_v57, %v1138_v42  ;;  %v1165_v20 = vadd.f32 %v1163_v35, %v1159_v32  ;;  %v1217_v35 = vmul.f32 %v4795_v61, %v4505_v0 }
 0x3ad   :  { %v1331_v47 = vpop.permute.xlu1 %1330  ;;  %v1175_v57 = vpop.permute.xlu0 %1174 }
 0x3ae   :  { %v1333_v50 = vadd.f32 %v1331_v47, %v1327_v19  ;;  %v1171_v47 = vadd.f32 %v1169_v14, %v1165_v20  ;;  %v1210_v19 = vadd.f32 %v1208_v26, %v1204_v39  ;;  %v3760_v26 = vld [vmem:[%s5691_s6 + $0xd4] ss:$8 sps:$4 sm:$0xff]  }
 0x3af   :  { %1655 = vmatprep.subr.bf16.mxu0 %v3760_v26 }
 0x3b0   :  { %v1335_v16 = vadd.f32 %v1334_v56, %v1333_v50  ;;  %v1177_v25 = vadd.f32 %v1175_v57, %v1171_v47  ;;  %v1178_v50 = vmul.f32 %v4795_v61, %v4476_v18  ;;  %1656 = vmatpush1.bf16.msra.mxu0 %v3758_v6 }
 0x3b1   :  { %v1370_v53 = vpop.permute.xlu1 %1369 }
 0x3b2   :  { %v1372_v52 = vadd.f32 %v1370_v53, %v1366_v22  ;;  %v1179_v56 = vadd.f32 %v1178_v50, %v1177_v25  ;;  %v1214_v22 = vpop.permute.xlu0 %1213 }
 0x3b3   :  { %v1216_v53 = vadd.f32 %v1214_v22, %v1210_v19 }
 0x3b4   :  { %v1374_v29 = vadd.f32 %v1373_v27, %v1372_v52 }
 0x3b5   :  { %v1300_v42 = vpop.permute.xlu1 %1299  ;;  %v1218_v52 = vadd.f32 %v1217_v35, %v1216_v53 }
 0x3b6   :  { %v1144_v27 = vpop.permute.xlu0 %1143  ;;  %v1302_v47 = vadd.f32 %v1300_v42, %v1296_v48 }
 0x3b7   :  { %v1146_v57 = vadd.f32 %v1144_v27, %v1140_v43  ;;  %v3763_v43 = vld [vmem:[%s5691_s6 + $0xe4] ss:$8 sps:$4 sm:$0xff]  }
 0x3b8   :  { %1657 = vmatprep.subr.bf16.mxu0 %v3763_v43 }
 0x3b9   :  { %v1339_v34 = vpop.permute.xlu1 %1338  ;;  %1658 = vmatpush1.bf16.msra.mxu0 %v3761_v55  ;;  %v1237_v55 = vmul.f32 %v4746_v30, %v4717_v46 }
 0x3ba   :  { %v1183_v14 = vpop.permute.xlu0 %1182  ;;  %v1341_v48 = vadd.f32 %v1339_v34, %v1335_v16 }
 0x3bd   :  { %v1306_v32 = vpop.permute.xlu1 %1305 }
 0x3be   :  { %v1378_v62 = vpop.permute.xlu0 %1377  ;;  %v1308_v25 = vadd.f32 %v1306_v32, %v1302_v47  ;;  %v1185_v32 = vadd.f32 %v1183_v14, %v1179_v56 }
 0x3bf   :  { %v1380_v6 = vadd.f32 %v1378_v62, %v1374_v29 }
 0x3c1   :  { %v1150_v37 = vpop.permute.xlu1 %1149 }
 0x3c2   :  { %v1222_v39 = vpop.permute.xlu0 %1221  ;;  %v1152_v50 = vadd.f32 %v1150_v37, %v1146_v57  ;;  %v3766_v57 = vld [vmem:[%s5691_s6 + $0xf4] ss:$8 sps:$4 sm:$0xff]  }
 0x3c3   :  { %v1224_v16 = vadd.f32 %v1222_v39, %v1218_v52  ;;  %1659 = vmatprep.subr.bf16.mxu0 %v3766_v57  ;;  %v1256_v39 = vmul.f32 %v4795_v61, %v4719_v60 }
 0x3c5   :  { %v1345_v20 = vpop.permute.xlu1 %1344 }
 0x3c6   :  { %v1189_v22 = vpop.permute.xlu0 %1188  ;;  %v1347_v27 = vadd.f32 %v1345_v20, %v1341_v48  ;;  %v1081_v48 = vmul.f32 %v4746_v30, %v4721_v23 }
 0x3c7   :  { %v1191_v26 = vadd.f32 %v1189_v22, %v1185_v32 }
 0x3c9   :  { %v1312_v63 = vpop.permute.xlu1 %1311 }
 0x3ca   :  { %v1314_v53 = vadd.f32 %v1312_v63, %v1308_v25  ;;  %v1384_v18 = vpop.permute.xlu0 %1383 }
 0x3cb   :  { %v1386_v34 = vadd.f32 %v1384_v18, %v1380_v6 }
 0x3cd   :  { %v1156_v19 = vpop.permute.xlu1 %1155 }
 0x3ce   :  { %v1158_v35 = vadd.f32 %v1156_v19, %v1152_v50  ;;  %v1228_v37 = vpop.permute.xlu0 %1227 }
 0x3cf   :  { %v1230_v62 = vadd.f32 %v1228_v37, %v1224_v16 }
 0x3d0   :  { %v3616_v0 = vpack.i.bf16 %v1158_v35, %v1314_v53 }
 0x3d1   :  { %v1351_v58 = vpop.permute.xlu1 %1350 }
 0x3d2   :  { %3617 = vrot.lane.b32.xlu1 %v3616_v0, %s4059_s28  ;;  %v1353_v63 = vadd.f32 %v1351_v58, %v1347_v27  ;;  %v3764_v0 = vld [vmem:[%s5691_s6 + $0xf0] ss:$8 sps:$4 sm:$0xff]   ;;  %v1195_v25 = vpop.permute.xlu0 %1194  ;;  %s5032_s6 = sld [smem:[#allocation2 + $0x2]] }
 0x3d3   :  { %v1197_v50 = vadd.f32 %v1195_v25, %v1191_v26  ;;  %1660 = vmatpush1.bf16.msra.mxu0 %v3764_v0  ;;  %v1100_v26 = vmul.f32 %v4795_v61, %v4723_v24 }
 0x3d5   :  { %v1390_v42 = vpop.permute.xlu1 %1389  ;;  %v3621_v58 = vpack.i.bf16 %v1197_v50, %v1353_v63 }
 0x3d6   :  { %v1392_v29 = vadd.f32 %v1390_v42, %v1386_v34  ;;  %v1234_v14 = vpop.permute.xlu0 %1233 }
 0x3d7   :  { %v1236_v19 = vadd.f32 %v1234_v14, %v1230_v62  ;;  %3622 = vrot.lane.b32.xlu0 %v3621_v58, %s4058_s27 }
 0x3d9   :  { %v1241_v47 = vpop.permute.xlu1 %1240  ;;  %v3626_v53 = vpack.i.bf16 %v1236_v19, %v1392_v29 }
 0x3da   :  { %v1243_v20 = vadd.f32 %v1241_v47, %v1237_v55  ;;  %v1085_v52 = vpop.permute.xlu0 %1084 }
 0x3db   :  { %3627 = vrot.lane.b32.xlu1 %v3626_v53, %s4057_s3  ;;  %v1087_v37 = vadd.f32 %v1085_v52, %v1081_v48 }
 0x3dd   :  { %v1247_v56 = vpop.permute.xlu1 %1246 }
 0x3de   :  { %v1249_v22 = vadd.f32 %v1247_v56, %v1243_v20  ;;  %v1091_v42 = vpop.permute.xlu0 %1090 }
 0x3df   :  { %v1093_v32 = vadd.f32 %v1091_v42, %v1087_v37 }
 0x3e1   :  { %v1253_v35 = vpop.permute.xlu1 %1252 }
 0x3e2   :  { %v1255_v18 = vadd.f32 %v1253_v35, %v1249_v22  ;;  %v1097_v27 = vpop.permute.xlu0 %1096 }
 0x3e3   :  { %v1099_v6 = vadd.f32 %v1097_v27, %v1093_v32 }
 0x3e4   :  { %v1257_v43 = vadd.f32 %v1256_v39, %v1255_v18 }
 0x3e5   :  { %v1101_v63 = vadd.f32 %v1100_v26, %v1099_v6  ;;  %v1261_v47 = vpop.permute.xlu1 %1260  ;;  %v1457_v6 = vld [vmem:[%s5692_s7] sm:$0x3] }
 0x3e6   :  { %v1263_v55 = vadd.f32 %v1261_v47, %v1257_v43  ;;  %v1462_v26 = vrot.slane %v1457_v6, %v4313_v41  ;;  %v1673_v47 = vstv %s5032_s6 }
 0x3e9   :  { %v1267_v57 = vpop.permute.xlu1 %1266 }
 0x3ea   :  { %v1269_v30 = vadd.f32 %v1267_v57, %v1263_v55 }
 0x3eb   :  { %v1105_v0 = vpop.permute.xlu0 %1104 }
 0x3ec   :  { %v1107_v62 = vadd.f32 %v1105_v0, %v1101_v63 }
 0x3ed   :  { %v1273_v16 = vpop.permute.xlu1 %1272 }
 0x3ee   :  { %v1275_v22 = vadd.f32 %v1273_v16, %v1269_v30 }
 0x3ef   :  { %v1111_v25 = vpop.permute.xlu0 %1110 }
 0x3f0   :  { %v1113_v29 = vadd.f32 %v1111_v25, %v1107_v62 }
 0x3f3   :  { %v1117_v34 = vpop.permute.xlu0 %1116 }
 0x3f4   :  { %v1119_v53 = vadd.f32 %v1117_v34, %v1113_v29 }
 0x444   :  { %v3618_v50 = vpop.permute.xlu1 %3617 }
 0x445   :  { %v3620_v56 = vunpack.i.h.bf16 %v3618_v50  ;;  %v3619_v14 = vunpack.i.l.bf16 %v3618_v50 }
 0x447   :  { %v1417_v35 = vsel %vm817_vm2, %v1119_v53, %v3620_v56  ;;  %v1420_v52 = vsel %vm817_vm2, %v1275_v22, %v3619_v14  ;;  %v5873_v22 = vld [vmem:[#allocation13_spill] sm:$0xff]  ;;  %v5874_v53 = vld [vmem:[#allocation12_spill] sm:$0xff] }
 0x449   :  { %v3623_v58 = vpop.permute.xlu0 %3622 }
 0x44a   :  { %v3625_v20 = vunpack.i.h.bf16 %v3623_v58  ;;  %v3624_v19 = vunpack.i.l.bf16 %v3623_v58 }
 0x44c   :  { %v1418_v48 = vsel %vm819_vm3, %v1417_v35, %v3625_v20  ;;  %v1421_v43 = vsel %vm819_vm3, %v1420_v52, %v3624_v19  ;;  %v5872_v19 = vld [vmem:[#allocation11_spill] sm:$0xff]  ;;  %v5876_v35 = vld [vmem:[#allocation29_spill] sm:$0xff] }
 0x44d   :  { %v3628_v61 = vpop.permute.xlu1 %3627 }
 0x44e   :  { %v3630_v18 = vunpack.i.h.bf16 %v3628_v61  ;;  %v3629_v39 = vunpack.i.l.bf16 %v3628_v61  ;;  %v5875_v61 = vld [vmem:[#allocation14_spill] sm:$0xff] }
 0x450   :  { %v1419_v42 = vsel %vm821_vm4, %v1418_v48, %v3630_v18  ;;  %v1422_v37 = vsel %vm821_vm4, %v1421_v43, %v3629_v39  ;;  %v5877_v18 = vld [vmem:[#allocation31_spill] sm:$0xff] }
 0x451   :  { %v1423_v32 = vpack.c.bf16 %v1419_v42, %v1419_v42  ;;  %v1424_v27 = vpack.c.bf16 %v1422_v37, %v1422_v37  ;;  %v5878_v48 = vld [vmem:[#allocation15_spill] sm:$0xff]  ;;  %v5879_v42 = vld [vmem:[#allocation18_spill] sm:$0xff] }
 0x453   :  { %1661 = vmatprep.mubr.bf16.mxu0 %v1424_v27 }
 0x454   :  { %1662 = vmatmul.mubr.bf16.vlgmr.msra.gmra.mrb[4].mxu0 %v1423_v32  ;;  %v5880_v32 = vld [vmem:[#allocation16_spill] sm:$0xff] }
 0x527   :  { %v1663_v63 = vpop.f32.mrb[4].mxu0 }
 0x528   :  { %v1664_v0 = vadd.f32 %v1663_v63, %v1462_v26  ;;  %v1665_v57 = vpop.f32.mrb[5].mxu0  ;;  %v5882_v63 = vld [vmem:[#allocation32_spill] sm:$0xff] }
 0x529   :  { %v1667_v25 = vpop.f32.mrb[6].mxu0 }
 0x52a   :  { %vm1671_vm7 = vcmp.gt.f32.partialorder %v1664_v0, 0.0  ;;  %v1674_v16 = vmul.f32 %v1673_v47, %v1664_v0  ;;  %v1668_v34 = vpop.f32.mrb[7].mxu0  ;;  %v5884_v25 = vld [vmem:[#allocation20_spill] sm:$0xff] }
 0x52b   :  { %v5885_v34 = vld [vmem:[#allocation36_spill] sm:$0xff] }
 0x52c   :  { %v5039_v50 = vsel %vm1671_vm7, %v1664_v0, %v1674_v16  ;;  %v5883_v0 = vld [vmem:[#allocation34_spill] sm:$0xff] }
 0x52d   :  { %v1718_v55 = vmul.f32 %v5039_v50, %v4310_v40  ;;  %v1874_v62 = vmul.f32 %v5039_v50, %v4302_v38  ;;  %v1757_v58 = vmul.f32 %v5039_v50, %v4253_v5  ;;  %v1913_v30 = vmul.f32 %v5039_v50, %v4250_v3 }
 0x52e   :  { %v1952_v29 = vmul.f32 %v5039_v50, %v4321_v45  ;;  %v1880_v38 = vmul.f32 %v5039_v50, %v4256_v7  ;;  %v1796_v5 = vmul.f32 %v5039_v50, %v4262_v11  ;;  %v1724_v3 = vmul.f32 %v5039_v50, %v4259_v9 }
 0x52f   :  { %1720 = vrot.lane.b32.xlu1 %v1718_v55, %s4057_s3  ;;  %1876 = vrot.lane.b32.xlu0 %v1874_v62, %s4057_s3  ;;  %v1763_v40 = vmul.f32 %v5039_v50, %v4265_v13  ;;  %v1919_v7 = vmul.f32 %v5039_v50, %v4326_v54  ;;  %v1958_v11 = vmul.f32 %v5039_v50, %v5834_v1  ;;  %v5886_v62 = vld [vmem:[#allocation22_spill] sm:$0xff] }
 0x530   :  { %v1466_v45 = vrot.slane %v1457_v6, %v4363_v12  ;;  %v1886_v9 = vmul.f32 %v5039_v50, %v4268_v15  ;;  %v1802_v13 = vmul.f32 %v5039_v50, %v5836_v49  ;;  %v1730_v54 = vmul.f32 %v5039_v50, %v4271_v17  ;;  %v5881_v6 = vld [vmem:[#allocation19_spill] sm:$0xff] }
 0x531   :  { %v1769_v1 = vmul.f32 %v5039_v50, %v5838_v51  ;;  %v1925_v15 = vmul.f32 %v5039_v50, %v4352_v4  ;;  %v1808_v49 = vmul.f32 %v5039_v50, %v5840_v59  ;;  %v1964_v17 = vmul.f32 %v5039_v50, %v5835_v8 }
 0x532   :  { %v1666_v56 = vadd.f32 %v1665_v57, %v1466_v45  ;;  %v1679_v55 = vmul.f32 %v5039_v50, %v5885_v34  ;;  %v5891_v45 = vld [vmem:[#allocation43_spill] sm:$0xff]  ;;  %v3814_v34 = vld [vmem:[%s5693_s8 + $0xec] ss:$16 sps:$4 sm:$0xff]  }
 0x533   :  { %1759 = vrot.lane.b32.xlu1 %v1757_v58, %s4057_s3  ;;  %1915 = vrot.lane.b32.xlu0 %v1913_v30, %s4057_s3  ;;  %v1835_v58 = vmul.f32 %v5039_v50, %v5886_v62  ;;  %v5887_v30 = vld [vmem:[#allocation40_spill] sm:$0xff] }
 0x534   :  { %v1675_v14 = vmul.f32 %v1673_v47, %v1666_v56  ;;  %vm1672_vm8 = vcmp.gt.f32.partialorder %v1666_v56, 0.0  ;;  %v3812_v62 = vld [vmem:[%s5693_s8 + $0xe8] ss:$16 sps:$4 sm:$0xff]  }
 0x536   :  { %v5091_v20 = vsel %vm1672_vm8, %v1666_v56, %v1675_v14  ;;  %v3769_v56 = vld [vmem:[%s5693_s8 + $0x4] ss:$16 sps:$4 sm:$0xff]  }
 0x537   :  { %1954 = vrot.lane.b32.xlu1 %v1952_v29, %s4057_s3  ;;  %1882 = vrot.lane.b32.xlu0 %v1880_v38, %s4058_s27  ;;  %v1738_v51 = vmul.f32 %v5091_v20, %v5842_v33  ;;  %v1894_v4 = vmul.f32 %v5091_v20, %v5837_v10  ;;  %v1777_v59 = vmul.f32 %v5091_v20, %v5844_v28  ;;  %v5888_v38 = vld [vmem:[#allocation28_spill] sm:$0xff]  ;;  %v3775_v14 = vld [vmem:[%s5693_s8 + $0x24] ss:$16 sps:$4 sm:$0xff]  }
 0x538   :  { %v1933_v8 = vmul.f32 %v5091_v20, %v5839_v21  ;;  %v1972_v33 = vmul.f32 %v5091_v20, %v5846_v44  ;;  %v1900_v10 = vmul.f32 %v5091_v20, %v5872_v19  ;;  %v1816_v28 = vmul.f32 %v5091_v20, %v5873_v22  ;;  %2428 = vmatprep.subr.bf16.mxu1 %v3769_v56  ;;  %v3784_v19 = vld [vmem:[%s5693_s8 + $0x4c] ss:$16 sps:$4 sm:$0xff]  }
 0x539   :  { %v1744_v21 = vmul.f32 %v5091_v20, %v5874_v53  ;;  %v1783_v44 = vmul.f32 %v5091_v20, %v5875_v61  ;;  %v1939_v52 = vmul.f32 %v5091_v20, %v5876_v35  ;;  %v1978_v39 = vmul.f32 %v5091_v20, %v5877_v18  ;;  %v5895_v53 = vld [vmem:[#allocation50_spill] sm:$0xff] }
 0x53a   :  { %v1906_v43 = vmul.f32 %v5091_v20, %v5878_v48  ;;  %v1822_v37 = vmul.f32 %v5091_v20, %v5879_v42  ;;  %v1750_v27 = vmul.f32 %v5091_v20, %v5880_v32  ;;  %v1789_v26 = vmul.f32 %v5091_v20, %v5881_v6  ;;  %v3782_v61 = vld [vmem:[%s5693_s8 + $0x48] ss:$16 sps:$4 sm:$0xff]   ;;  %v3790_v35 = vld [vmem:[%s5693_s8 + $0x6c] ss:$16 sps:$4 sm:$0xff]  }
 0x53b   :  { %1798 = vrot.lane.b32.xlu1 %v1796_v5, %s4057_s3  ;;  %1726 = vrot.lane.b32.xlu0 %v1724_v3, %s4058_s27  ;;  %v1945_v47 = vmul.f32 %v5091_v20, %v5882_v63  ;;  %v1828_v57 = vmul.f32 %v5091_v20, %v5883_v0  ;;  %v1984_v16 = vmul.f32 %v5091_v20, %v5884_v25  ;;  %v5889_v3 = vld [vmem:[#allocation42_spill] sm:$0xff] }
 0x53c   :  { %v1685_v29 = vmul.f32 %v5039_v50, %v5887_v30  ;;  %v1841_v5 = vmul.f32 %v5039_v50, %v5888_v38  ;;  %v3788_v48 = vld [vmem:[%s5693_s8 + $0x68] ss:$16 sps:$4 sm:$0xff]   ;;  %v3796_v42 = vld [vmem:[%s5693_s8 + $0x8c] ss:$16 sps:$4 sm:$0xff]  }
 0x53d   :  { %v3794_v32 = vld [vmem:[%s5693_s8 + $0x88] ss:$16 sps:$4 sm:$0xff]   ;;  %v3802_v6 = vld [vmem:[%s5693_s8 + $0xac] ss:$16 sps:$4 sm:$0xff]  }
 0x53e   :  { %v3800_v63 = vld [vmem:[%s5693_s8 + $0xa8] ss:$16 sps:$4 sm:$0xff]   ;;  %v3808_v0 = vld [vmem:[%s5693_s8 + $0xcc] ss:$16 sps:$4 sm:$0xff]  }
 0x53f   :  { %1765 = vrot.lane.b32.xlu1 %v1763_v40, %s4058_s27  ;;  %1921 = vrot.lane.b32.xlu0 %v1919_v7, %s4058_s27  ;;  %v1691_v40 = vmul.f32 %v5039_v50, %v5889_v3  ;;  %v5890_v7 = vld [vmem:[#allocation33_spill] sm:$0xff]  ;;  %v3806_v25 = vld [vmem:[%s5693_s8 + $0xc8] ss:$16 sps:$4 sm:$0xff]   ;;  %v3820_v30 = vld [vmem:[%s5693_s8 + $0x10c] ss:$16 sps:$4 sm:$0xff]  }
 0x540   :  { %v3823_v3 = vld [vmem:[%s5693_s8 + $0x124] ss:$16 sps:$4 sm:$0xff]   ;;  %v3832_v56 = vld [vmem:[%s5693_s8 + $0x14c] ss:$16 sps:$4 sm:$0xff]  }
 0x543   :  { %1960 = vrot.lane.b32.xlu1 %v1958_v11, %s4058_s27  ;;  %1888 = vrot.lane.b32.xlu0 %v1886_v9, %s4059_s28  ;;  %v1847_v11 = vmul.f32 %v5039_v50, %v5890_v7  ;;  %v1699_v9 = vmul.f32 %v5091_v20, %v5891_v45 }
 0x547   :  { %1804 = vrot.lane.b32.xlu1 %v1802_v13, %s4058_s27  ;;  %1732 = vrot.lane.b32.xlu0 %v1730_v54, %s4059_s28  ;;  %v3767_v13 = vld [vmem:[%s5693_s8] ss:$16 sps:$4 sm:$0xff]   ;;  %v3770_v54 = vld [vmem:[%s5693_s8 + $0x8] ss:$16 sps:$4 sm:$0xff]  }
 0x548   :  { %2429 = vmatpush1.bf16.msra.mxu1 %v3767_v13  ;;  %v3829_v13 = vld [vmem:[%s5693_s8 + $0x144] ss:$16 sps:$4 sm:$0xff]  }
 0x549   :  { %2430 = vmatprep.subr.bf16.mxu1 %v3775_v14 }
 0x54b   :  { %1771 = vrot.lane.b32.xlu1 %v1769_v1, %s4059_s28  ;;  %1927 = vrot.lane.b32.xlu0 %v1925_v15, %s4059_s28  ;;  %v3772_v1 = vld [vmem:[%s5693_s8 + $0xc] ss:$16 sps:$4 sm:$0xff]  }
 0x54c   :  { %v3778_v15 = vld [vmem:[%s5693_s8 + $0x2c] ss:$16 sps:$4 sm:$0xff]   ;;  %2469 = vmatprep.subr.bf16.mxu0 %v3772_v1  ;;  %v3827_v1 = vld [vmem:[%s5693_s8 + $0x140] ss:$16 sps:$4 sm:$0xff]  }
 0x54d   :  { %2470 = vmatpush1.bf16.msra.mxu0 %v3770_v54 }
 0x54e   :  { %2471 = vmatprep.subr.bf16.mxu0 %v3778_v15  ;;  %v3830_v15 = vld [vmem:[%s5693_s8 + $0x148] ss:$16 sps:$4 sm:$0xff]  }
 0x54f   :  { %1810 = vrot.lane.b32.xlu1 %v1808_v49, %s4059_s28  ;;  %1966 = vrot.lane.b32.xlu0 %v1964_v17, %s4059_s28  ;;  %v5892_v49 = vld [vmem:[#allocation41_spill] sm:$0xff] }
 0x550   :  { %v1855_v17 = vmul.f32 %v5091_v20, %v5892_v49  ;;  %v3835_v49 = vld [vmem:[%s5693_s8 + $0x164] ss:$16 sps:$4 sm:$0xff]  }
 0x553   :  { %1740 = vrot.lane.b32.xlu1 %v1738_v51, %s4057_s3  ;;  %1896 = vrot.lane.b32.xlu0 %v1894_v4, %s4057_s3  ;;  %v3773_v51 = vld [vmem:[%s5693_s8 + $0x20] ss:$16 sps:$4 sm:$0xff]  }
 0x554   :  { %v5893_v4 = vld [vmem:[#allocation47_spill] sm:$0xff]  ;;  %2431 = vmatpush1.bf16.msra.mxu1 %v3773_v51 }
 0x557   :  { %1779 = vrot.lane.b32.xlu1 %v1777_v59, %s4057_s3  ;;  %1935 = vrot.lane.b32.xlu0 %v1933_v8, %s4057_s3  ;;  %v1705_v59 = vmul.f32 %v5091_v20, %v5893_v4  ;;  %v3776_v8 = vld [vmem:[%s5693_s8 + $0x28] ss:$16 sps:$4 sm:$0xff]   ;;  %v3833_v4 = vld [vmem:[%s5693_s8 + $0x160] ss:$16 sps:$4 sm:$0xff]  }
 0x558   :  { %2472 = vmatpush1.bf16.msra.mxu0 %v3776_v8  ;;  %v3836_v8 = vld [vmem:[%s5693_s8 + $0x168] ss:$16 sps:$4 sm:$0xff]  }
 0x559   :  { %2473 = vmatprep.subr.bf16.mxu0 %v3784_v19  ;;  %v3844_v19 = vld [vmem:[%s5693_s8 + $0x18c] ss:$16 sps:$4 sm:$0xff]  }
 0x55b   :  { %1974 = vrot.lane.b32.xlu1 %v1972_v33, %s4057_s3  ;;  %1902 = vrot.lane.b32.xlu0 %v1900_v10, %s4058_s27  ;;  %v3781_v33 = vld [vmem:[%s5693_s8 + $0x44] ss:$16 sps:$4 sm:$0xff]   ;;  %v5894_v10 = vld [vmem:[#allocation48_spill] sm:$0xff] }
 0x55c   :  { %v1861_v22 = vmul.f32 %v5091_v20, %v5894_v10  ;;  %2432 = vmatprep.subr.bf16.mxu1 %v3781_v33  ;;  %2474 = vmatpush1.bf16.msra.mxu0 %v3782_v61  ;;  %v3841_v33 = vld [vmem:[%s5693_s8 + $0x184] ss:$16 sps:$4 sm:$0xff]  }
 0x55d   :  { %2475 = vmatprep.subr.bf16.mxu0 %v3790_v35 }
 0x55f   :  { %1818 = vrot.lane.b32.xlu1 %v1816_v28, %s4057_s3  ;;  %1746 = vrot.lane.b32.xlu0 %v1744_v21, %s4058_s27  ;;  %v3779_v28 = vld [vmem:[%s5693_s8 + $0x40] ss:$16 sps:$4 sm:$0xff]   ;;  %v1711_v21 = vmul.f32 %v5091_v20, %v5895_v53  ;;  %v3842_v53 = vld [vmem:[%s5693_s8 + $0x188] ss:$16 sps:$4 sm:$0xff]  }
 0x560   :  { %2433 = vmatpush1.bf16.msra.mxu1 %v3779_v28  ;;  %2476 = vmatpush1.bf16.msra.mxu0 %v3788_v48 }
 0x561   :  { %2477 = vmatprep.subr.bf16.mxu0 %v3796_v42 }
 0x563   :  { %1785 = vrot.lane.b32.xlu1 %v1783_v44, %s4058_s27  ;;  %1941 = vrot.lane.b32.xlu0 %v1939_v52, %s4058_s27  ;;  %v3787_v44 = vld [vmem:[%s5693_s8 + $0x64] ss:$16 sps:$4 sm:$0xff]  }
 0x564   :  { %v5896_v52 = vld [vmem:[#allocation49_spill] sm:$0xff]  ;;  %2434 = vmatprep.subr.bf16.mxu1 %v3787_v44  ;;  %2478 = vmatpush1.bf16.msra.mxu0 %v3794_v32 }
 0x565   :  { %v1867_v18 = vmul.f32 %v5091_v20, %v5896_v52  ;;  %2479 = vmatprep.subr.bf16.mxu0 %v3802_v6  ;;  %v5899_v6 = vld [vmem:[#allocation35_spill] sm:$0xff] }
 0x567   :  { %1980 = vrot.lane.b32.xlu1 %v1978_v39, %s4058_s27  ;;  %1908 = vrot.lane.b32.xlu0 %v1906_v43, %s4059_s28  ;;  %v3785_v39 = vld [vmem:[%s5693_s8 + $0x60] ss:$16 sps:$4 sm:$0xff]   ;;  %v3793_v43 = vld [vmem:[%s5693_s8 + $0x84] ss:$16 sps:$4 sm:$0xff]  }
 0x568   :  { %2435 = vmatpush1.bf16.msra.mxu1 %v3785_v39  ;;  %2480 = vmatpush1.bf16.msra.mxu0 %v3800_v63 }
 0x569   :  { %2436 = vmatprep.subr.bf16.mxu1 %v3793_v43  ;;  %2481 = vmatprep.subr.bf16.mxu0 %v3808_v0  ;;  %v1756_v43 = vmul.f32 %v5039_v50, %v5871_v36 }
 0x56b   :  { %1824 = vrot.lane.b32.xlu1 %v1822_v37, %s4058_s27  ;;  %1752 = vrot.lane.b32.xlu0 %v1750_v27, %s4059_s28  ;;  %v3791_v37 = vld [vmem:[%s5693_s8 + $0x80] ss:$16 sps:$4 sm:$0xff]   ;;  %v3799_v27 = vld [vmem:[%s5693_s8 + $0xa4] ss:$16 sps:$4 sm:$0xff]  }
 0x56c   :  { %2437 = vmatpush1.bf16.msra.mxu1 %v3791_v37  ;;  %2482 = vmatpush1.bf16.msra.mxu0 %v3806_v25  ;;  %v1795_v25 = vmul.f32 %v5039_v50, %v4424_v2 }
 0x56d   :  { %2438 = vmatprep.subr.bf16.mxu1 %v3799_v27  ;;  %2483 = vmatprep.subr.bf16.mxu0 %v3814_v34 }
 0x56f   :  { %1791 = vrot.lane.b32.xlu1 %v1789_v26, %s4059_s28  ;;  %1947 = vrot.lane.b32.xlu0 %v1945_v47, %s4059_s28  ;;  %v3797_v26 = vld [vmem:[%s5693_s8 + $0xa0] ss:$16 sps:$4 sm:$0xff]   ;;  %v3805_v47 = vld [vmem:[%s5693_s8 + $0xc4] ss:$16 sps:$4 sm:$0xff]  }
 0x570   :  { %2439 = vmatpush1.bf16.msra.mxu1 %v3797_v26  ;;  %2484 = vmatpush1.bf16.msra.mxu0 %v3812_v62  ;;  %v1892_v26 = vmul.f32 %v5091_v20, %v5899_v6 }
 0x571   :  { %2440 = vmatprep.subr.bf16.mxu1 %v3805_v47  ;;  %2485 = vmatprep.subr.bf16.mxu0 %v3820_v30  ;;  %v1912_v47 = vmul.f32 %v5039_v50, %v4384_v31 }
 0x573   :  { %1830 = vrot.lane.b32.xlu1 %v1828_v57, %s4059_s28  ;;  %1986 = vrot.lane.b32.xlu0 %v1984_v16, %s4059_s28  ;;  %v3803_v57 = vld [vmem:[%s5693_s8 + $0xc0] ss:$16 sps:$4 sm:$0xff]   ;;  %v3811_v16 = vld [vmem:[%s5693_s8 + $0xe4] ss:$16 sps:$4 sm:$0xff]  }
 0x574   :  { %2441 = vmatpush1.bf16.msra.mxu1 %v3803_v57 }
 0x575   :  { %2442 = vmatprep.subr.bf16.mxu1 %v3811_v16 }
 0x577   :  { %1681 = vrot.lane.b32.xlu1 %v1679_v55, %s4057_s3  ;;  %1837 = vrot.lane.b32.xlu0 %v1835_v58, %s4057_s3  ;;  %v3809_v55 = vld [vmem:[%s5693_s8 + $0xe0] ss:$16 sps:$4 sm:$0xff]   ;;  %v3817_v58 = vld [vmem:[%s5693_s8 + $0x104] ss:$16 sps:$4 sm:$0xff]  }
 0x578   :  { %2443 = vmatpush1.bf16.msra.mxu1 %v3809_v55 }
 0x579   :  { %2444 = vmatprep.subr.bf16.mxu1 %v3817_v58  ;;  %v5900_v58 = vld [vmem:[#allocation37_spill] sm:$0xff] }
 0x57a   :  { %v1736_v30 = vmul.f32 %v5091_v20, %v5900_v58 }
 0x57b   :  { %1687 = vrot.lane.b32.xlu1 %v1685_v29, %s4058_s27  ;;  %1843 = vrot.lane.b32.xlu0 %v1841_v5, %s4058_s27  ;;  %v3815_v29 = vld [vmem:[%s5693_s8 + $0x100] ss:$16 sps:$4 sm:$0xff]   ;;  %v3818_v5 = vld [vmem:[%s5693_s8 + $0x108] ss:$16 sps:$4 sm:$0xff]  }
 0x57c   :  { %2445 = vmatpush1.bf16.msra.mxu1 %v3815_v29  ;;  %2486 = vmatpush1.bf16.msra.mxu0 %v3818_v5  ;;  %v5901_v5 = vld [vmem:[#allocation39_spill] sm:$0xff] }
 0x57d   :  { %2446 = vmatprep.subr.bf16.mxu1 %v3823_v3  ;;  %v1775_v3 = vmul.f32 %v5091_v20, %v5901_v5 }
 0x57f   :  { %1693 = vrot.lane.b32.xlu1 %v1691_v40, %s4059_s28  ;;  %1849 = vrot.lane.b32.xlu0 %v1847_v11, %s4059_s28  ;;  %v3826_v40 = vld [vmem:[%s5693_s8 + $0x12c] ss:$16 sps:$4 sm:$0xff]   ;;  %v3821_v11 = vld [vmem:[%s5693_s8 + $0x120] ss:$16 sps:$4 sm:$0xff]  }
 0x580   :  { %2487 = vmatprep.subr.bf16.mxu0 %v3826_v40  ;;  %2447 = vmatpush1.bf16.msra.mxu1 %v3821_v11  ;;  %v5902_v40 = vld [vmem:[#allocation30_spill] sm:$0xff] }
 0x581   :  { %2448 = vmatprep.subr.bf16.mxu1 %v3829_v13  ;;  %v1951_v31 = vmul.f32 %v5039_v50, %v5902_v40 }
 0x583   :  { %1701 = vrot.lane.b32.xlu1 %v1699_v9, %s4057_s3  ;;  %1857 = vrot.lane.b32.xlu0 %v1855_v17, %s4057_s3  ;;  %v3824_v9 = vld [vmem:[%s5693_s8 + $0x128] ss:$16 sps:$4 sm:$0xff]   ;;  %v3838_v17 = vld [vmem:[%s5693_s8 + $0x16c] ss:$16 sps:$4 sm:$0xff]  }
 0x584   :  { %2488 = vmatpush1.bf16.msra.mxu0 %v3824_v9  ;;  %2449 = vmatpush1.bf16.msra.mxu1 %v3827_v1  ;;  %v5903_v1 = vld [vmem:[#allocation44_spill] sm:$0xff] }
 0x585   :  { %2489 = vmatprep.subr.bf16.mxu0 %v3832_v56  ;;  %2450 = vmatprep.subr.bf16.mxu1 %v3835_v49 }
 0x587   :  { %1707 = vrot.lane.b32.xlu1 %v1705_v59, %s4058_s27  ;;  %1863 = vrot.lane.b32.xlu0 %v1861_v22, %s4058_s27  ;;  %v3839_v22 = vld [vmem:[%s5693_s8 + $0x180] ss:$16 sps:$4 sm:$0xff]  }
 0x588   :  { %2490 = vmatpush1.bf16.msra.mxu0 %v3830_v15  ;;  %2451 = vmatpush1.bf16.msra.mxu1 %v3833_v4  ;;  %v1931_v15 = vmul.f32 %v5091_v20, %v5903_v1 }
 0x589   :  { %2491 = vmatprep.subr.bf16.mxu0 %v3838_v17  ;;  %2452 = vmatprep.subr.bf16.mxu1 %v3841_v33  ;;  %v5904_v17 = vld [vmem:[#allocation45_spill] sm:$0xff] }
 0x58b   :  { %1713 = vrot.lane.b32.xlu1 %v1711_v21, %s4059_s28  ;;  %1869 = vrot.lane.b32.xlu0 %v1867_v18, %s4059_s28  ;;  %v5897_v21 = vld [vmem:[#allocation23_spill] sm:$0xff]  ;;  %v5898_v18 = vld [vmem:[#allocation25_spill] sm:$0xff] }
 0x58c   :  { %2492 = vmatpush1.bf16.msra.mxu0 %v3836_v8  ;;  %v1873_v61 = vmul.f32 %v5039_v50, %v5897_v21  ;;  %2453 = vmatpush1.bf16.msra.mxu1 %v3839_v22  ;;  %v1717_v39 = vmul.f32 %v5039_v50, %v5898_v18  ;;  %v5905_v22 = vld [vmem:[#allocation46_spill] sm:$0xff] }
 0x58d   :  { %2493 = vmatprep.subr.bf16.mxu0 %v3844_v19 }
 0x590   :  { %2494 = vmatpush1.bf16.msra.mxu0 %v3842_v53 }
 0x5a1   :  { %v1721_v38 = vpop.permute.xlu1 %1720  ;;  %v1877_v7 = vpop.permute.xlu0 %1876 }
 0x5a2   :  { %v1879_v35 = vadd.f32 %v1877_v7, %v1873_v61  ;;  %v1723_v37 = vadd.f32 %v1721_v38, %v1717_v39 }
 0x5a5   :  { %v1760_v45 = vpop.permute.xlu1 %1759  ;;  %v1916_v54 = vpop.permute.xlu0 %1915 }
 0x5a6   :  { %v1762_v63 = vadd.f32 %v1760_v45, %v1756_v43  ;;  %v1918_v55 = vadd.f32 %v1916_v54, %v1912_v47 }
 0x5a9   :  { %v1955_v14 = vpop.permute.xlu1 %1954  ;;  %v1883_v51 = vpop.permute.xlu0 %1882 }
 0x5aa   :  { %v1885_v48 = vadd.f32 %v1883_v51, %v1879_v35  ;;  %v1957_v13 = vadd.f32 %v1955_v14, %v1951_v31  ;;  %v1814_v51 = vmul.f32 %v5091_v20, %v5904_v17 }
 0x5ad   :  { %v1799_v59 = vpop.permute.xlu1 %1798  ;;  %v1727_v10 = vpop.permute.xlu0 %1726 }
 0x5ae   :  { %v1729_v0 = vadd.f32 %v1727_v10, %v1723_v37  ;;  %v1801_v29 = vadd.f32 %v1799_v59, %v1795_v25  ;;  %v3847_v37 = vld [vmem:[%s5693_s8 + $0x1a4] ss:$16 sps:$4 sm:$0xff]  }
 0x5af   :  { %2454 = vmatprep.subr.bf16.mxu1 %v3847_v37  ;;  %v3853_v25 = vld [vmem:[%s5693_s8 + $0x1c4] ss:$16 sps:$4 sm:$0xff]  }
 0x5b1   :  { %v1766_v28 = vpop.permute.xlu1 %1765  ;;  %v1922_v44 = vpop.permute.xlu0 %1921 }
 0x5b2   :  { %v1768_v16 = vadd.f32 %v1766_v28, %v1762_v63  ;;  %v1924_v7 = vadd.f32 %v1922_v44, %v1918_v55  ;;  %v1970_v28 = vmul.f32 %v5091_v20, %v5905_v22  ;;  %v1678_v22 = vmul.f32 %v5039_v50, %v4721_v23 }
 0x5b3   :  { %v1853_v23 = vmul.f32 %v5091_v20, %v4719_v60 }
 0x5b5   :  { %v1961_v52 = vpop.permute.xlu1 %1960  ;;  %v1889_v42 = vpop.permute.xlu0 %1888 }
 0x5b6   :  { %v1891_v32 = vadd.f32 %v1889_v42, %v1885_v48  ;;  %v1963_v4 = vadd.f32 %v1961_v52, %v1957_v13  ;;  %v3845_v52 = vld [vmem:[%s5693_s8 + $0x1a0] ss:$16 sps:$4 sm:$0xff]   ;;  %v3862_v13 = vld [vmem:[%s5693_s8 + $0x1ec] ss:$16 sps:$4 sm:$0xff]  }
 0x5b7   :  { %2455 = vmatpush1.bf16.msra.mxu1 %v3845_v52 }
 0x5b8   :  { %v1893_v57 = vadd.f32 %v1892_v26, %v1891_v32  ;;  %v3848_v32 = vld [vmem:[%s5693_s8 + $0x1a8] ss:$16 sps:$4 sm:$0xff]   ;;  %2456 = vmatprep.subr.bf16.mxu1 %v3853_v25 }
 0x5b9   :  { %v1805_v27 = vpop.permute.xlu1 %1804  ;;  %v1733_v34 = vpop.permute.xlu0 %1732 }
 0x5ba   :  { %v1735_v36 = vadd.f32 %v1733_v34, %v1729_v0  ;;  %v1807_v45 = vadd.f32 %v1805_v27, %v1801_v29  ;;  %v3850_v27 = vld [vmem:[%s5693_s8 + $0x1ac] ss:$16 sps:$4 sm:$0xff]   ;;  %v3851_v0 = vld [vmem:[%s5693_s8 + $0x1c0] ss:$16 sps:$4 sm:$0xff]  }
 0x5bb   :  { %2495 = vmatprep.subr.bf16.mxu0 %v3850_v27  ;;  %2457 = vmatpush1.bf16.msra.mxu1 %v3851_v0 }
 0x5bc   :  { %v1737_v11 = vadd.f32 %v1736_v30, %v1735_v36  ;;  %2496 = vmatpush1.bf16.msra.mxu0 %v3848_v32  ;;  %v3856_v36 = vld [vmem:[%s5693_s8 + $0x1cc] ss:$16 sps:$4 sm:$0xff]  }
 0x5bd   :  { %v1772_v62 = vpop.permute.xlu1 %1771  ;;  %v1928_v2 = vpop.permute.xlu0 %1927  ;;  %2497 = vmatprep.subr.bf16.mxu0 %v3856_v36 }
 0x5be   :  { %v1774_v38 = vadd.f32 %v1772_v62, %v1768_v16  ;;  %v1930_v56 = vadd.f32 %v1928_v2, %v1924_v7  ;;  %v3854_v16 = vld [vmem:[%s5693_s8 + $0x1c8] ss:$16 sps:$4 sm:$0xff]  }
 0x5bf   :  { %v3860_v2 = vld [vmem:[%s5693_s8 + $0x1e8] ss:$16 sps:$4 sm:$0xff]  }
 0x5c0   :  { %v1776_v9 = vadd.f32 %v1775_v3, %v1774_v38  ;;  %v1932_v59 = vadd.f32 %v1931_v15, %v1930_v56  ;;  %2498 = vmatpush1.bf16.msra.mxu0 %v3854_v16 }
 0x5c1   :  { %v1811_v54 = vpop.permute.xlu1 %1810  ;;  %v1967_v8 = vpop.permute.xlu0 %1966  ;;  %2499 = vmatprep.subr.bf16.mxu0 %v3862_v13  ;;  %v3871_v13 = vld [vmem:[%s5695_s10 + $0x24] ss:$8 sps:$4 sm:$0xff]  }
 0x5c2   :  { %v1813_v49 = vadd.f32 %v1811_v54, %v1807_v45  ;;  %v1969_v19 = vadd.f32 %v1967_v8, %v1963_v4  ;;  %v3859_v45 = vld [vmem:[%s5693_s8 + $0x1e4] ss:$16 sps:$4 sm:$0xff]  }
 0x5c3   :  { %2458 = vmatprep.subr.bf16.mxu1 %v3859_v45  ;;  %v3863_v45 = vld [vmem:[%s5695_s10] ss:$8 sps:$4 sm:$0xff]  }
 0x5c4   :  { %v1815_v33 = vadd.f32 %v1814_v51, %v1813_v49  ;;  %v1971_v53 = vadd.f32 %v1970_v28, %v1969_v19  ;;  %v3865_v49 = vld [vmem:[%s5695_s10 + $0x4] ss:$8 sps:$4 sm:$0xff]   ;;  %2500 = vmatpush1.bf16.msra.mxu0 %v3860_v2  ;;  %v3868_v2 = vld [vmem:[%s5695_s10 + $0x14] ss:$8 sps:$4 sm:$0xff]  }
 0x5c5   :  { %v1741_v10 = vpop.permute.xlu1 %1740  ;;  %v1897_v14 = vpop.permute.xlu0 %1896 }
 0x5c6   :  { %v1899_v26 = vadd.f32 %v1897_v14, %v1893_v57  ;;  %v1743_v63 = vadd.f32 %v1741_v10, %v1737_v11  ;;  %v3857_v11 = vld [vmem:[%s5693_s8 + $0x1e0] ss:$16 sps:$4 sm:$0xff]   ;;  %v1834_v14 = vmul.f32 %v5039_v50, %v4717_v46 }
 0x5c7   :  { %2459 = vmatpush1.bf16.msra.mxu1 %v3857_v11 }
 0x5c8   :  { %2924 = vmatprep.subr.bf16.mxu1 %v3865_v49  ;;  %v3875_v49 = vld [vmem:[%s5695_s10 + $0x40] ss:$8 sps:$4 sm:$0xff]  }
 0x5c9   :  { %v1780_v21 = vpop.permute.xlu1 %1779  ;;  %v1936_v61 = vpop.permute.xlu0 %1935 }
 0x5ca   :  { %v1782_v34 = vadd.f32 %v1780_v21, %v1776_v9  ;;  %v1938_v62 = vadd.f32 %v1936_v61, %v1932_v59 }
 0x5cd   :  { %v1975_v44 = vpop.permute.xlu1 %1974  ;;  %v1903_v35 = vpop.permute.xlu0 %1902 }
 0x5ce   :  { %v1905_v55 = vadd.f32 %v1903_v35, %v1899_v26  ;;  %v1977_v56 = vadd.f32 %v1975_v44, %v1971_v53 }
 0x5d1   :  { %v1819_v18 = vpop.permute.xlu1 %1818  ;;  %v1747_v39 = vpop.permute.xlu0 %1746 }
 0x5d2   :  { %v1749_v57 = vadd.f32 %v1747_v39, %v1743_v63  ;;  %v1821_v3 = vadd.f32 %v1819_v18, %v1815_v33  ;;  %v1697_v39 = vmul.f32 %v5091_v20, %v4723_v24 }
 0x5d5   :  { %v1786_v48 = vpop.permute.xlu1 %1785  ;;  %v1942_v43 = vpop.permute.xlu0 %1941 }
 0x5d6   :  { %v1788_v30 = vadd.f32 %v1786_v48, %v1782_v34  ;;  %v1944_v40 = vadd.f32 %v1942_v43, %v1938_v62 }
 0x5d9   :  { %v1981_v42 = vpop.permute.xlu1 %1980  ;;  %v1909_v6 = vpop.permute.xlu0 %1908 }
 0x5da   :  { %v1911_v29 = vadd.f32 %v1909_v6, %v1905_v55  ;;  %v1983_v17 = vadd.f32 %v1981_v42, %v1977_v56  ;;  %v3869_v56 = vld [vmem:[%s5695_s10 + $0x20] ss:$8 sps:$4 sm:$0xff]  }
 0x5dd   :  { %v1825_v47 = vpop.permute.xlu1 %1824  ;;  %v1753_v58 = vpop.permute.xlu0 %1752 }
 0x5de   :  { %v1755_v38 = vadd.f32 %v1753_v58, %v1749_v57  ;;  %v1827_v54 = vadd.f32 %v1825_v47, %v1821_v3 }
 0x5e0   :  { %v3631_v31 = vpack.i.bf16 %v1755_v38, %v1911_v29 }
 0x5e1   :  { %v1792_v5 = vpop.permute.xlu1 %1791  ;;  %v1948_v9 = vpop.permute.xlu0 %1947 }
 0x5e2   :  { %v1794_v7 = vadd.f32 %v1792_v5, %v1788_v30  ;;  %v1950_v1 = vadd.f32 %v1948_v9, %v1944_v40  ;;  %3632 = vrot.lane.b32.xlu0 %v3631_v31, %s4059_s28  ;;  %v3866_v9 = vld [vmem:[%s5695_s10 + $0x10] ss:$8 sps:$4 sm:$0xff]  }
 0x5e4   :  { %v3636_v51 = vpack.i.bf16 %v1794_v7, %v1950_v1  ;;  %v3872_v1 = vld [vmem:[%s5695_s10 + $0x30] ss:$8 sps:$4 sm:$0xff]  }
 0x5e5   :  { %v1831_v15 = vpop.permute.xlu1 %1830  ;;  %v1987_v59 = vpop.permute.xlu0 %1986 }
 0x5e6   :  { %v1833_v4 = vadd.f32 %v1831_v15, %v1827_v54  ;;  %v1989_v8 = vadd.f32 %v1987_v59, %v1983_v17  ;;  %3637 = vrot.lane.b32.xlu1 %v3636_v51, %s4058_s27  ;;  %v3874_v54 = vld [vmem:[%s5695_s10 + $0x34] ss:$8 sps:$4 sm:$0xff]   ;;  %v3877_v15 = vld [vmem:[%s5695_s10 + $0x44] ss:$8 sps:$4 sm:$0xff]   ;;  %v3878_v51 = vld [vmem:[%s5695_s10 + $0x50] ss:$8 sps:$4 sm:$0xff]  }
 0x5e7   :  { %v3880_v17 = vld [vmem:[%s5695_s10 + $0x54] ss:$8 sps:$4 sm:$0xff]   ;;  %v3881_v59 = vld [vmem:[%s5695_s10 + $0x60] ss:$8 sps:$4 sm:$0xff]  }
 0x5e8   :  { %v3641_v19 = vpack.i.bf16 %v1833_v4, %v1989_v8  ;;  %v3883_v4 = vld [vmem:[%s5695_s10 + $0x64] ss:$8 sps:$4 sm:$0xff]   ;;  %v3886_v8 = vld [vmem:[%s5695_s10 + $0x74] ss:$8 sps:$4 sm:$0xff]  }
 0x5e9   :  { %v1682_v33 = vpop.permute.xlu1 %1681  ;;  %v1838_v10 = vpop.permute.xlu0 %1837 }
 0x5ea   :  { %3642 = vrot.lane.b32.xlu0 %v3641_v19, %s4057_s3  ;;  %v1684_v53 = vadd.f32 %v1682_v33, %v1678_v22  ;;  %v1840_v44 = vadd.f32 %v1838_v10, %v1834_v14  ;;  %v3884_v33 = vld [vmem:[%s5695_s10 + $0x70] ss:$8 sps:$4 sm:$0xff]   ;;  %v3889_v19 = vld [vmem:[%s5695_s10 + $0x84] ss:$8 sps:$4 sm:$0xff]   ;;  %v3887_v10 = vld [vmem:[%s5695_s10 + $0x80] ss:$8 sps:$4 sm:$0xff]  }
 0x5eb   :  { %v3892_v22 = vld [vmem:[%s5695_s10 + $0x94] ss:$8 sps:$4 sm:$0xff]   ;;  %v3893_v14 = vld [vmem:[%s5695_s10 + $0xa0] ss:$8 sps:$4 sm:$0xff]  }
 0x5ed   :  { %v1688_v28 = vpop.permute.xlu1 %1687  ;;  %v1844_v21 = vpop.permute.xlu0 %1843 }
 0x5ee   :  { %v1690_v61 = vadd.f32 %v1688_v28, %v1684_v53  ;;  %v1846_v48 = vadd.f32 %v1844_v21, %v1840_v44  ;;  %v3890_v28 = vld [vmem:[%s5695_s10 + $0x90] ss:$8 sps:$4 sm:$0xff]   ;;  %v3895_v53 = vld [vmem:[%s5695_s10 + $0xa4] ss:$8 sps:$4 sm:$0xff]   ;;  %v3898_v21 = vld [vmem:[%s5695_s10 + $0xb4] ss:$8 sps:$4 sm:$0xff]  }
 0x5ef   :  { %v3901_v44 = vld [vmem:[%s5695_s10 + $0xc4] ss:$8 sps:$4 sm:$0xff]  }
 0x5f1   :  { %v1694_v35 = vpop.permute.xlu1 %1693  ;;  %v1850_v43 = vpop.permute.xlu0 %1849 }
 0x5f2   :  { %v1696_v18 = vadd.f32 %v1694_v35, %v1690_v61  ;;  %v1852_v52 = vadd.f32 %v1850_v43, %v1846_v48  ;;  %v3896_v61 = vld [vmem:[%s5695_s10 + $0xb0] ss:$8 sps:$4 sm:$0xff]   ;;  %v3899_v35 = vld [vmem:[%s5695_s10 + $0xc0] ss:$8 sps:$4 sm:$0xff]   ;;  %v3907_v43 = vld [vmem:[%s5695_s10 + $0xe4] ss:$8 sps:$4 sm:$0xff]  }
 0x5f3   :  { %v3905_v48 = vld [vmem:[%s5695_s10 + $0xe0] ss:$8 sps:$4 sm:$0xff]  }
 0x5f4   :  { %v1698_v42 = vadd.f32 %v1697_v39, %v1696_v18  ;;  %v1854_v37 = vadd.f32 %v1853_v23, %v1852_v52  ;;  %v3904_v18 = vld [vmem:[%s5695_s10 + $0xd4] ss:$8 sps:$4 sm:$0xff]   ;;  %v3902_v39 = vld [vmem:[%s5695_s10 + $0xd0] ss:$8 sps:$4 sm:$0xff]   ;;  %v3913_v23 = vld [vmem:[%s5695_s10 + $0x104] ss:$8 sps:$4 sm:$0xff]  }
 0x5f5   :  { %v1858_v32 = vpop.permute.xlu0 %1857  ;;  %v1702_v27 = vpop.permute.xlu1 %1701  ;;  %v3908_v52 = vld [vmem:[%s5695_s10 + $0xf0] ss:$8 sps:$4 sm:$0xff]  }
 0x5f6   :  { %v1860_v47 = vadd.f32 %v1858_v32, %v1854_v37  ;;  %v1704_v0 = vadd.f32 %v1702_v27, %v1698_v42  ;;  %v3910_v42 = vld [vmem:[%s5695_s10 + $0xf4] ss:$8 sps:$4 sm:$0xff]   ;;  %v3959_v37 = vld [vmem:[%s5697_s12 + $0x40] sm:$0xff]   ;;  %v3961_v27 = vld [vmem:[%s5697_s12 + $0x48] sm:$0xff]  }
 0x5f7   :  { %v3960_v32 = vld [vmem:[%s5697_s12] sm:$0xff]   ;;  %3441 = vmatprep.subr.bf16.mxu0 %v3959_v37  ;;  %v3938_v37 = vld [vmem:[%s5695_s10 + $0x190] ss:$8 sps:$4 sm:$0xff]  }
 0x5f9   :  { %v1864_v6 = vpop.permute.xlu0 %1863  ;;  %v1708_v46 = vpop.permute.xlu1 %1707 }
 0x5fa   :  { %v1866_v16 = vadd.f32 %v1864_v6, %v1860_v47  ;;  %v1710_v24 = vadd.f32 %v1708_v46, %v1704_v0  ;;  %v3962_v6 = vld [vmem:[%s5697_s12 + $0x8] sm:$0xff]   ;;  %v3963_v46 = vld [vmem:[%s5697_s12 + $0x50] sm:$0xff]   ;;  %v3967_v47 = vld [vmem:[%s5697_s12 + $0x60] sm:$0xff]  }
 0x5fb   :  { %v3968_v0 = vld [vmem:[%s5697_s12 + $0x20] sm:$0xff]  }
 0x5fd   :  { %v1870_v50 = vpop.permute.xlu0 %1869  ;;  %v1714_v26 = vpop.permute.xlu1 %1713 }
 0x5fe   :  { %v1872_v62 = vadd.f32 %v1870_v50, %v1866_v16  ;;  %v1716_v58 = vadd.f32 %v1714_v26, %v1710_v24  ;;  %v3964_v50 = vld [vmem:[%s5697_s12 + $0x10] sm:$0xff]   ;;  %v3965_v26 = vld [vmem:[%s5697_s12 + $0x58] sm:$0xff]   ;;  %v3970_v16 = vld [vmem:[%s5697_s12 + $0x28] sm:$0xff]  }
 0x5ff   :  { %v5906_v24 = vld [vmem:[#allocation17_spill] sm:$0xff] }
 0x654   :  { %v3633_v63 = vpop.permute.xlu0 %3632 }
 0x655   :  { %v3635_v34 = vunpack.i.h.bf16 %v3633_v63  ;;  %v3634_v55 = vunpack.i.l.bf16 %v3633_v63  ;;  %v3966_v63 = vld [vmem:[%s5697_s12 + $0x18] sm:$0xff]  }
 0x657   :  { %v2014_v20 = vsel %vm817_vm2, %v1716_v58, %v3635_v34  ;;  %v2017_v30 = vsel %vm817_vm2, %v1872_v62, %v3634_v55  ;;  %v2098_v34 = vsub.s32 2, %v5906_v24  ;;  %v2086_v55 = vld [vmem:[%s5694_s9] sm:$0xf] }
 0x658   :  { %v3638_v25 = vpop.permute.xlu1 %3637  ;;  %v2095_v58 = vrot.slane %v2086_v55, %v4363_v12 }
 0x659   :  { %v3640_v57 = vunpack.i.h.bf16 %v3638_v25  ;;  %v3639_v36 = vunpack.i.l.bf16 %v3638_v25  ;;  %v3969_v25 = vld [vmem:[%s5697_s12 + $0x68] sm:$0xff]   ;;  %v2099_v62 = vrot.slane %v2086_v55, %v2098_v34 }
 0x65b   :  { %v2015_v5 = vsel %vm819_vm3, %v2014_v20, %v3640_v57  ;;  %v2018_v3 = vsel %vm819_vm3, %v2017_v30, %v3639_v36  ;;  %v2102_v57 = vsub.s32 3, %v5906_v24  ;;  %v2091_v36 = vrot.slane %v2086_v55, %v4313_v41  ;;  %v3956_v24 = vld [vmem:[%s5695_s10 + $0x1f0] ss:$8 sps:$4 sm:$0xff]  }
 0x65c   :  { %v3643_v60 = vpop.permute.xlu0 %3642  ;;  %v2515_v30 = vstv %s3358_s30 }
 0x65d   :  { %v3645_v29 = vunpack.i.h.bf16 %v3643_v60  ;;  %v3644_v38 = vunpack.i.l.bf16 %v3643_v60  ;;  %v2103_v60 = vrot.slane %v2086_v55, %v2102_v57  ;;  %v3971_v55 = vld [vmem:[%s5697_s12 + $0x70] sm:$0xff]  }
 0x65e   :  { %v3972_v57 = vld [vmem:[%s5697_s12 + $0x30] sm:$0xff]  }
 0x65f   :  { %v2016_v40 = vsel %vm821_vm4, %v2015_v5, %v3645_v29  ;;  %v2019_v31 = vsel %vm821_vm4, %v2018_v3, %v3644_v38 }
 0x660   :  { %v2020_v7 = vpack.c.bf16 %v2016_v40, %v2016_v40  ;;  %v2021_v11 = vpack.c.bf16 %v2019_v31, %v2019_v31 }
 0x662   :  { %2460 = vmatprep.mubr.bf16.mxu1 %v2021_v11  ;;  %2501 = vmatprep.mubr.bf16.mxu0 %v2021_v11 }
 0x663   :  { %2461 = vmatmul.mubr.bf16.vlgmr.msra.gmra.mrb[4].mxu1 %v2020_v7  ;;  %2502 = vmatmul.mubr.bf16.vlgmr.msra.gmra.mrb[8].mxu0 %v2020_v7 }
 0x664   :  { %2925 = vmatpush1.bf16.msra.mxu1 %v3863_v45  ;;  %3442 = vmatpush3.bf16.msra.mxu0 %v3960_v32  ;;  %v3943_v32 = vld [vmem:[%s5695_s10 + $0x1a4] ss:$8 sps:$4 sm:$0xff]  }
 0x665   :  { %2926 = vmatprep.subr.bf16.mxu1 %v3868_v2  ;;  %3443 = vmatprep.subr.bf16.mxu0 %v3961_v27  ;;  %v3941_v27 = vld [vmem:[%s5695_s10 + $0x1a0] ss:$8 sps:$4 sm:$0xff]  }
 0x668   :  { %2927 = vmatpush1.bf16.msra.mxu1 %v3866_v9  ;;  %3444 = vmatpush3.bf16.msra.mxu0 %v3962_v6  ;;  %v3946_v6 = vld [vmem:[%s5695_s10 + $0x1b4] ss:$8 sps:$4 sm:$0xff]  }
 0x669   :  { %2928 = vmatprep.subr.bf16.mxu1 %v3871_v13  ;;  %3445 = vmatprep.subr.bf16.mxu0 %v3963_v46  ;;  %v3944_v46 = vld [vmem:[%s5695_s10 + $0x1b0] ss:$8 sps:$4 sm:$0xff]  }
 0x66c   :  { %2929 = vmatpush1.bf16.msra.mxu1 %v3869_v56  ;;  %3446 = vmatpush3.bf16.msra.mxu0 %v3964_v50  ;;  %v3949_v50 = vld [vmem:[%s5695_s10 + $0x1c4] ss:$8 sps:$4 sm:$0xff]  }
 0x66d   :  { %2930 = vmatprep.subr.bf16.mxu1 %v3874_v54  ;;  %3447 = vmatprep.subr.bf16.mxu0 %v3965_v26  ;;  %v3947_v26 = vld [vmem:[%s5695_s10 + $0x1c0] ss:$8 sps:$4 sm:$0xff]  }
 0x670   :  { %2931 = vmatpush1.bf16.msra.mxu1 %v3872_v1  ;;  %3448 = vmatpush3.bf16.msra.mxu0 %v3966_v63  ;;  %v3952_v63 = vld [vmem:[%s5695_s10 + $0x1d4] ss:$8 sps:$4 sm:$0xff]  }
 0x671   :  { %2932 = vmatprep.subr.bf16.mxu1 %v3877_v15  ;;  %3449 = vmatprep.subr.bf16.mxu0 %v3967_v47  ;;  %v3950_v47 = vld [vmem:[%s5695_s10 + $0x1d0] ss:$8 sps:$4 sm:$0xff]  }
 0x674   :  { %2933 = vmatpush1.bf16.msra.mxu1 %v3875_v49  ;;  %3450 = vmatpush3.bf16.msra.mxu0 %v3968_v0  ;;  %v3955_v0 = vld [vmem:[%s5695_s10 + $0x1e4] ss:$8 sps:$4 sm:$0xff]  }
 0x675   :  { %2934 = vmatprep.subr.bf16.mxu1 %v3880_v17  ;;  %3451 = vmatprep.subr.bf16.mxu0 %v3969_v25  ;;  %v3953_v25 = vld [vmem:[%s5695_s10 + $0x1e0] ss:$8 sps:$4 sm:$0xff]  }
 0x678   :  { %2935 = vmatpush1.bf16.msra.mxu1 %v3878_v51  ;;  %3452 = vmatpush3.bf16.msra.mxu0 %v3970_v16  ;;  %v3958_v16 = vld [vmem:[%s5695_s10 + $0x1f4] ss:$8 sps:$4 sm:$0xff]  }
 0x679   :  { %2936 = vmatprep.subr.bf16.mxu1 %v3883_v4  ;;  %3453 = vmatprep.subr.bf16.mxu0 %v3971_v55 }
 0x67c   :  { %2937 = vmatpush1.bf16.msra.mxu1 %v3881_v59  ;;  %v3911_v59 = vld [vmem:[%s5695_s10 + $0x100] ss:$8 sps:$4 sm:$0xff]   ;;  %3454 = vmatpush3.bf16.msra.mxu0 %v3972_v57 }
 0x67d   :  { %2938 = vmatprep.subr.bf16.mxu1 %v3886_v8 }
 0x680   :  { %2939 = vmatpush1.bf16.msra.mxu1 %v3884_v33  ;;  %v3916_v33 = vld [vmem:[%s5695_s10 + $0x114] ss:$8 sps:$4 sm:$0xff]  }
 0x681   :  { %2940 = vmatprep.subr.bf16.mxu1 %v3889_v19 }
 0x684   :  { %2941 = vmatpush1.bf16.msra.mxu1 %v3887_v10  ;;  %v3914_v10 = vld [vmem:[%s5695_s10 + $0x110] ss:$8 sps:$4 sm:$0xff]  }
 0x685   :  { %2942 = vmatprep.subr.bf16.mxu1 %v3892_v22  ;;  %v3919_v22 = vld [vmem:[%s5695_s10 + $0x124] ss:$8 sps:$4 sm:$0xff]  }
 0x688   :  { %2943 = vmatpush1.bf16.msra.mxu1 %v3890_v28  ;;  %v3917_v28 = vld [vmem:[%s5695_s10 + $0x120] ss:$8 sps:$4 sm:$0xff]  }
 0x689   :  { %2944 = vmatprep.subr.bf16.mxu1 %v3895_v53  ;;  %v3922_v53 = vld [vmem:[%s5695_s10 + $0x134] ss:$8 sps:$4 sm:$0xff]  }
 0x68c   :  { %2945 = vmatpush1.bf16.msra.mxu1 %v3893_v14  ;;  %v3920_v14 = vld [vmem:[%s5695_s10 + $0x130] ss:$8 sps:$4 sm:$0xff]  }
 0x68d   :  { %2946 = vmatprep.subr.bf16.mxu1 %v3898_v21  ;;  %v3925_v21 = vld [vmem:[%s5695_s10 + $0x144] ss:$8 sps:$4 sm:$0xff]  }
 0x690   :  { %2947 = vmatpush1.bf16.msra.mxu1 %v3896_v61  ;;  %v3923_v61 = vld [vmem:[%s5695_s10 + $0x140] ss:$8 sps:$4 sm:$0xff]  }
 0x691   :  { %2948 = vmatprep.subr.bf16.mxu1 %v3901_v44  ;;  %v3928_v44 = vld [vmem:[%s5695_s10 + $0x154] ss:$8 sps:$4 sm:$0xff]  }
 0x694   :  { %2949 = vmatpush1.bf16.msra.mxu1 %v3899_v35  ;;  %v3926_v35 = vld [vmem:[%s5695_s10 + $0x150] ss:$8 sps:$4 sm:$0xff]  }
 0x695   :  { %2950 = vmatprep.subr.bf16.mxu1 %v3904_v18  ;;  %v3931_v18 = vld [vmem:[%s5695_s10 + $0x164] ss:$8 sps:$4 sm:$0xff]  }
 0x698   :  { %2951 = vmatpush1.bf16.msra.mxu1 %v3902_v39  ;;  %v3929_v39 = vld [vmem:[%s5695_s10 + $0x160] ss:$8 sps:$4 sm:$0xff]  }
 0x699   :  { %2952 = vmatprep.subr.bf16.mxu1 %v3907_v43  ;;  %v3932_v43 = vld [vmem:[%s5695_s10 + $0x170] ss:$8 sps:$4 sm:$0xff]  }
 0x69c   :  { %2953 = vmatpush1.bf16.msra.mxu1 %v3905_v48  ;;  %v3934_v48 = vld [vmem:[%s5695_s10 + $0x174] ss:$8 sps:$4 sm:$0xff]  }
 0x69d   :  { %2954 = vmatprep.subr.bf16.mxu1 %v3910_v42  ;;  %v3937_v42 = vld [vmem:[%s5695_s10 + $0x184] ss:$8 sps:$4 sm:$0xff]  }
 0x6a0   :  { %2955 = vmatpush1.bf16.msra.mxu1 %v3908_v52  ;;  %v3935_v52 = vld [vmem:[%s5695_s10 + $0x180] ss:$8 sps:$4 sm:$0xff]  }
 0x6a1   :  { %2965 = vmatprep.subr.bf16.mxu1 %v3913_v23  ;;  %v3940_v23 = vld [vmem:[%s5695_s10 + $0x194] ss:$8 sps:$4 sm:$0xff]  }
 0x736   :  { %v2462_v20 = vpop.f32.mrb[4].mxu1  ;;  %v2503_v29 = vpop.f32.mrb[8].mxu0 }
 0x737   :  { %v2463_v38 = vadd.f32 %v2462_v20, %v2091_v36  ;;  %v2504_v5 = vadd.f32 %v2503_v29, %v2099_v62  ;;  %v2464_v3 = vpop.f32.mrb[5].mxu1  ;;  %v2505_v40 = vpop.f32.mrb[9].mxu0  ;;  %v3973_v36 = vld [vmem:[%s5697_s12 + $0x78] sm:$0xff]   ;;  %v3009_v29 = vstv %s3423_s1 }
 0x738   :  { %v2465_v31 = vadd.f32 %v2464_v3, %v2095_v58  ;;  %v2506_v7 = vadd.f32 %v2505_v40, %v2103_v60  ;;  %v2466_v11 = vpop.f32.mrb[6].mxu1  ;;  %v2507_v45 = vpop.f32.mrb[10].mxu0  ;;  %v3974_v62 = vld [vmem:[%s5697_s12 + $0x38] sm:$0xff]   ;;  %3455 = vmatprep.subr.bf16.mxu0 %v3973_v36  ;;  %v2592_v58 = vld [vmem:[%s5696_s11] sm:$0x3] }
 0x739   :  { %vm2511_vm9 = vcmp.gt.f32.partialorder %v2463_v38, 0.0  ;;  %v2516_v2 = vmul.f32 %v2515_v30, %v2463_v38  ;;  %vm2513_vm10 = vcmp.gt.f32.partialorder %v2504_v5, 0.0  ;;  %v2518_v9 = vmul.f32 %v2515_v30, %v2504_v5  ;;  %v2467_v13 = vpop.f32.mrb[7].mxu1  ;;  %v2508_v56 = vpop.f32.mrb[11].mxu0  ;;  %3456 = vmatpush3.bf16.msra.mxu0 %v3974_v62 }
 0x73a   :  { %vm2512_vm11 = vcmp.gt.f32.partialorder %v2465_v31, 0.0  ;;  %v2517_v54 = vmul.f32 %v2515_v30, %v2465_v31  ;;  %vm2514_vm12 = vcmp.gt.f32.partialorder %v2506_v7, 0.0  ;;  %v2519_v1 = vmul.f32 %v2515_v30, %v2506_v7 }
 0x73b   :  { %v2520_v15 = vsel %vm2511_vm9, %v2463_v38, %v2516_v2  ;;  %v5563_v49 = vsel %vm2513_vm10, %v2504_v5, %v2518_v9  ;;  %v2597_v60 = vrot.slane %v2592_v58, %v4313_v41  ;;  %v2601_v20 = vrot.slane %v2592_v58, %v4363_v12  ;;  %v3424_v12 = vld [vmem:[%s5698_s13] ss:$0 sm:$0xff] }
 0x73c   :  { %v2521_v17 = vsel %vm2512_vm11, %v2465_v31, %v2517_v54  ;;  %v2523_v51 = vsel %vm2514_vm12, %v2506_v7, %v2519_v1  ;;  %v2524_v8 = vpack.c.bf16 %v2520_v15, %v2520_v15  ;;  %v2526_v34 = vpack.c.bf16 %v5563_v49, %v5563_v49 }
 0x73d   :  { %v2525_v4 = vpack.c.bf16 %v2521_v17, %v2521_v17  ;;  %v2527_v19 = vpack.c.bf16 %v2523_v51, %v2523_v51 }
 0x73f   :  { %2956 = vmatprep.mubr.bf16.mxu1 %v2525_v4 }
 0x740   :  { %2957 = vmatmul.mubr.bf16.vlgmr.msra.gmra.mrb[8].mxu1 %v2524_v8 }
 0x741   :  { %2966 = vmatpush1.bf16.msra.mxu1 %v3911_v59  ;;  %2997 = vmatprep.mubr.bf16.mxu1 %v2527_v19 }
 0x742   :  { %2967 = vmatprep.subr.bf16.mxu1 %v3916_v33 }
 0x745   :  { %2968 = vmatpush1.bf16.msra.mxu1 %v3914_v10 }
 0x746   :  { %2969 = vmatprep.subr.bf16.mxu1 %v3919_v22 }
 0x749   :  { %2970 = vmatpush1.bf16.msra.mxu1 %v3917_v28 }
 0x74a   :  { %2971 = vmatprep.subr.bf16.mxu1 %v3922_v53 }
 0x74d   :  { %2972 = vmatpush1.bf16.msra.mxu1 %v3920_v14 }
 0x74e   :  { %2973 = vmatprep.subr.bf16.mxu1 %v3925_v21 }
 0x751   :  { %2974 = vmatpush1.bf16.msra.mxu1 %v3923_v61 }
 0x752   :  { %2975 = vmatprep.subr.bf16.mxu1 %v3928_v44 }
 0x755   :  { %2976 = vmatpush1.bf16.msra.mxu1 %v3926_v35 }
 0x756   :  { %2977 = vmatprep.subr.bf16.mxu1 %v3931_v18 }
 0x759   :  { %2978 = vmatpush1.bf16.msra.mxu1 %v3929_v39 }
 0x75a   :  { %2979 = vmatprep.subr.bf16.mxu1 %v3934_v48 }
 0x75d   :  { %2980 = vmatpush1.bf16.msra.mxu1 %v3932_v43 }
 0x75e   :  { %2981 = vmatprep.subr.bf16.mxu1 %v3937_v42 }
 0x761   :  { %2982 = vmatpush1.bf16.msra.mxu1 %v3935_v52 }
 0x762   :  { %2983 = vmatprep.subr.bf16.mxu1 %v3940_v23 }
 0x765   :  { %2984 = vmatpush1.bf16.msra.mxu1 %v3938_v37 }
 0x766   :  { %2985 = vmatprep.subr.bf16.mxu1 %v3943_v32 }
 0x769   :  { %2986 = vmatpush1.bf16.msra.mxu1 %v3941_v27 }
 0x76a   :  { %2987 = vmatprep.subr.bf16.mxu1 %v3946_v6 }
 0x76d   :  { %2988 = vmatpush1.bf16.msra.mxu1 %v3944_v46 }
 0x76e   :  { %2989 = vmatprep.subr.bf16.mxu1 %v3949_v50 }
 0x771   :  { %2990 = vmatpush1.bf16.msra.mxu1 %v3947_v26 }
 0x772   :  { %2991 = vmatprep.subr.bf16.mxu1 %v3952_v63 }
 0x775   :  { %2992 = vmatpush1.bf16.msra.mxu1 %v3950_v47 }
 0x776   :  { %2993 = vmatprep.subr.bf16.mxu1 %v3955_v0 }
 0x779   :  { %2994 = vmatpush1.bf16.msra.mxu1 %v3953_v25 }
 0x77a   :  { %2995 = vmatprep.subr.bf16.mxu1 %v3958_v16 }
 0x77d   :  { %2996 = vmatpush1.bf16.msra.mxu1 %v3956_v24 }
 0x780   :  { %2998 = vmatmul.mubr.bf16.vlgmr.msra.gmra.mrb[8].mxu1 %v2526_v34 }
 0x853   :  { %v2999_v30 = vpop.f32.mrb[8].mxu1 }
 0x854   :  { %v3463_v38 = vadd.f32 %v2999_v30, %v2597_v60  ;;  %v3001_v5 = vpop.f32.mrb[9].mxu1 }
 0x855   :  { %v3464_v3 = vadd.f32 %v3001_v5, %v2601_v20  ;;  %v3003_v40 = vpop.f32.mrb[10].mxu1 }
 0x856   :  { %vm3007_vm13 = vcmp.gt.f32.partialorder %v3463_v38, 0.0  ;;  %v3010_v31 = vmul.f32 %v3463_v38, %v3009_v29  ;;  %v3004_v7 = vpop.f32.mrb[11].mxu1 }
 0x857   :  { %vm3008_vm14 = vcmp.gt.f32.partialorder %v3464_v3, 0.0  ;;  %v3011_v11 = vmul.f32 %v3464_v3, %v3009_v29 }
 0x858   :  { %v3012_v45 = vsel %vm3007_vm13, %v3463_v38, %v3010_v31 }
 0x859   :  { %v3013_v2 = vsel %vm3008_vm14, %v3464_v3, %v3011_v11  ;;  %v3014_v13 = vpack.c.bf16 %v3012_v45, %v3012_v45 }
 0x85a   :  { %v3015_v9 = vpack.c.bf16 %v3013_v2, %v3013_v2 }
 0x85c   :  { %3183 = vmatprep.mubr.bf16.mxu0 %v3015_v9 }
 0x85d   :  { %3184 = vmatmul.mubr.bf16.vlgmr.msra.gmra.mrb[12].mxu0 %v3014_v13 }
 0x930   :  { %v3457_v41 = vpop.f32.mrb[12].mxu0 }
 0x931   :  { %v3458_v56 = vpop.f32.mrb[13].mxu0 }
 0x932   :  { %v3459_v54 = vadd.f32 %v3458_v56, %v3457_v41  ;;  %v3460_v1 = vpop.f32.mrb[14].mxu0 }
 0x933   :  { %v3461_v15 = vpop.f32.mrb[15].mxu0 }
 0x934   :  { %v3186_v49 = vadd.f32 %v3459_v54, %v3424_v12 }
 0x936   :  { %v3191_v17 = vmul.f32 %v3186_v49, %v3186_v49 }
 0x938   :  { %v3193_v51 = vsel %vm3192_vm15, %v3191_v17, 0.0 }
 0x939   :  { %3194 = vadd.xlane.f32.xlu1 %v3193_v51 }
 0x9c6   :  { %v3195_v4 = vpop.xlane.xlu1 %3194 }
 0x9c7   :  { %3975 = vrsqrt.f32 %v3195_v4  ;;  %vm3198_vm0 = vcmp.eq.f32.partialorder %v3195_v4, inf  ;;  %v3201_v33 = vand.u32 2147483648, %v3195_v4  ;;  %vm3200_vm1 = vcmp.eq.f32.partialorder %v3195_v4, 0.0 }
 0x9d1   :  { %v3976_v59 = vpop.eup %3975 }
 0x9d2   :  { %v3197_v8 = vmul.f32 %v3976_v59, %v3195_v4 }
 0x9d4   :  { %v3199_v19 = vsel %vm3198_vm0, %v3195_v4, %v3197_v8 }
 0x9d5   :  { %v3202_v10 = vsel %vm3200_vm1, %v3201_v33, %v3199_v19 }
 0x9d6   :  { %v3203_v22 = vmax.f32 %v3202_v10, 1e-12 }
 0x9d8   :  { %3977 = vrcp.f32 %v3203_v22 }
 0x9e2   :  { %v3978_v28 = vpop.eup %3977 }
 0x9e3   :  { %v3205_v53 = vmul.f32 %v3978_v28, %v3186_v49 }
 0x9e5   :  { %3206 = vst.msk [vmem:[%s5700_s15] sm:$0xff] %vm3192_vm15, %v3205_v53 }
 0x9e6   :  { %3211 = vsyncpa [#allocation3], 1 }

</bundles_post_ra>
